<compile_context>
chip_gen: v5e
topology: v5e:2x2
jax: 0.10.0
libtpu: 0.0.40
codegen_flags: <defaults>
</compile_context>

<pallas_src>
import functools

import jax
import jax.numpy as jnp
import numpy as np
from jax.experimental import pallas as pl
from jax.experimental.pallas import tpu as pltpu

_LANE = 128


def _round_up(x, m):
    return ((x + m - 1) // m) * m


def _vmem_limits():
    """Generation-aware scoped-VMEM limit and planning budget (bytes)."""
    try:
        phys = int(pltpu.get_tpu_info().vmem_capacity_bytes)
    except Exception:
        phys = 64 * 1024 * 1024                      # conservative (v7x-sized) fallback
    limit = min(max(phys - 16 * 1024 * 1024, 32 * 1024 * 1024), 100 * 1024 * 1024)
    return limit, (limit * 3) // 4


def _choose_row_tile(n, fin_p, f_p, k, budget):
    """Largest row tile whose double-buffered working set fits the budget."""
    n128 = _round_up(max(n, 1), _LANE)
    for tm in (1024, 512, 256, 128):
        tm_e = min(tm, n128)
        n_p = _round_up(max(n, 1), tm_e)
        # Fused Chebyshev-hop kernel working set.
        hop = (2 * tm_e * n_p * 2          # streamed bf16 L row block (double buffered)
               + 2 * n_p * f_p * 2         # resident bf16 H input (assume 2 buffers)
               + 2 * n_p * f_p * 2         # ping-pong Z scratch (2 slots, bf16)
               + 2 * tm_e * f_p * 2)       # bf16 Z output block (double buffered)
        # Fused gate kernel working set.
        km1 = max(k - 1, 0)
        gate = (2 * tm_e * (fin_p + f_p + km1 * f_p) * 2   # x, h, zcat rows (bf16)
                + 2 * tm_e * f_p * 4                        # c row (f32)
                + 2 * (fin_p + k * f_p) * 4 * f_p * 2       # fused bf16 weights
                + 2 * 2 * tm_e * f_p * 4                    # h_out, c_out rows (f32)
                + 2 * tm_e * 4 * f_p * 4)                   # f32 pre-activation temps
        if max(hop, gate) <= budget:
            return tm_e
    # TODO(synk): for very large N also tile the contraction (column) axis of L_hat.
    return min(128, n128)


def _compiler_params(semantics, vmem_limit):
    return pltpu.CompilerParams(dimension_semantics=semantics,
                                vmem_limit_bytes=int(vmem_limit))


# --------------------------------------------------------------------------------------
# Kernel A: all K-1 Chebyshev hops fused in one call.
#   grid = (K-1, n_p // tm); hop axis outer (sequential), row axis inner (sequential —
#   scratch is core-private, so rows must NOT be sharded across TensorCores here).
#   zbuf scratch holds two [n_p, f_p] bf16 slabs flattened to [2*n_p, f_p]:
#   slot role alternates with hop parity (Z_{k-2} rows are overwritten in place by Z_k).
# --------------------------------------------------------------------------------------
def _cheb_fused_kernel(l_ref, h_ref, zcat_ref, zbuf_ref, *, tm, n_p):
    h = pl.program_id(0)                       # hop index; computes Z_{h+1}
    i = pl.program_id(1)                       # row-tile index
    row0 = pl.multiple_of(i * tm, tm)

    @pl.when(h == 0)
    def _():
        # Seed Z_0 (= H) rows into slot 1 (needed by hop 1's subtraction) and
        # compute Z_1 = L_hat @ H into slot 0 (f32 MXU accumulation, bf16 store).
        zbuf_ref[pl.ds(n_p + row0, tm), :] = h_ref[pl.ds(row0, tm), :]
        acc = jnp.dot(l_ref[...], h_ref[...], preferred_element_type=jnp.float32)
        zb = acc.astype(jnp.bfloat16)
        zbuf_ref[pl.ds(row0, tm), :] = zb
        zcat_ref[...] = zb

    @pl.when(h > 0)
    def _():
        # Z_{h+1} = 2 * L_hat @ Z_h - Z_{h-1}; buffer roles alternate with hop parity.
        read_base = pl.multiple_of(((h + 1) % 2) * n_p, tm)    # holds Z_h
        write_base = pl.multiple_of((h % 2) * n_p, tm)         # holds Z_{h-1}, reused
        z_prev = zbuf_ref[pl.ds(read_base, n_p), :]
        acc = jnp.dot(l_ref[...], z_prev, preferred_element_type=jnp.float32)
        z_pp = zbuf_ref[pl.ds(write_base + row0, tm), :].astype(jnp.float32)
        zb = (2.0 * acc - z_pp).astype(jnp.bfloat16)
        zbuf_ref[pl.ds(write_base + row0, tm), :] = zb
        zcat_ref[...] = zb


def _run_cheb_hops(l_bf16, h_bf16, K, tm, vmem_limit):
    """Returns bf16 [n_p, (K-1)*f_p] slab of stacked Z_1 .. Z_{K-1}."""
    n_p = l_bf16.shape[0]
    f_p = h_bf16.shape[1]
    return pl.pallas_call(
        functools.partial(_cheb_fused_kernel, tm=tm, n_p=n_p),
        out_shape=jax.ShapeDtypeStruct((n_p, (K - 1) * f_p), jnp.bfloat16),
        grid=(K - 1, n_p // tm),
        in_specs=[
            pl.BlockSpec((tm, n_p), lambda h, i: (i, 0)),    # streamed bf16 L row block
            pl.BlockSpec((n_p, f_p), lambda h, i: (0, 0)),   # resident bf16 H (fetched once)
        ],
        out_specs=pl.BlockSpec((tm, f_p), lambda h, i: (i, h)),
        scratch_shapes=[pltpu.VMEM((2 * n_p, f_p), jnp.bfloat16)],
        compiler_params=_compiler_params(("arbitrary", "arbitrary"), vmem_limit),
    )(l_bf16, h_bf16)


# --------------------------------------------------------------------------------------
# Kernel B: fused LSTM gate math.  One [TM, 4*F] bf16-operand / f32-accumulate
# pre-activation slab per row tile; two lane-dense (TM, F) outputs (H_new, C_new).
# --------------------------------------------------------------------------------------
def _gate_kernel(*refs, f_p, has_hops):
    if has_hops:
        (x_ref, h_ref, c_ref, z_ref, w_ref, wc0_ref, wcr_ref, b_ref,
         h_out_ref, c_out_ref) = refs
    else:
        x_ref, h_ref, c_ref, w_ref, wc0_ref, b_ref, h_out_ref, c_out_ref = refs
        z_ref = wcr_ref = None

    # Fused gate pre-activations (gate order i, f, c, o along lanes).
    pre = jnp.dot(x_ref[...], w_ref[...], preferred_element_type=jnp.float32)
    pre = pre + jnp.dot(h_ref[...], wc0_ref[...], preferred_element_type=jnp.float32)
    if has_hops:
        pre = pre + jnp.dot(z_ref[...], wcr_ref[...], preferred_element_type=jnp.float32)
    pre = pre + b_ref[...]

    i_g = jax.nn.sigmoid(pre[:, 0 * f_p:1 * f_p])
    f_g = jax.nn.sigmoid(pre[:, 1 * f_p:2 * f_p])
    t_g = jnp.tanh(pre[:, 2 * f_p:3 * f_p])
    o_g = jax.nn.sigmoid(pre[:, 3 * f_p:4 * f_p])

    c_new = f_g * c_ref[...] + i_g * t_g
    h_out_ref[...] = o_g * jnp.tanh(c_new)
    c_out_ref[...] = c_new


# --------------------------------------------------------------------------------------
# Wrapper
# --------------------------------------------------------------------------------------
def gclstm_forward(X, L_hat, params, H=None, C=None, *, K):
    """GCLSTM forward: returns (H_new, C_new), matching the PyTorch module."""
    assert K >= 1
    N, f_in = X.shape
    f_out = params["W"].shape[-1]
    if H is None:
        H = jnp.zeros((N, f_out), jnp.float32)
    if C is None:
        C = jnp.zeros((N, f_out), jnp.float32)

    f_p = _round_up(f_out, _LANE)
    fin_p = _round_up(f_in, _LANE)
    vmem_limit, vmem_budget = _vmem_limits()
    tm = _choose_row_tile(N, fin_p, f_p, K, vmem_budget)
    n_p = _round_up(N, tm)

    # ---- padded operands (plain-JAX glue); bf16 built directly, C kept in f32 ----
    x_p = jnp.zeros((n_p, fin_p), jnp.bfloat16).at[:N, :f_in].set(X.astype(jnp.bfloat16))
    h_p = jnp.zeros((n_p, f_p), jnp.bfloat16).at[:N, :f_out].set(H.astype(jnp.bfloat16))
    c_p = jnp.zeros((n_p, f_p), jnp.float32).at[:N, :f_out].set(C.astype(jnp.float32))
    l_p = jnp.zeros((n_p, n_p), jnp.bfloat16).at[:N, :N].set(L_hat.astype(jnp.bfloat16))

    # ---- fused, padded weights (bf16 operands; bias stays f32) ----
    # TODO(synk): for recurrent rollouts hoist this weight packing (and l_p) out of the
    # per-step path and alias H/C via input_output_aliases.
    w_pad = jnp.zeros((4, fin_p, f_p), jnp.float32).at[:, :f_in, :f_out].set(params["W"])
    w_all = w_pad.transpose(1, 0, 2).reshape(fin_p, 4 * f_p).astype(jnp.bfloat16)
    wc_pad = (jnp.zeros((4, K, f_p, f_p), jnp.float32)
              .at[:, :, :f_out, :f_out].set(params["Wcheb"]))
    wc_flat = wc_pad.transpose(1, 2, 0, 3).reshape(K * f_p, 4 * f_p).astype(jnp.bfloat16)
    wc0 = wc_flat[:f_p]                                    # applied to Z_0 = H
    wcr = wc_flat[f_p:]                                    # applied to Z_1 .. Z_{K-1}
    b_total = (params["b"] + params["bcheb"])[:, 0, :]     # [4, F_out]
    b_flat = (jnp.zeros((4, f_p), jnp.float32).at[:, :f_out].set(b_total)
              ).reshape(1, 4 * f_p)

    # ---- Chebyshev recursion on H, all hops fused into one kernel ----
    has_hops = K > 1
    z_cat = _run_cheb_hops(l_p, h_p, K, tm, vmem_limit) if has_hops else None

    # ---- fused gate kernel ----
    def row(cols):
        return pl.BlockSpec((tm, cols), lambda i: (i, 0))

    def full(r, c):
        return pl.BlockSpec((r, c), lambda i: (0, 0))

    if has_hops:
        args = (x_p, h_p, c_p, z_cat, w_all, wc0, wcr, b_flat)
        in_specs = [row(fin_p), row(f_p), row(f_p), row((K - 1) * f_p),
                    full(fin_p, 4 * f_p), full(f_p, 4 * f_p),
                    full((K - 1) * f_p, 4 * f_p), full(1, 4 * f_p)]
    else:
        args = (x_p, h_p, c_p, w_all, wc0, b_flat)
        in_specs = [row(fin_p), row(f_p), row(f_p),
                    full(fin_p, 4 * f_p), full(f_p, 4 * f_p), full(1, 4 * f_p)]

    h_new_p, c_new_p = pl.pallas_call(
        functools.partial(_gate_kernel, f_p=f_p, has_hops=has_hops),
        out_shape=(jax.ShapeDtypeStruct((n_p, f_p), jnp.float32),
                   jax.ShapeDtypeStruct((n_p, f_p), jnp.float32)),
        grid=(n_p // tm,),
        in_specs=in_specs,
        out_specs=[row(f_p), row(f_p)],
        compiler_params=_compiler_params(("parallel",), vmem_limit),
    )(*args)

    return h_new_p[:N, :f_out], c_new_p[:N, :f_out]


# --------------------------------------------------------------------------------------
# Graph prep, init, reference
# --------------------------------------------------------------------------------------
def scaled_laplacian(edge_index, edge_weight, num_nodes, lambda_max=2.0):
    """Dense L_hat = 2/lambda_max * (I - D^{-1/2} A D^{-1/2}) - I  ("sym" norm)."""
    src, dst = edge_index
    A = jnp.zeros((num_nodes, num_nodes), jnp.float32).at[src, dst].add(edge_weight)
    deg = A.sum(axis=1)
    dinv = jnp.where(deg > 0, 1.0 / jnp.sqrt(deg), 0.0)
    A_norm = dinv[:, None] * A * dinv[None, :]
    L = jnp.eye(num_nodes, dtype=jnp.float32) - A_norm
    return 2.0 * L / lambda_max - jnp.eye(num_nodes, dtype=jnp.float32)


def _glorot(key, shape):
    fan_in, fan_out = shape[-2], shape[-1]
    a = float(np.sqrt(6.0 / (fan_in + fan_out)))
    return jax.random.uniform(key, shape, jnp.float32, minval=-a, maxval=a)


def init_params(key, in_channels, out_channels, K):
    k1, k2 = jax.random.split(key)
    return {
        # gates ordered (i, f, c, o)
        "W": _glorot(k1, (4, in_channels, out_channels)),
        "b": jnp.zeros((4, 1, out_channels), jnp.float32),
        "Wcheb": _glorot(k2, (4, K, out_channels, out_channels)),
        "bcheb": jnp.zeros((4, 1, out_channels), jnp.float32),
    }


def _reference(X, L_hat, params, H, C, K):
    """Pure-JAX f32 reference of the GCLSTM forward."""
    Z = [H]
    if K > 1:
        Z.append(L_hat @ H)
    for _ in range(2, K):
        Z.append(2.0 * (L_hat @ Z[-1]) - Z[-2])

    def gate(g):
        out = X @ params["W"][g]
        for k in range(K):
            out = out + Z[k] @ params["Wcheb"][g, k]
        return out + params["bcheb"][g] + params["b"][g]

    I = jax.nn.sigmoid(gate(0))
    F = jax.nn.sigmoid(gate(1))
    T = jnp.tanh(gate(2))
    O = jax.nn.sigmoid(gate(3))
    C_new = F * C + I * T
    H_new = O * jnp.tanh(C_new)
    return H_new, C_new


if __name__ == "__main__":
    N = 16            # number of graph nodes
    IN_CHANNELS = 4
    OUT_CHANNELS = 8
    K = 3             # Chebyshev filter size

    key = jax.random.PRNGKey(0)
    kx, kp, kh, kc = jax.random.split(key, 4)

    X = jax.random.normal(kx, (N, IN_CHANNELS), jnp.float32)

    # Undirected ring graph: edge_index [2, 2N], unit edge weights.
    src = np.concatenate([np.arange(N), (np.arange(N) + 1) % N])
    dst = np.concatenate([(np.arange(N) + 1) % N, np.arange(N)])
    edge_index = jnp.asarray(np.stack([src, dst]), jnp.int32)
    edge_weight = jnp.ones((edge_index.shape[1],), jnp.float32)

    # lambda_max defaults to 2.0 for "sym" normalization (matches ChebConv).
    L_hat = scaled_laplacian(edge_index, edge_weight, N, lambda_max=2.0)

    params = init_params(kp, IN_CHANNELS, OUT_CHANNELS, K)

    # Non-zero H/C so the Chebyshev and cell-update paths are actually exercised.
    H0 = jax.random.normal(kh, (N, OUT_CHANNELS), jnp.float32)
    C0 = jax.random.normal(kc, (N, OUT_CHANNELS), jnp.float32)

    fwd = jax.jit(functools.partial(gclstm_forward, K=K))
    H_new, C_new = fwd(X, L_hat, params, H0, C0)
    jax.block_until_ready((H_new, C_new))

    H_ref, C_ref = _reference(X, L_hat, params, H0, C0, K)
    # Tolerance accounts for bf16 operands (f32 MXU accumulation) on the Laplacian
    # recursion and gate matmuls; the cell update and activations run in f32.
    np.testing.assert_allclose(np.asarray(H_new), np.asarray(H_ref), rtol=4e-2, atol=4e-2)
    np.testing.assert_allclose(np.asarray(C_new), np.asarray(C_ref), rtol=4e-2, atol=4e-2)

    print("KERNEL_OK")
</pallas_src>

<mosaic_0001>
module attributes {stable_mosaic.version = 11 : i64} {
  func.func @_cheb_fused_kernel(%arg0: i32, %arg1: i32, %arg2: memref<128x128xbf16, #tpu.memory_space<vmem>>, %arg3: memref<128x128xbf16, #tpu.memory_space<vmem>>, %arg4: memref<128x128xbf16, #tpu.memory_space<vmem>>, %arg5: memref<256x128xbf16, #tpu.memory_space<vmem>>) attributes {dimension_semantics = [#tpu.dimension_semantics<arbitrary>, #tpu.dimension_semantics<arbitrary>], iteration_bounds = array<i64: 2, 1>, scalar_prefetch = 0 : i64, scratch_operands = 1 : i64, tpu.core_type = #tpu.core_type<tc>, window_params = [{transform_indices = @transform_0, window_bounds = array<i64: 128, 128>}, {pipeline_mode = #tpu.pipeline_mode<synchronous>, transform_indices = @transform_1, window_bounds = array<i64: 128, 128>}, {transform_indices = @transform_2, window_bounds = array<i64: 128, 128>}]} {
    %c128_i32 = arith.constant 128 : i32
    %0 = arith.muli %arg1, %c128_i32 : i32
    %1 = tpu.assume_multiple %0, 128 : i32
    %c0_i32 = arith.constant 0 : i32
    %2 = arith.cmpi eq, %arg0, %c0_i32 : i32
    %3 = arith.extui %2 : i1 to i32
    %c0_i32_0 = arith.constant 0 : i32
    %4 = arith.cmpi ne, %3, %c0_i32_0 : i32
    scf.if %4 {
      %8 = arith.index_cast %1 : i32 to index
      %c0 = arith.constant 0 : index
      %9 = vector.load %arg3[%8, %c0] : memref<128x128xbf16, #tpu.memory_space<vmem>>, vector<128x128xbf16>
      %c128_i32_3 = arith.constant 128 : i32
      %10 = arith.addi %c128_i32_3, %1 : i32
      %11 = arith.index_cast %10 : i32 to index
      %c0_4 = arith.constant 0 : index
      %12 = vector.load %arg5[%11, %c0_4] : memref<256x128xbf16, #tpu.memory_space<vmem>>, vector<128x128xbf16>
      tpu.vector_store %arg5[%11, %c0_4], %9 {strides = array<i32>} : memref<256x128xbf16, #tpu.memory_space<vmem>>, vector<128x128xbf16>,
      %c0_5 = arith.constant 0 : index
      %c0_6 = arith.constant 0 : index
      %13 = vector.load %arg2[%c0_5, %c0_6] : memref<128x128xbf16, #tpu.memory_space<vmem>>, vector<128x128xbf16>
      %c0_7 = arith.constant 0 : index
      %c0_8 = arith.constant 0 : index
      %14 = vector.load %arg3[%c0_7, %c0_8] : memref<128x128xbf16, #tpu.memory_space<vmem>>, vector<128x128xbf16>
      %cst = arith.constant dense<0.000000e+00> : vector<128x128xf32>
      %15 = tpu.matmul %13, %14, %cst {dimension_numbers = #tpu.dot_dimension_numbers<[1], [0], [0], [1], [0, 0, 1, 1], [], []>} : vector<128x128xbf16>, vector<128x128xbf16>, vector<128x128xf32> -> vector<128x128xf32>
      %16 = arith.truncf %15 : vector<128x128xf32> to vector<128x128xbf16>
      %17 = arith.index_cast %1 : i32 to index
      %c0_9 = arith.constant 0 : index
      %18 = vector.load %arg5[%17, %c0_9] : memref<256x128xbf16, #tpu.memory_space<vmem>>, vector<128x128xbf16>
      tpu.vector_store %arg5[%17, %c0_9], %16 {strides = array<i32>} : memref<256x128xbf16, #tpu.memory_space<vmem>>, vector<128x128xbf16>,
      %c0_10 = arith.constant 0 : index
      %c0_11 = arith.constant 0 : index
      %19 = vector.load %arg4[%c0_10, %c0_11] : memref<128x128xbf16, #tpu.memory_space<vmem>>, vector<128x128xbf16>
      tpu.vector_store %arg4[%c0_10, %c0_11], %16 {strides = array<i32>} : memref<128x128xbf16, #tpu.memory_space<vmem>>, vector<128x128xbf16>,
    } else {
    }
    %c0_i32_1 = arith.constant 0 : i32
    %5 = arith.cmpi sgt, %arg0, %c0_i32_1 : i32
    %6 = arith.extui %5 : i1 to i32
    %c0_i32_2 = arith.constant 0 : i32
    %7 = arith.cmpi ne, %6, %c0_i32_2 : i32
    scf.if %7 {
      %c1_i32 = arith.constant 1 : i32
      %8 = arith.addi %arg0, %c1_i32 : i32
      %c2_i32 = arith.constant 2 : i32
      %c0_i32_3 = arith.constant 0 : i32
      %9 = arith.cmpi eq, %c2_i32, %c0_i32_3 : i32
      %c1_i32_4 = arith.constant 1 : i32
      %10 = arith.select %9, %c1_i32_4, %c2_i32 : i32
      %11 = arith.remsi %8, %10 : i32
      %c0_i32_5 = arith.constant 0 : i32
      %12 = arith.cmpi ne, %11, %c0_i32_5 : i32
      %c0_i32_6 = arith.constant 0 : i32
      %13 = arith.cmpi slt, %11, %c0_i32_6 : i32
      %c0_i32_7 = arith.constant 0 : i32
      %14 = arith.cmpi slt, %10, %c0_i32_7 : i32
      %15 = arith.xori %13, %14 : i1
      %16 = arith.andi %15, %12 : i1
      %17 = arith.addi %11, %10 : i32
      %18 = arith.select %16, %17, %11 : i32
      %c128_i32_8 = arith.constant 128 : i32
      %19 = arith.muli %18, %c128_i32_8 : i32
      %20 = tpu.assume_multiple %19, 128 : i32
      %c2_i32_9 = arith.constant 2 : i32
      %c0_i32_10 = arith.constant 0 : i32
      %21 = arith.cmpi eq, %c2_i32_9, %c0_i32_10 : i32
      %c1_i32_11 = arith.constant 1 : i32
      %22 = arith.select %21, %c1_i32_11, %c2_i32_9 : i32
      %23 = arith.remsi %arg0, %22 : i32
      %c0_i32_12 = arith.constant 0 : i32
      %24 = arith.cmpi ne, %23, %c0_i32_12 : i32
      %c0_i32_13 = arith.constant 0 : i32
      %25 = arith.cmpi slt, %23, %c0_i32_13 : i32
      %c0_i32_14 = arith.constant 0 : i32
      %26 = arith.cmpi slt, %22, %c0_i32_14 : i32
      %27 = arith.xori %25, %26 : i1
      %28 = arith.andi %27, %24 : i1
      %29 = arith.addi %23, %22 : i32
      %30 = arith.select %28, %29, %23 : i32
      %c128_i32_15 = arith.constant 128 : i32
      %31 = arith.muli %30, %c128_i32_15 : i32
      %32 = tpu.assume_multiple %31, 128 : i32
      %33 = arith.index_cast %20 : i32 to index
      %c0 = arith.constant 0 : index
      %34 = vector.load %arg5[%33, %c0] : memref<256x128xbf16, #tpu.memory_space<vmem>>, vector<128x128xbf16>
      %c0_16 = arith.constant 0 : index
      %c0_17 = arith.constant 0 : index
      %35 = vector.load %arg2[%c0_16, %c0_17] : memref<128x128xbf16, #tpu.memory_space<vmem>>, vector<128x128xbf16>
      %cst = arith.constant dense<0.000000e+00> : vector<128x128xf32>
      %36 = tpu.matmul %35, %34, %cst {dimension_numbers = #tpu.dot_dimension_numbers<[1], [0], [0], [1], [0, 0, 1, 1], [], []>} : vector<128x128xbf16>, vector<128x128xbf16>, vector<128x128xf32> -> vector<128x128xf32>
      %37 = arith.addi %32, %1 : i32
      %38 = arith.index_cast %37 : i32 to index
      %c0_18 = arith.constant 0 : index
      %39 = vector.load %arg5[%38, %c0_18] : memref<256x128xbf16, #tpu.memory_space<vmem>>, vector<128x128xbf16>
      %40 = arith.extf %39 : vector<128x128xbf16> to vector<128x128xf32>
      %cst_19 = arith.constant 2.000000e+00 : f32
      %41 = vector.broadcast %cst_19 : f32 to vector<128x128xf32>
      %42 = arith.mulf %41, %36 : vector<128x128xf32>
      %43 = arith.subf %42, %40 : vector<128x128xf32>
      %44 = arith.truncf %43 : vector<128x128xf32> to vector<128x128xbf16>
      %45 = arith.addi %32, %1 : i32
      %46 = arith.index_cast %45 : i32 to index
      %c0_20 = arith.constant 0 : index
      %47 = vector.load %arg5[%46, %c0_20] : memref<256x128xbf16, #tpu.memory_space<vmem>>, vector<128x128xbf16>
      tpu.vector_store %arg5[%46, %c0_20], %44 {strides = array<i32>} : memref<256x128xbf16, #tpu.memory_space<vmem>>, vector<128x128xbf16>,
      %c0_21 = arith.constant 0 : index
      %c0_22 = arith.constant 0 : index
      %48 = vector.load %arg4[%c0_21, %c0_22] : memref<128x128xbf16, #tpu.memory_space<vmem>>, vector<128x128xbf16>
      tpu.vector_store %arg4[%c0_21, %c0_22], %44 {strides = array<i32>} : memref<128x128xbf16, #tpu.memory_space<vmem>>, vector<128x128xbf16>,
    } else {
    }
    return
  }
  func.func @transform_0(%arg0: i32, %arg1: i32) -> (i32, i32) {
    %c0_i32 = arith.constant 0 : i32
    %c0_i32_0 = arith.constant 0 : i32
    return %arg1, %c0_i32 : i32, i32
  }
  func.func @transform_1(%arg0: i32, %arg1: i32) -> (i32, i32) {
    %c0_i32 = arith.constant 0 : i32
    %c0_i32_0 = arith.constant 0 : i32
    %c0_i32_1 = arith.constant 0 : i32
    return %c0_i32, %c0_i32_0 : i32, i32
  }
  func.func @transform_2(%arg0: i32, %arg1: i32) -> (i32, i32) {
    %c0_i32 = arith.constant 0 : i32
    return %arg1, %arg0 : i32, i32
  }
}

module attributes {stable_mosaic.version = 11 : i64} {
  func.func @_gate_kernel(%arg0: i32, %arg1: memref<128x128xbf16, #tpu.memory_space<vmem>>, %arg2: memref<128x128xbf16, #tpu.memory_space<vmem>>, %arg3: memref<128x128xf32, #tpu.memory_space<vmem>>, %arg4: memref<128x256xbf16, #tpu.memory_space<vmem>>, %arg5: memref<128x512xbf16, #tpu.memory_space<vmem>>, %arg6: memref<128x512xbf16, #tpu.memory_space<vmem>>, %arg7: memref<256x512xbf16, #tpu.memory_space<vmem>>, %arg8: memref<1x512xf32, #tpu.memory_space<vmem>>, %arg9: memref<128x128xf32, #tpu.memory_space<vmem>>, %arg10: memref<128x128xf32, #tpu.memory_space<vmem>>) attributes {dimension_semantics = [#tpu.dimension_semantics<parallel>], iteration_bounds = array<i64: 1>, scalar_prefetch = 0 : i64, scratch_operands = 0 : i64, tpu.core_type = #tpu.core_type<tc>, window_params = [{transform_indices = @transform_0, window_bounds = array<i64: 128, 128>}, {transform_indices = @transform_1, window_bounds = array<i64: 128, 128>}, {transform_indices = @transform_2, window_bounds = array<i64: 128, 128>}, {transform_indices = @transform_3, window_bounds = array<i64: 128, 256>}, {pipeline_mode = #tpu.pipeline_mode<synchronous>, transform_indices = @transform_4, window_bounds = array<i64: 128, 512>}, {pipeline_mode = #tpu.pipeline_mode<synchronous>, transform_indices = @transform_5, window_bounds = array<i64: 128, 512>}, {pipeline_mode = #tpu.pipeline_mode<synchronous>, transform_indices = @transform_6, window_bounds = array<i64: 256, 512>}, {pipeline_mode = #tpu.pipeline_mode<synchronous>, transform_indices = @transform_7, window_bounds = array<i64: 1, 512>}, {transform_indices = @transform_8, window_bounds = array<i64: 128, 128>}, {transform_indices = @transform_9, window_bounds = array<i64: 128, 128>}]} {
    %c0 = arith.constant 0 : index
    %c0_0 = arith.constant 0 : index
    %0 = vector.load %arg1[%c0, %c0_0] : memref<128x128xbf16, #tpu.memory_space<vmem>>, vector<128x128xbf16>
    %c0_1 = arith.constant 0 : index
    %c0_2 = arith.constant 0 : index
    %1 = vector.load %arg5[%c0_1, %c0_2] : memref<128x512xbf16, #tpu.memory_space<vmem>>, vector<128x512xbf16>
    %cst = arith.constant dense<0.000000e+00> : vector<128x512xf32>
    %2 = tpu.matmul %0, %1, %cst {dimension_numbers = #tpu.dot_dimension_numbers<[1], [0], [0], [1], [0, 0, 1, 1], [], []>} : vector<128x128xbf16>, vector<128x512xbf16>, vector<128x512xf32> -> vector<128x512xf32>
    %c0_3 = arith.constant 0 : index
    %c0_4 = arith.constant 0 : index
    %3 = vector.load %arg2[%c0_3, %c0_4] : memref<128x128xbf16, #tpu.memory_space<vmem>>, vector<128x128xbf16>
    %c0_5 = arith.constant 0 : index
    %c0_6 = arith.constant 0 : index
    %4 = vector.load %arg6[%c0_5, %c0_6] : memref<128x512xbf16, #tpu.memory_space<vmem>>, vector<128x512xbf16>
    %cst_7 = arith.constant dense<0.000000e+00> : vector<128x512xf32>
    %5 = tpu.matmul %3, %4, %cst_7 {dimension_numbers = #tpu.dot_dimension_numbers<[1], [0], [0], [1], [0, 0, 1, 1], [], []>} : vector<128x128xbf16>, vector<128x512xbf16>, vector<128x512xf32> -> vector<128x512xf32>
    %6 = arith.addf %2, %5 : vector<128x512xf32>
    %c0_8 = arith.constant 0 : index
    %c0_9 = arith.constant 0 : index
    %7 = vector.load %arg4[%c0_8, %c0_9] : memref<128x256xbf16, #tpu.memory_space<vmem>>, vector<128x256xbf16>
    %c0_10 = arith.constant 0 : index
    %c0_11 = arith.constant 0 : index
    %8 = vector.load %arg7[%c0_10, %c0_11] : memref<256x512xbf16, #tpu.memory_space<vmem>>, vector<256x512xbf16>
    %cst_12 = arith.constant dense<0.000000e+00> : vector<128x512xf32>
    %9 = tpu.matmul %7, %8, %cst_12 {dimension_numbers = #tpu.dot_dimension_numbers<[1], [0], [0], [1], [0, 0, 1, 1], [], []>} : vector<128x256xbf16>, vector<256x512xbf16>, vector<128x512xf32> -> vector<128x512xf32>
    %10 = arith.addf %6, %9 : vector<128x512xf32>
    %c0_13 = arith.constant 0 : index
    %c0_14 = arith.constant 0 : index
    %11 = vector.load %arg8[%c0_13, %c0_14] : memref<1x512xf32, #tpu.memory_space<vmem>>, vector<1x512xf32>
    %12 = vector.broadcast %11 : vector<1x512xf32> to vector<128x512xf32>
    %13 = arith.addf %10, %12 : vector<128x512xf32>
    %14 = vector.extract_strided_slice %13 {offsets = [0, 0], sizes = [128, 128], strides = [1, 1]} : vector<128x512xf32> to vector<128x128xf32>
    %15 = arith.negf %14 : vector<128x128xf32>
    %16 = math.exp %15 : vector<128x128xf32>
    %cst_15 = arith.constant 1.000000e+00 : f32
    %17 = vector.broadcast %cst_15 : f32 to vector<128x128xf32>
    %18 = arith.addf %17, %16 : vector<128x128xf32>
    %19 = arith.divf %17, %18 : vector<128x128xf32>
    %20 = vector.extract_strided_slice %13 {offsets = [0, 128], sizes = [128, 128], strides = [1, 1]} : vector<128x512xf32> to vector<128x128xf32>
    %21 = arith.negf %20 : vector<128x128xf32>
    %22 = math.exp %21 : vector<128x128xf32>
    %cst_16 = arith.constant 1.000000e+00 : f32
    %23 = vector.broadcast %cst_16 : f32 to vector<128x128xf32>
    %24 = arith.addf %23, %22 : vector<128x128xf32>
    %25 = arith.divf %23, %24 : vector<128x128xf32>
    %26 = vector.extract_strided_slice %13 {offsets = [0, 256], sizes = [128, 128], strides = [1, 1]} : vector<128x512xf32> to vector<128x128xf32>
    %27 = math.tanh %26 : vector<128x128xf32>
    %28 = vector.extract_strided_slice %13 {offsets = [0, 384], sizes = [128, 128], strides = [1, 1]} : vector<128x512xf32> to vector<128x128xf32>
    %29 = arith.negf %28 : vector<128x128xf32>
    %30 = math.exp %29 : vector<128x128xf32>
    %cst_17 = arith.constant 1.000000e+00 : f32
    %31 = vector.broadcast %cst_17 : f32 to vector<128x128xf32>
    %32 = arith.addf %31, %30 : vector<128x128xf32>
    %33 = arith.divf %31, %32 : vector<128x128xf32>
    %c0_18 = arith.constant 0 : index
    %c0_19 = arith.constant 0 : index
    %34 = vector.load %arg3[%c0_18, %c0_19] : memref<128x128xf32, #tpu.memory_space<vmem>>, vector<128x128xf32>
    %35 = arith.mulf %25, %34 : vector<128x128xf32>
    %36 = arith.mulf %19, %27 : vector<128x128xf32>
    %37 = arith.addf %35, %36 : vector<128x128xf32>
    %38 = math.tanh %37 : vector<128x128xf32>
    %39 = arith.mulf %33, %38 : vector<128x128xf32>
    %c0_20 = arith.constant 0 : index
    %c0_21 = arith.constant 0 : index
    %40 = vector.load %arg9[%c0_20, %c0_21] : memref<128x128xf32, #tpu.memory_space<vmem>>, vector<128x128xf32>
    tpu.vector_store %arg9[%c0_20, %c0_21], %39 {strides = array<i32>} : memref<128x128xf32, #tpu.memory_space<vmem>>, vector<128x128xf32>,
    %c0_22 = arith.constant 0 : index
    %c0_23 = arith.constant 0 : index
    %41 = vector.load %arg10[%c0_22, %c0_23] : memref<128x128xf32, #tpu.memory_space<vmem>>, vector<128x128xf32>
    tpu.vector_store %arg10[%c0_22, %c0_23], %37 {strides = array<i32>} : memref<128x128xf32, #tpu.memory_space<vmem>>, vector<128x128xf32>,
    return
  }
  func.func @transform_0(%arg0: i32) -> (i32, i32) {
    %c0_i32 = arith.constant 0 : i32
    %c0_i32_0 = arith.constant 0 : i32
    return %arg0, %c0_i32 : i32, i32
  }
  func.func @transform_1(%arg0: i32) -> (i32, i32) {
    %c0_i32 = arith.constant 0 : i32
    %c0_i32_0 = arith.constant 0 : i32
    return %arg0, %c0_i32 : i32, i32
  }
  func.func @transform_2(%arg0: i32) -> (i32, i32) {
    %c0_i32 = arith.constant 0 : i32
    %c0_i32_0 = arith.constant 0 : i32
    return %arg0, %c0_i32 : i32, i32
  }
  func.func @transform_3(%arg0: i32) -> (i32, i32) {
    %c0_i32 = arith.constant 0 : i32
    %c0_i32_0 = arith.constant 0 : i32
    return %arg0, %c0_i32 : i32, i32
  }
  func.func @transform_4(%arg0: i32) -> (i32, i32) {
    %c0_i32 = arith.constant 0 : i32
    %c0_i32_0 = arith.constant 0 : i32
    %c0_i32_1 = arith.constant 0 : i32
    return %c0_i32, %c0_i32_0 : i32, i32
  }
  func.func @transform_5(%arg0: i32) -> (i32, i32) {
    %c0_i32 = arith.constant 0 : i32
    %c0_i32_0 = arith.constant 0 : i32
    %c0_i32_1 = arith.constant 0 : i32
    return %c0_i32, %c0_i32_0 : i32, i32
  }
  func.func @transform_6(%arg0: i32) -> (i32, i32) {
    %c0_i32 = arith.constant 0 : i32
    %c0_i32_0 = arith.constant 0 : i32
    %c0_i32_1 = arith.constant 0 : i32
    return %c0_i32, %c0_i32_0 : i32, i32
  }
  func.func @transform_7(%arg0: i32) -> (i32, i32) {
    %c0_i32 = arith.constant 0 : i32
    %c0_i32_0 = arith.constant 0 : i32
    %c0_i32_1 = arith.constant 0 : i32
    return %c0_i32, %c0_i32_0 : i32, i32
  }
  func.func @transform_8(%arg0: i32) -> (i32, i32) {
    %c0_i32 = arith.constant 0 : i32
    %c0_i32_0 = arith.constant 0 : i32
    return %arg0, %c0_i32 : i32, i32
  }
  func.func @transform_9(%arg0: i32) -> (i32, i32) {
    %c0_i32 = arith.constant 0 : i32
    %c0_i32_0 = arith.constant 0 : i32
    return %arg0, %c0_i32 : i32, i32
  }
}

</mosaic_0001>

<bundles_post_ra>
// kernel: gclstm_forward.2
= control target key start
LH: loop header
LB: loop body
LE: loop exit
PB: predicated region body
PF: predicated region fallthrough
CT: control target
= control target key end

     0   :  { %s1512_s9 = smov 0   ;;  %s1514_s10 = smov 0   ;;  %s1737_s0 = inlined_call_operand.vmem [shape: bf16[128,128], index: 0, kind: input, shape index: {}]   ;;  %s1738_s1 = inlined_call_operand.vmem [shape: bf16[128,128], index: 1, kind: input, shape index: {}]   ;;  %s1739_s2 = inlined_call_operand.vmem [shape: bf16[128,256], index: 2, kind: output, shape index: {}]  }
   0x1   :  { %s1516_s11 = smov 0   ;;  %s1518_s12 = smov 0  }
   0x2   :  { %s1520_s13 = smov 0  }
   0x3 LB: > { %s944_s14 = sadd.s32 4294967295, %s1495_s13   ;;  %s24_s15 = sadd.s32 1, %s1491_s12  ;;  %s1495_s13 = sphi %s1520_s13, %s12_s13   ;;  %s1491_s12 = sphi %s1518_s12, %s1744_s12   ;;  %s1487_s11 = sphi %s1516_s11, %s1743_s11   ;;  %s1483_s10 = sphi %s1514_s10, %s1742_s10   ;;  %s1479_s9 = sphi %s1512_s9, %s1741_s9  }
   0x4   : > { %p26_p0 = scmp.ge.s32.totalorder %s24_s15, 2  ;;  %s80_s16 = sadd.s32 1, %s1483_s10 }
   0x5   : > { %p90_p1 = scmp.ne.s32.totalorder %s1483_s10, %s1479_s9  ;;  %p91_p2 = scmp.eq.s32.totalorder %s944_s14, 1 }
   0x6   : > { %s1746_s15 = smov (%p26_p0, %s24_s15), 0  ;;  %p948_p4 = scmp.ge.s32.totalorder %s1495_s13, 1 }
   0x7   : > { %p1541_p3 = por %p91_p2, %p90_p1  ;;  %s76_s18 = ssub.s32 %s1491_s12, %s1746_s15 }
   0x8   : > { %p127_p5 = scmp.lt.s32.totalorder %s1495_s13, 3  ;;  %p78_p6 = scmp.eq.s32.totalorder %s76_s18, 0 }
   0xa   : > { %p128_p7 = pnand %p948_p4, %p127_p5 }
   0xb   : > { %s1550_s19 = scalar_select %p78_p6, %s1483_s10, %s80_s16  }
   0xc   : > { %131 = sbr.rel (%p128_p7) target bundleno = 451 (0x1c3), region = 28  ;;  %s145_s20 = sand.u32 (!%p128_p7), 1, %s1479_s9  }
   0xd   : > { %s949_s21 = sshll.u32 (!%p128_p7), %s145_s20, 6  ;;  %p950_p8 = scmp.ne.s32.totalorder (!%p128_p7), %s1487_s11, 0 }
   0xe   : > { %s1552_s22 = scalar_lea.vmem (!%p128_p7), [#allocation3], %s949_s21 }
  0x11   : > { %159 = sbr.rel (%p950_p8) target bundleno = 219 (0xdb), region = 32 }
  0x16   : > { %v164_v0 = vld [vmem:[%s1738_s1] sm:$0xff]   ;;  %v166_v1 = vld [vmem:[%s1738_s1 + $0x8] sm:$0xff]   ;;  %v168_v2 = vld [vmem:[%s1738_s1 + $0x10] sm:$0xff]  }
  0x17   : > { %v170_v3 = vld [vmem:[%s1738_s1 + $0x18] sm:$0xff]   ;;  %951 = vst [vmem:[#allocation2 + $0x40] sm:$0xff] %v164_v0   ;;  %v172_v4 = vld [vmem:[%s1738_s1 + $0x20] sm:$0xff]   ;;  %v174_v6 = vld [vmem:[%s1738_s1 + $0x28] sm:$0xff]  }
  0x18   : > { %953 = vst [vmem:[#allocation2 + $0x48] sm:$0xff] %v166_v1   ;;  %v1125_v5 = vld [vmem:[%s1738_s1 + $0x38] sm:$0xff]  ;;  %v176_v7 = vld [vmem:[%s1738_s1 + $0x30] sm:$0xff]   ;;  %v1123_v10 = vld [vmem:[%s1738_s1 + $0x28] sm:$0xff] }
  0x19   : > { %955 = vst [vmem:[#allocation2 + $0x50] sm:$0xff] %v168_v2   ;;  %329 = vmatpush.bf16.msra.mxu0 %v1125_v5  ;;  %1369 = vmatpush.bf16.msra.mxu1 %v1125_v5  ;;  %v1124_v8 = vld [vmem:[%s1738_s1 + $0x30] sm:$0xff]  ;;  %v178_v9 = vld [vmem:[%s1738_s1 + $0x38] sm:$0xff]   ;;  %v1122_v11 = vld [vmem:[%s1738_s1 + $0x20] sm:$0xff] }
  0x1a   : > { %957 = vst [vmem:[#allocation2 + $0x58] sm:$0xff] %v170_v3   ;;  %1370 = vmatpush.bf16.msra.mxu2 %v1125_v5  ;;  %1371 = vmatpush.bf16.msra.mxu3 %v1125_v5  ;;  %v1121_v12 = vld [vmem:[%s1738_s1 + $0x18] sm:$0xff]  ;;  %v1120_v13 = vld [vmem:[%s1738_s1 + $0x10] sm:$0xff]  ;;  %v1119_v14 = vld [vmem:[%s1738_s1 + $0x8] sm:$0xff] }
  0x1b   : > { %959 = vst [vmem:[#allocation2 + $0x60] sm:$0xff] %v172_v4   ;;  %v1118_v15 = vld [vmem:[%s1738_s1] sm:$0xff]  ;;  %v1112_v17 = vld [vmem:[%s1737_s0 + $0x10] sm:$0xff]  ;;  %v1111_v20 = vld [vmem:[%s1737_s0 + $0x8] sm:$0xff] }
  0x1c   : > { %961 = vst [vmem:[#allocation2 + $0x68] sm:$0xff] %v174_v6   ;;  %v1110_v16 = vld [vmem:[%s1737_s0] sm:$0xff]  ;;  %v1116_v19 = vld [vmem:[%s1737_s0 + $0x30] sm:$0xff]  ;;  %v1113_v21 = vld [vmem:[%s1737_s0 + $0x18] sm:$0xff] }
  0x1d   : > { %963 = vst [vmem:[#allocation2 + $0x70] sm:$0xff] %v176_v7   ;;  %330 = vmatpush.bf16.msra.mxu0 %v1124_v8  ;;  %1372 = vmatpush.bf16.msra.mxu1 %v1124_v8  ;;  %v1114_v18 = vld [vmem:[%s1737_s0 + $0x20] sm:$0xff]  ;;  %v1115_v22 = vld [vmem:[%s1737_s0 + $0x28] sm:$0xff]  ;;  %v1117_v23 = vld [vmem:[%s1737_s0 + $0x38] sm:$0xff] }
  0x1e   : > { %965 = vst [vmem:[#allocation2 + $0x78] sm:$0xff] %v178_v9   ;;  %1373 = vmatpush.bf16.msra.mxu2 %v1124_v8  ;;  %1374 = vmatpush.bf16.msra.mxu3 %v1124_v8 }
  0x21   : > { %331 = vmatpush.bf16.msra.mxu0 %v1123_v10  ;;  %1375 = vmatpush.bf16.msra.mxu1 %v1123_v10 }
  0x22   : > { %1376 = vmatpush.bf16.msra.mxu2 %v1123_v10  ;;  %1377 = vmatpush.bf16.msra.mxu3 %v1123_v10 }
  0x25   : > { %332 = vmatpush.bf16.msra.mxu0 %v1122_v11  ;;  %1378 = vmatpush.bf16.msra.mxu1 %v1122_v11 }
  0x26   : > { %1379 = vmatpush.bf16.msra.mxu2 %v1122_v11  ;;  %1380 = vmatpush.bf16.msra.mxu3 %v1122_v11 }
  0x29   : > { %333 = vmatpush.bf16.msra.mxu0 %v1121_v12  ;;  %1381 = vmatpush.bf16.msra.mxu1 %v1121_v12 }
  0x2a   : > { %1382 = vmatpush.bf16.msra.mxu2 %v1121_v12  ;;  %1383 = vmatpush.bf16.msra.mxu3 %v1121_v12 }
  0x2d   : > { %334 = vmatpush.bf16.msra.mxu0 %v1120_v13  ;;  %1384 = vmatpush.bf16.msra.mxu1 %v1120_v13 }
  0x2e   : > { %1385 = vmatpush.bf16.msra.mxu2 %v1120_v13  ;;  %1386 = vmatpush.bf16.msra.mxu3 %v1120_v13 }
  0x31   : > { %335 = vmatpush.bf16.msra.mxu0 %v1119_v14  ;;  %1387 = vmatpush.bf16.msra.mxu1 %v1119_v14 }
  0x32   : > { %1388 = vmatpush.bf16.msra.mxu2 %v1119_v14  ;;  %1389 = vmatpush.bf16.msra.mxu3 %v1119_v14 }
  0x35   : > { %336 = vmatpush.bf16.msra.mxu0 %v1118_v15  ;;  %1390 = vmatpush.bf16.msra.mxu1 %v1118_v15 }
  0x36   : > { %1391 = vmatpush.bf16.msra.mxu2 %v1118_v15  ;;  %1392 = vmatpush.bf16.msra.mxu3 %v1118_v15 }
  0x38   : > { %337 = vmatmul.bf16.vlgmr.msra.gmra.mxu0 %v1110_v16  ;;  %347 = vmatmul.bf16.vlgmr.msra.gmra.mxu1 %v1112_v17 }
  0x39   : > { %357 = vmatmul.bf16.vlgmr.msra.gmra.mxu2 %v1114_v18  ;;  %367 = vmatmul.bf16.vlgmr.msra.gmra.mxu3 %v1116_v19 }
  0x48   : > { %342 = vmatmul.bf16.gmra.mxu0 %v1111_v20  ;;  %352 = vmatmul.bf16.gmra.mxu1 %v1113_v21 }
  0x49   : > { %362 = vmatmul.bf16.gmra.mxu2 %v1115_v22  ;;  %372 = vmatmul.bf16.gmra.mxu3 %v1117_v23 }
  0xb5   : > { %v338_v24 = vpop.f32.mrf.mxu0  ;;  %v348_v25 = vpop.f32.mrf.mxu1 }
  0xbc   : > { %v358_v26 = vpop.f32.mrf.mxu2  ;;  %v368_v27 = vpop.f32.mrf.mxu3 }
  0xbd   : > { %v340_v28 = vpop.f32.mrf.mxu0  ;;  %v350_v29 = vpop.f32.mrf.mxu1 }
  0xbe   : > { %v1145_v30 = vpack.c.bf16 %v340_v28, %v338_v24  ;;  %v1155_v31 = vpack.c.bf16 %v350_v29, %v348_v25 }
  0xc0   : > { %1146 = vst [vmem:[#allocation2] sm:$0xff] %v1145_v30  }
  0xc1   : > { %1186 = vst [vmem:[%s1552_s22] sm:$0xff] %v1145_v30  }
  0xc2   : > { %1335 = vst [vmem:[#allocation2 + $0x10] sm:$0xff] %v1155_v31  }
  0xc3   : > { %1342 = vst [vmem:[%s1552_s22 + $0x10] sm:$0xff] %v1155_v31  }
  0xc4   : > { %v360_v32 = vpop.f32.mrf.mxu2  ;;  %v370_v33 = vpop.f32.mrf.mxu3 }
  0xc5   : > { %v1165_v34 = vpack.c.bf16 %v360_v32, %v358_v26  ;;  %v1175_v35 = vpack.c.bf16 %v370_v33, %v368_v27  ;;  %v343_v36 = vpop.f32.mrf.mxu0  ;;  %v353_v37 = vpop.f32.mrf.mxu1 }
  0xc7   : > { %1337 = vst [vmem:[#allocation2 + $0x20] sm:$0xff] %v1165_v34  }
  0xc8   : > { %1344 = vst [vmem:[%s1552_s22 + $0x20] sm:$0xff] %v1165_v34  }
  0xc9   : > { %1339 = vst [vmem:[#allocation2 + $0x30] sm:$0xff] %v1175_v35  }
  0xca   : > { %1346 = vst [vmem:[%s1552_s22 + $0x30] sm:$0xff] %v1175_v35  }
  0xcc   : > { %v363_v38 = vpop.f32.mrf.mxu2  ;;  %v373_v39 = vpop.f32.mrf.mxu3 }
  0xcd   : > { %v345_v40 = vpop.f32.mrf.mxu0  ;;  %v355_v41 = vpop.f32.mrf.mxu1 }
  0xce   : > { %v1150_v42 = vpack.c.bf16 %v345_v40, %v343_v36  ;;  %v1160_v43 = vpack.c.bf16 %v355_v41, %v353_v37 }
  0xd0   : > { %1334 = vst [vmem:[#allocation2 + $0x8] sm:$0xff] %v1150_v42  }
  0xd1   : > { %1341 = vst [vmem:[%s1552_s22 + $0x8] sm:$0xff] %v1150_v42  }
  0xd2   : > { %1336 = vst [vmem:[#allocation2 + $0x18] sm:$0xff] %v1160_v43  }
  0xd3   : > { %1343 = vst [vmem:[%s1552_s22 + $0x18] sm:$0xff] %v1160_v43  }
  0xd4   : > { %v365_v44 = vpop.f32.mrf.mxu2  ;;  %v375_v45 = vpop.f32.mrf.mxu3 }
  0xd5   : > { %v1170_v46 = vpack.c.bf16 %v365_v44, %v363_v38  ;;  %v1180_v47 = vpack.c.bf16 %v375_v45, %v373_v39 }
  0xd7   : > { %1338 = vst [vmem:[#allocation2 + $0x28] sm:$0xff] %v1170_v46  }
  0xd8   : > { %1345 = vst [vmem:[%s1552_s22 + $0x28] sm:$0xff] %v1170_v46  }
  0xd9   : > { %1340 = vst [vmem:[#allocation2 + $0x38] sm:$0xff] %v1180_v47  }
  0xda   : > { %1347 = vst [vmem:[%s1552_s22 + $0x38] sm:$0xff] %v1180_v47  }
  0xdb PF: > { %p1031_p9 = scmp.le.s32.totalorder %s1487_s11, 0 }
  0xdc   : > { %s432_s3 = sadd.s32 (!%p1031_p9), 1, %s1487_s11  ;;  %p446_p12 = scmp.lt.s32.totalorder (!%p1031_p9), %s1487_s11, 0 }
  0xdd   : > { %431 = sbr.rel (%p1031_p9) target bundleno = 433 (0x1b1), region = 36  ;;  %p433_p10 = scmp.lt.s32.totalorder (!%p1031_p9), %s432_s3, 0 }
  0xde   : > { %s434_s4 = ssub.s32 (!%p1031_p9), 0, %s432_s3 }
  0xdf   : > { %s1032_s5 = smin.u32 (!%p1031_p9), %s434_s4, %s432_s3 }
  0xe0   : > { %s436_s6 = sand.u32 (!%p1031_p9), 1, %s1032_s5  }
  0xe1   : > { %s437_s7 = ssub.s32 (!%p1031_p9), 0, %s436_s6 }
  0xe2   : > { %s1748_s7 = smov (!%p433_p10, %s437_s7), %s436_s6  ;;  %v1134_v56 = vld [vmem:[%s1737_s0] sm:$0xff]  ;;  %v1136_v57 = vld [vmem:[%s1737_s0 + $0x10] sm:$0xff]  ;;  %v1135_v60 = vld [vmem:[%s1737_s0 + $0x8] sm:$0xff] }
  0xe3   : > { %p1034_p11 = scmp.lt.s32.totalorder %s1748_s7, 0  ;;  %s443_s8 = sadd.s32 2, %s1748_s7  ;;  %v1138_v58 = vld [vmem:[%s1737_s0 + $0x20] sm:$0xff]  ;;  %v1140_v59 = vld [vmem:[%s1737_s0 + $0x30] sm:$0xff]  ;;  %v1137_v61 = vld [vmem:[%s1737_s0 + $0x18] sm:$0xff] }
  0xe4   : > { %v1139_v62 = vld [vmem:[%s1737_s0 + $0x28] sm:$0xff]  ;;  %v1141_v63 = vld [vmem:[%s1737_s0 + $0x38] sm:$0xff] }
  0xe5   : > { %s1750_s8 = smov (!%p1034_p11, %s443_s8), %s1748_s7 }
  0xe6   : > { %s1035_s9 = sshll.u32 %s1750_s8, 7 }
  0xe7   : > { %s459_s14 = sshra.s32 %s1035_s9, 3  ;;  %s447_s9 = ssub.s32 0, %s1487_s11 }
  0xe8   : > { %s1040_s16 = sshll.u32 %s459_s14, 2  ;;  %s1036_s14 = smin.u32 %s1487_s11, %s447_s9 }
  0xe9   : > { %s1637_s18 = scalar_lea.vmem [#allocation2], %s1040_s16  ;;  %s449_s16 = sand.u32 1, %s1036_s14  }
  0xea   : > { %v1133_v48 = vld [vmem:[%s1637_s18 + $0x38] sm:$0xff]  ;;  %v1132_v49 = vld [vmem:[%s1637_s18 + $0x30] sm:$0xff]  ;;  %v1131_v50 = vld [vmem:[%s1637_s18 + $0x28] sm:$0xff] }
  0xeb   : > { %591 = vmatpush.bf16.msra.mxu0 %v1133_v48  ;;  %1393 = vmatpush.bf16.msra.mxu1 %v1133_v48  ;;  %v1130_v51 = vld [vmem:[%s1637_s18 + $0x20] sm:$0xff]  ;;  %v1129_v52 = vld [vmem:[%s1637_s18 + $0x18] sm:$0xff]  ;;  %v1128_v53 = vld [vmem:[%s1637_s18 + $0x10] sm:$0xff] }
  0xec   : > { %1394 = vmatpush.bf16.msra.mxu2 %v1133_v48  ;;  %1395 = vmatpush.bf16.msra.mxu3 %v1133_v48  ;;  %v1127_v54 = vld [vmem:[%s1637_s18 + $0x8] sm:$0xff]  ;;  %v1126_v55 = vld [vmem:[%s1637_s18] sm:$0xff]  ;;  %s450_s18 = ssub.s32 0, %s449_s16 }
  0xed   : > { %s1752_s18 = smov (!%p446_p12, %s450_s18), %s449_s16 }
  0xee   : > { %p1038_p13 = scmp.lt.s32.totalorder %s1752_s18, 0  ;;  %s456_s20 = sadd.s32 2, %s1752_s18 }
  0xef   : > { %592 = vmatpush.bf16.msra.mxu0 %v1132_v49  ;;  %1396 = vmatpush.bf16.msra.mxu1 %v1132_v49 }
  0xf0   : > { %1397 = vmatpush.bf16.msra.mxu2 %v1132_v49  ;;  %1398 = vmatpush.bf16.msra.mxu3 %v1132_v49  ;;  %s1754_s20 = smov (!%p1038_p13, %s456_s20), %s1752_s18 }
  0xf1   : > { %s1039_s21 = sshll.u32 %s1754_s20, 7 }
  0xf2   : > { %s641_s23 = sshra.s32 %s1039_s21, 3 }
  0xf3   : > { %593 = vmatpush.bf16.msra.mxu0 %v1131_v50  ;;  %1399 = vmatpush.bf16.msra.mxu1 %v1131_v50  ;;  %s1105_s24 = sshll.u32 %s641_s23, 2 }
  0xf4   : > { %1400 = vmatpush.bf16.msra.mxu2 %v1131_v50  ;;  %1401 = vmatpush.bf16.msra.mxu3 %v1131_v50  ;;  %s1674_s25 = scalar_lea.vmem [#allocation2], %s1105_s24 }
  0xf5   : > { %v1223_v2 = vld [vmem:[%s1674_s25] sm:$0xff]   ;;  %v1349_v3 = vld [vmem:[%s1674_s25 + $0x10] sm:$0xff]   ;;  %v1348_v40 = vld [vmem:[%s1674_s25 + $0x8] sm:$0xff]  }
  0xf6   : > { %v1224_v4 = vunpack.c.l.bf16 %v1223_v2  ;;  %v1232_v5 = vunpack.c.l.bf16 %v1349_v3  ;;  %v1225_v10 = vunpack.c.h.bf16 %v1223_v2  ;;  %v1233_v11 = vunpack.c.h.bf16 %v1349_v3  ;;  %v1351_v16 = vld [vmem:[%s1674_s25 + $0x20] sm:$0xff]   ;;  %v1353_v17 = vld [vmem:[%s1674_s25 + $0x30] sm:$0xff]   ;;  %v1350_v41 = vld [vmem:[%s1674_s25 + $0x18] sm:$0xff]  }
  0xf7   : > { %594 = vmatpush.bf16.msra.mxu0 %v1130_v51  ;;  %1402 = vmatpush.bf16.msra.mxu1 %v1130_v51  ;;  %v1240_v22 = vunpack.c.l.bf16 %v1351_v16  ;;  %v1248_v23 = vunpack.c.l.bf16 %v1353_v17  ;;  %v1241_v28 = vunpack.c.h.bf16 %v1351_v16  ;;  %v1249_v29 = vunpack.c.h.bf16 %v1353_v17 }
  0xf8   : > { %1403 = vmatpush.bf16.msra.mxu2 %v1130_v51  ;;  %1404 = vmatpush.bf16.msra.mxu3 %v1130_v51  ;;  %v1228_v44 = vunpack.c.l.bf16 %v1348_v40  ;;  %v1236_v45 = vunpack.c.l.bf16 %v1350_v41  ;;  %v1229_v50 = vunpack.c.h.bf16 %v1348_v40  ;;  %v1237_v51 = vunpack.c.h.bf16 %v1350_v41 }
  0xfb   : > { %595 = vmatpush.bf16.msra.mxu0 %v1129_v52  ;;  %1405 = vmatpush.bf16.msra.mxu1 %v1129_v52 }
  0xfc   : > { %1406 = vmatpush.bf16.msra.mxu2 %v1129_v52  ;;  %1407 = vmatpush.bf16.msra.mxu3 %v1129_v52 }
  0xff   : > { %596 = vmatpush.bf16.msra.mxu0 %v1128_v53  ;;  %1408 = vmatpush.bf16.msra.mxu1 %v1128_v53 }
 0x100   : > { %1409 = vmatpush.bf16.msra.mxu2 %v1128_v53  ;;  %1410 = vmatpush.bf16.msra.mxu3 %v1128_v53 }
 0x103   : > { %597 = vmatpush.bf16.msra.mxu0 %v1127_v54  ;;  %1411 = vmatpush.bf16.msra.mxu1 %v1127_v54 }
 0x104   : > { %1412 = vmatpush.bf16.msra.mxu2 %v1127_v54  ;;  %1413 = vmatpush.bf16.msra.mxu3 %v1127_v54 }
 0x107   : > { %598 = vmatpush.bf16.msra.mxu0 %v1126_v55  ;;  %1414 = vmatpush.bf16.msra.mxu1 %v1126_v55 }
 0x108   : > { %1415 = vmatpush.bf16.msra.mxu2 %v1126_v55  ;;  %1416 = vmatpush.bf16.msra.mxu3 %v1126_v55 }
 0x10a   : > { %599 = vmatmul.bf16.vlgmr.msra.gmra.mxu0 %v1134_v56  ;;  %609 = vmatmul.bf16.vlgmr.msra.gmra.mxu1 %v1136_v57  ;;  %v1352_v56 = vld [vmem:[%s1674_s25 + $0x28] sm:$0xff]   ;;  %v1354_v57 = vld [vmem:[%s1674_s25 + $0x38] sm:$0xff]  }
 0x10b   : > { %619 = vmatmul.bf16.vlgmr.msra.gmra.mxu2 %v1138_v58  ;;  %629 = vmatmul.bf16.vlgmr.msra.gmra.mxu3 %v1140_v59 }
 0x11a   : > { %604 = vmatmul.bf16.gmra.mxu0 %v1135_v60  ;;  %614 = vmatmul.bf16.gmra.mxu1 %v1137_v61 }
 0x11b   : > { %624 = vmatmul.bf16.gmra.mxu2 %v1139_v62  ;;  %634 = vmatmul.bf16.gmra.mxu3 %v1141_v63  ;;  %v1244_v62 = vunpack.c.l.bf16 %v1352_v56  ;;  %v1252_v63 = vunpack.c.l.bf16 %v1354_v57 }
 0x187   : > { %v600_v0 = vpop.f32.mrf.mxu0  ;;  %v610_v1 = vpop.f32.mrf.mxu1 }
 0x188   : > { %v677_v6 = vmul.f32 2.0, %v600_v0  ;;  %v681_v7 = vmul.f32 2.0, %v610_v1 }
 0x18a   : > { %v693_v18 = vsub.f32 %v677_v6, %v1224_v4  ;;  %v697_v19 = vsub.f32 %v681_v7, %v1232_v5  ;;  %v1245_v4 = vunpack.c.h.bf16 %v1352_v56  ;;  %v1253_v5 = vunpack.c.h.bf16 %v1354_v57 }
 0x18e   : > { %v620_v8 = vpop.f32.mrf.mxu2  ;;  %v630_v9 = vpop.f32.mrf.mxu3 }
 0x18f   : > { %v602_v12 = vpop.f32.mrf.mxu0  ;;  %v612_v13 = vpop.f32.mrf.mxu1  ;;  %v685_v26 = vmul.f32 2.0, %v620_v8  ;;  %v689_v27 = vmul.f32 2.0, %v630_v9 }
 0x190   : > { %v678_v14 = vmul.f32 2.0, %v602_v12  ;;  %v682_v15 = vmul.f32 2.0, %v612_v13 }
 0x191   : > { %v701_v36 = vsub.f32 %v685_v26, %v1240_v22  ;;  %v705_v37 = vsub.f32 %v689_v27, %v1248_v23 }
 0x192   : > { %v694_v20 = vsub.f32 %v678_v14, %v1225_v10  ;;  %v698_v21 = vsub.f32 %v682_v15, %v1233_v11 }
 0x194   : > { %v1257_v24 = vpack.c.bf16 %v694_v20, %v693_v18  ;;  %v1267_v25 = vpack.c.bf16 %v698_v21, %v697_v19 }
 0x196   : > { %1258 = vst [vmem:[%s1674_s25] sm:$0xff] %v1257_v24   ;;  %v622_v30 = vpop.f32.mrf.mxu2  ;;  %v632_v31 = vpop.f32.mrf.mxu3 }
 0x197   : > { %1298 = vst [vmem:[%s1552_s22] sm:$0xff] %v1257_v24   ;;  %v686_v32 = vmul.f32 2.0, %v622_v30  ;;  %v690_v33 = vmul.f32 2.0, %v632_v31  ;;  %v605_v34 = vpop.f32.mrf.mxu0  ;;  %v615_v35 = vpop.f32.mrf.mxu1 }
 0x198   : > { %1356 = vst [vmem:[%s1674_s25 + $0x10] sm:$0xff] %v1267_v25   ;;  %v679_v46 = vmul.f32 2.0, %v605_v34  ;;  %v683_v47 = vmul.f32 2.0, %v615_v35 }
 0x199   : > { %1363 = vst [vmem:[%s1552_s22 + $0x10] sm:$0xff] %v1267_v25   ;;  %v702_v38 = vsub.f32 %v686_v32, %v1241_v28  ;;  %v706_v39 = vsub.f32 %v690_v33, %v1249_v29 }
 0x19a   : > { %v695_v58 = vsub.f32 %v679_v46, %v1228_v44  ;;  %v699_v59 = vsub.f32 %v683_v47, %v1236_v45 }
 0x19b   : > { %v1277_v42 = vpack.c.bf16 %v702_v38, %v701_v36  ;;  %v1287_v43 = vpack.c.bf16 %v706_v39, %v705_v37 }
 0x19d   : > { %1358 = vst [vmem:[%s1674_s25 + $0x20] sm:$0xff] %v1277_v42  }
 0x19e   : > { %1365 = vst [vmem:[%s1552_s22 + $0x20] sm:$0xff] %v1277_v42   ;;  %v625_v48 = vpop.f32.mrf.mxu2  ;;  %v635_v49 = vpop.f32.mrf.mxu3 }
 0x19f   : > { %1360 = vst [vmem:[%s1674_s25 + $0x30] sm:$0xff] %v1287_v43   ;;  %v607_v52 = vpop.f32.mrf.mxu0  ;;  %v617_v53 = vpop.f32.mrf.mxu1  ;;  %v687_v2 = vmul.f32 2.0, %v625_v48  ;;  %v691_v3 = vmul.f32 2.0, %v635_v49 }
 0x1a0   : > { %1367 = vst [vmem:[%s1552_s22 + $0x30] sm:$0xff] %v1287_v43   ;;  %v680_v54 = vmul.f32 2.0, %v607_v52  ;;  %v684_v55 = vmul.f32 2.0, %v617_v53 }
 0x1a1   : > { %v703_v10 = vsub.f32 %v687_v2, %v1244_v62  ;;  %v707_v11 = vsub.f32 %v691_v3, %v1252_v63 }
 0x1a2   : > { %v696_v60 = vsub.f32 %v680_v54, %v1229_v50  ;;  %v700_v61 = vsub.f32 %v684_v55, %v1237_v51 }
 0x1a4   : > { %v1262_v0 = vpack.c.bf16 %v696_v60, %v695_v58  ;;  %v1272_v1 = vpack.c.bf16 %v700_v61, %v699_v59 }
 0x1a6   : > { %1355 = vst [vmem:[%s1674_s25 + $0x8] sm:$0xff] %v1262_v0   ;;  %v627_v6 = vpop.f32.mrf.mxu2  ;;  %v637_v7 = vpop.f32.mrf.mxu3 }
 0x1a7   : > { %1362 = vst [vmem:[%s1552_s22 + $0x8] sm:$0xff] %v1262_v0   ;;  %v688_v8 = vmul.f32 2.0, %v627_v6  ;;  %v692_v9 = vmul.f32 2.0, %v637_v7 }
 0x1a8   : > { %1357 = vst [vmem:[%s1674_s25 + $0x18] sm:$0xff] %v1272_v1  }
 0x1a9   : > { %1364 = vst [vmem:[%s1552_s22 + $0x18] sm:$0xff] %v1272_v1   ;;  %v704_v12 = vsub.f32 %v688_v8, %v1245_v4  ;;  %v708_v13 = vsub.f32 %v692_v9, %v1253_v5 }
 0x1ab   : > { %v1282_v14 = vpack.c.bf16 %v704_v12, %v703_v10  ;;  %v1292_v15 = vpack.c.bf16 %v708_v13, %v707_v11 }
 0x1ad   : > { %1359 = vst [vmem:[%s1674_s25 + $0x28] sm:$0xff] %v1282_v14  }
 0x1ae   : > { %1366 = vst [vmem:[%s1552_s22 + $0x28] sm:$0xff] %v1282_v14  }
 0x1af   : > { %1361 = vst [vmem:[%s1674_s25 + $0x38] sm:$0xff] %v1292_v15  }
 0x1b0   : > { %1368 = vst [vmem:[%s1552_s22 + $0x38] sm:$0xff] %v1292_v15  }
 0x1b1 PF: > { %763 = sbr.rel (!%p1541_p3) target bundleno = 451 (0x1c3), region = 40  ;;  %s1107_s26 = sshll.u32 (%p1541_p3), %s1487_s11, 2  ;;  %v785_v16 = vld [vmem:[%s1552_s22] sm:$0xf] (%p1541_p3)  ;;  %v787_v17 = vld [vmem:[%s1552_s22 + $0x4] sm:$0xf] (%p1541_p3) }
 0x1b2   : > { %s768_s29 = scalar_lea.vmem (%p1541_p3), %s1739_s2, %s1107_s26  ;;  %v789_v18 = vld [vmem:[%s1552_s22 + $0x8] sm:$0xf] (%p1541_p3)  ;;  %v791_v19 = vld [vmem:[%s1552_s22 + $0xc] sm:$0xf] (%p1541_p3)  ;;  %v793_v20 = vld [vmem:[%s1552_s22 + $0x10] sm:$0xf] (%p1541_p3) }
 0x1b3   : > { %786 = vst [vmem:[%s768_s29] sm:$0xf] (%p1541_p3), %v785_v16  ;;  %v795_v21 = vld [vmem:[%s1552_s22 + $0x14] sm:$0xf] (%p1541_p3)  ;;  %v797_v22 = vld [vmem:[%s1552_s22 + $0x18] sm:$0xf] (%p1541_p3) }
 0x1b4   : > { %788 = vst [vmem:[%s768_s29 + $0x8] sm:$0xf] (%p1541_p3), %v787_v17  ;;  %v799_v23 = vld [vmem:[%s1552_s22 + $0x1c] sm:$0xf] (%p1541_p3)  ;;  %v801_v24 = vld [vmem:[%s1552_s22 + $0x20] sm:$0xf] (%p1541_p3) }
 0x1b5   : > { %790 = vst [vmem:[%s768_s29 + $0x10] sm:$0xf] (%p1541_p3), %v789_v18  ;;  %v803_v25 = vld [vmem:[%s1552_s22 + $0x24] sm:$0xf] (%p1541_p3)  ;;  %v805_v26 = vld [vmem:[%s1552_s22 + $0x28] sm:$0xf] (%p1541_p3) }
 0x1b6   : > { %792 = vst [vmem:[%s768_s29 + $0x18] sm:$0xf] %v791_v19  ;;  %v807_v27 = vld [vmem:[%s1552_s22 + $0x2c] sm:$0xf]  ;;  %v809_v28 = vld [vmem:[%s1552_s22 + $0x30] sm:$0xf] }
 0x1b7   : > { %794 = vst [vmem:[%s768_s29 + $0x20] sm:$0xf] %v793_v20  ;;  %v811_v29 = vld [vmem:[%s1552_s22 + $0x34] sm:$0xf]  ;;  %v813_v30 = vld [vmem:[%s1552_s22 + $0x38] sm:$0xf] }
 0x1b8   : > { %796 = vst [vmem:[%s768_s29 + $0x28] sm:$0xf] %v795_v21  ;;  %v815_v31 = vld [vmem:[%s1552_s22 + $0x3c] sm:$0xf] }
 0x1b9   : > { %798 = vst [vmem:[%s768_s29 + $0x30] sm:$0xf] %v797_v22 }
 0x1ba   : > { %800 = vst [vmem:[%s768_s29 + $0x38] sm:$0xf] %v799_v23 }
 0x1bb   : > { %802 = vst [vmem:[%s768_s29 + $0x40] sm:$0xf] %v801_v24 }
 0x1bc   : > { %804 = vst [vmem:[%s768_s29 + $0x48] sm:$0xf] %v803_v25 }
 0x1bd   : > { %806 = vst [vmem:[%s768_s29 + $0x50] sm:$0xf] %v805_v26 }
 0x1be   : > { %808 = vst [vmem:[%s768_s29 + $0x58] sm:$0xf] %v807_v27 }
 0x1bf   : > { %810 = vst [vmem:[%s768_s29 + $0x60] sm:$0xf] %v809_v28 }
 0x1c0   : > { %812 = vst [vmem:[%s768_s29 + $0x68] sm:$0xf] %v811_v29 }
 0x1c1   : > { %814 = vst [vmem:[%s768_s29 + $0x70] sm:$0xf] %v813_v30 }
 0x1c2   : > { %816 = vst [vmem:[%s768_s29 + $0x78] sm:$0xf] %v815_v31 }
 0x1c3 PF: > { %s12_s13 = sadd.s32 1, %s1495_s13   ;;  %s1741_s9 = smov %s1483_s10 }
 0x1c4   : > { %p9_p0 = scmp.ge.s32.totalorder %s12_s13, 4   ;;  %s1742_s10 = smov %s1550_s19 }
 0x1c5   : > { %s1743_s11 = smov %s1491_s12  ;;  %s1744_s12 = smov %s1746_s15 }
 0x1c6   :  { %11 = sbr.rel (!%p9_p0) target bundleno = 3 (0x3), region = 112 }

// kernel: gclstm_forward.3
= control target key start
LH: loop header
LB: loop body
LE: loop exit
PB: predicated region body
PF: predicated region fallthrough
CT: control target
= control target key end

     0   :  { %s7274_s5 = inlined_call_operand.vmem [shape: bf16[128,512], index: 5, kind: input, shape index: {}]   ;;  %s7275_s4 = inlined_call_operand.vmem [shape: bf16[128,512], index: 4, kind: input, shape index: {}]   ;;  %s7276_s1 = inlined_call_operand.vmem [shape: bf16[128,128], index: 1, kind: input, shape index: {}]   ;;  %s7277_s6 = inlined_call_operand.vmem [shape: bf16[256,512], index: 6, kind: input, shape index: {}]   ;;  %s7278_s0 = inlined_call_operand.vmem [shape: bf16[128,128], index: 0, kind: input, shape index: {}]   ;;  %s7279_s3 = inlined_call_operand.vmem [shape: bf16[128,256], index: 3, kind: input, shape index: {}]   ;;  %s7280_s7 = inlined_call_operand.vmem [shape: f32[1,512], index: 7, kind: input, shape index: {}]   ;;  %s7281_s2 = inlined_call_operand.vmem [shape: f32[128,128], index: 2, kind: input, shape index: {}]   ;;  %s7282_s9 = inlined_call_operand.vmem [shape: f32[128,128], index: 9, kind: output, shape index: {1}]   ;;  %s7283_s8 = inlined_call_operand.vmem [shape: f32[128,128], index: 8, kind: output, shape index: {0}]  }
   0x1   :  { %v3155_v0 = vld [vmem:[%s7274_s5 + $0xe0] sm:$0xf]  ;;  %v3775_v1 = vld [vmem:[%s7274_s5 + $0xec] sm:$0xf0]  ;;  %v3773_v2 = vld [vmem:[%s7274_s5 + $0xe4] sm:$0xf] }
   0x2   :  { %v3156_v3 = vor.u32 %v3775_v1, %v3155_v0  ;;  %v3157_v4 = vld [vmem:[%s7274_s5 + $0xf0] sm:$0xf0]  ;;  %v3163_v5 = vld [vmem:[%s7274_s5 + $0xe8] sm:$0xf]  ;;  %v3776_v6 = vld [vmem:[%s7274_s5 + $0xf4] sm:$0xf0] }
   0x3   :  { %v3160_v7 = vor.u32 %v3773_v2, %v3157_v4  ;;  %v3164_v8 = vor.u32 %v3776_v6, %v3163_v5  ;;  %v3774_v9 = vld [vmem:[%s7274_s5 + $0xec] sm:$0xf]  ;;  %v3165_v10 = vld [vmem:[%s7274_s5 + $0xf8] sm:$0xf0]  ;;  %v3139_v11 = vld [vmem:[%s7274_s5 + $0xc0] sm:$0xf] }
   0x4   :  { %335 = vmatpush.bf16.msra.mxu0 %v3156_v3  ;;  %v3168_v12 = vor.u32 %v3774_v9, %v3165_v10  ;;  %v3771_v13 = vld [vmem:[%s7274_s5 + $0xcc] sm:$0xf0]  ;;  %v3769_v14 = vld [vmem:[%s7274_s5 + $0xc4] sm:$0xf]  ;;  %v3141_v15 = vld [vmem:[%s7274_s5 + $0xd0] sm:$0xf0] }
   0x5   :  { %384 = vmatpush.bf16.msra.mxu1 %v3160_v7  ;;  %433 = vmatpush.bf16.msra.mxu2 %v3164_v8  ;;  %v3140_v16 = vor.u32 %v3771_v13, %v3139_v11  ;;  %v3144_v17 = vor.u32 %v3769_v14, %v3141_v15  ;;  %v3147_v18 = vld [vmem:[%s7274_s5 + $0xc8] sm:$0xf]  ;;  %v3772_v19 = vld [vmem:[%s7274_s5 + $0xd4] sm:$0xf0]  ;;  %v3770_v20 = vld [vmem:[%s7274_s5 + $0xcc] sm:$0xf] }
   0x6   :  { %482 = vmatpush.bf16.msra.mxu3 %v3168_v12  ;;  %v3148_v21 = vor.u32 %v3772_v19, %v3147_v18  ;;  %v3149_v22 = vld [vmem:[%s7274_s5 + $0xd8] sm:$0xf0]  ;;  %v3123_v23 = vld [vmem:[%s7274_s5 + $0xa0] sm:$0xf]  ;;  %v3767_v24 = vld [vmem:[%s7274_s5 + $0xac] sm:$0xf0] }
   0x7   :  { %v3152_v25 = vor.u32 %v3770_v20, %v3149_v22  ;;  %v3765_v26 = vld [vmem:[%s7274_s5 + $0xa4] sm:$0xf]  ;;  %v3125_v27 = vld [vmem:[%s7274_s5 + $0xb0] sm:$0xf0]  ;;  %v3131_v28 = vld [vmem:[%s7274_s5 + $0xa8] sm:$0xf]  ;;  %v3124_v29 = vor.u32 %v3767_v24, %v3123_v23 }
   0x8   :  { %336 = vmatpush.bf16.msra.mxu0 %v3140_v16  ;;  %v3768_v30 = vld [vmem:[%s7274_s5 + $0xb4] sm:$0xf0]  ;;  %v3766_v31 = vld [vmem:[%s7274_s5 + $0xac] sm:$0xf]  ;;  %v3133_v32 = vld [vmem:[%s7274_s5 + $0xb8] sm:$0xf0]  ;;  %v3128_v33 = vor.u32 %v3765_v26, %v3125_v27 }
   0x9   :  { %385 = vmatpush.bf16.msra.mxu1 %v3144_v17  ;;  %434 = vmatpush.bf16.msra.mxu2 %v3148_v21  ;;  %v3132_v34 = vor.u32 %v3768_v30, %v3131_v28  ;;  %v3107_v35 = vld [vmem:[%s7274_s5 + $0x80] sm:$0xf]  ;;  %v3763_v36 = vld [vmem:[%s7274_s5 + $0x8c] sm:$0xf0]  ;;  %v3761_v37 = vld [vmem:[%s7274_s5 + $0x84] sm:$0xf]  ;;  %v3136_v38 = vor.u32 %v3766_v31, %v3133_v32 }
   0xa   :  { %483 = vmatpush.bf16.msra.mxu3 %v3152_v25  ;;  %v3109_v39 = vld [vmem:[%s7274_s5 + $0x90] sm:$0xf0]  ;;  %v3115_v40 = vld [vmem:[%s7274_s5 + $0x88] sm:$0xf]  ;;  %v3764_v41 = vld [vmem:[%s7274_s5 + $0x94] sm:$0xf0]  ;;  %v3108_v44 = vor.u32 %v3763_v36, %v3107_v35 }
   0xb   :  { %v3762_v42 = vld [vmem:[%s7274_s5 + $0x8c] sm:$0xf]  ;;  %v3117_v43 = vld [vmem:[%s7274_s5 + $0x98] sm:$0xf0]  ;;  %v3112_v45 = vor.u32 %v3761_v37, %v3109_v39  ;;  %v3116_v46 = vor.u32 %v3764_v41, %v3115_v40  ;;  %v3091_v47 = vld [vmem:[%s7274_s5 + $0x60] sm:$0xf] }
   0xc   :  { %337 = vmatpush.bf16.msra.mxu0 %v3124_v29  ;;  %v3759_v48 = vld [vmem:[%s7274_s5 + $0x6c] sm:$0xf0]  ;;  %v3757_v49 = vld [vmem:[%s7274_s5 + $0x64] sm:$0xf]  ;;  %v3120_v50 = vor.u32 %v3762_v42, %v3117_v43  ;;  %v3093_v51 = vld [vmem:[%s7274_s5 + $0x70] sm:$0xf0] }
   0xd   :  { %386 = vmatpush.bf16.msra.mxu1 %v3128_v33  ;;  %435 = vmatpush.bf16.msra.mxu2 %v3132_v34  ;;  %v3099_v52 = vld [vmem:[%s7274_s5 + $0x68] sm:$0xf]  ;;  %v3760_v53 = vld [vmem:[%s7274_s5 + $0x74] sm:$0xf0]  ;;  %v3758_v54 = vld [vmem:[%s7274_s5 + $0x6c] sm:$0xf]  ;;  %v3092_v56 = vor.u32 %v3759_v48, %v3091_v47  ;;  %v3096_v57 = vor.u32 %v3757_v49, %v3093_v51 }
   0xe   :  { %484 = vmatpush.bf16.msra.mxu3 %v3136_v38  ;;  %v3101_v55 = vld [vmem:[%s7274_s5 + $0x78] sm:$0xf0]  ;;  %v3100_v58 = vor.u32 %v3760_v53, %v3099_v52  ;;  %v3075_v59 = vld [vmem:[%s7274_s5 + $0x40] sm:$0xf]  ;;  %v3755_v60 = vld [vmem:[%s7274_s5 + $0x4c] sm:$0xf0] }
   0xf   :  { %v3753_v61 = vld [vmem:[%s7274_s5 + $0x44] sm:$0xf]  ;;  %v3104_v62 = vor.u32 %v3758_v54, %v3101_v55  ;;  %v3077_v63 = vld [vmem:[%s7274_s5 + $0x50] sm:$0xf0]  ;;  %v3083_v0 = vld [vmem:[%s7274_s5 + $0x48] sm:$0xf]  ;;  %v3076_v4 = vor.u32 %v3755_v60, %v3075_v59 }
  0x10   :  { %338 = vmatpush.bf16.msra.mxu0 %v3108_v44  ;;  %v3756_v1 = vld [vmem:[%s7274_s5 + $0x54] sm:$0xf0]  ;;  %v3754_v2 = vld [vmem:[%s7274_s5 + $0x4c] sm:$0xf]  ;;  %v3085_v3 = vld [vmem:[%s7274_s5 + $0x58] sm:$0xf0]  ;;  %v3080_v5 = vor.u32 %v3753_v61, %v3077_v63 }
  0x11   :  { %387 = vmatpush.bf16.msra.mxu1 %v3112_v45  ;;  %436 = vmatpush.bf16.msra.mxu2 %v3116_v46  ;;  %v3084_v6 = vor.u32 %v3756_v1, %v3083_v0  ;;  %v3059_v7 = vld [vmem:[%s7274_s5 + $0x20] sm:$0xf]  ;;  %v3751_v8 = vld [vmem:[%s7274_s5 + $0x2c] sm:$0xf0]  ;;  %v3749_v9 = vld [vmem:[%s7274_s5 + $0x24] sm:$0xf]  ;;  %v3088_v10 = vor.u32 %v3754_v2, %v3085_v3 }
  0x12   :  { %485 = vmatpush.bf16.msra.mxu3 %v3120_v50  ;;  %v3061_v11 = vld [vmem:[%s7274_s5 + $0x30] sm:$0xf0]  ;;  %v3067_v12 = vld [vmem:[%s7274_s5 + $0x28] sm:$0xf]  ;;  %v3752_v13 = vld [vmem:[%s7274_s5 + $0x34] sm:$0xf0]  ;;  %v3060_v16 = vor.u32 %v3751_v8, %v3059_v7 }
  0x13   :  { %v3750_v14 = vld [vmem:[%s7274_s5 + $0x2c] sm:$0xf]  ;;  %v3069_v15 = vld [vmem:[%s7274_s5 + $0x38] sm:$0xf0]  ;;  %v3043_v17 = vld [vmem:[%s7274_s5] sm:$0xf]  ;;  %v3064_v18 = vor.u32 %v3749_v9, %v3061_v11  ;;  %v3068_v19 = vor.u32 %v3752_v13, %v3067_v12 }
  0x14   :  { %339 = vmatpush.bf16.msra.mxu0 %v3092_v56  ;;  %v3747_v20 = vld [vmem:[%s7274_s5 + $0xc] sm:$0xf0]  ;;  %v3745_v21 = vld [vmem:[%s7274_s5 + $0x4] sm:$0xf]  ;;  %v3045_v22 = vld [vmem:[%s7274_s5 + $0x10] sm:$0xf0]  ;;  %v3072_v23 = vor.u32 %v3750_v14, %v3069_v15 }
  0x15   :  { %388 = vmatpush.bf16.msra.mxu1 %v3096_v57  ;;  %437 = vmatpush.bf16.msra.mxu2 %v3100_v58  ;;  %v3051_v24 = vld [vmem:[%s7274_s5 + $0x8] sm:$0xf]  ;;  %v3748_v25 = vld [vmem:[%s7274_s5 + $0x14] sm:$0xf0]  ;;  %v3746_v26 = vld [vmem:[%s7274_s5 + $0xc] sm:$0xf]  ;;  %v3044_v30 = vor.u32 %v3747_v20, %v3043_v17  ;;  %v3048_v33 = vor.u32 %v3745_v21, %v3045_v22 }
  0x16   :  { %486 = vmatpush.bf16.msra.mxu3 %v3104_v62  ;;  %v3053_v27 = vld [vmem:[%s7274_s5 + $0x18] sm:$0xf0]  ;;  %v3323_v28 = vld [vmem:[%s7275_s4 + $0xe8] sm:$0xf]  ;;  %v3736_v29 = vld [vmem:[%s7275_s4 + $0xf4] sm:$0xf0]  ;;  %v3052_v34 = vor.u32 %v3748_v25, %v3051_v24 }
  0x17   :  { %v3734_v31 = vld [vmem:[%s7275_s4 + $0xec] sm:$0xf]  ;;  %v3325_v32 = vld [vmem:[%s7275_s4 + $0xf8] sm:$0xf0]  ;;  %v3737_v35 = vld [vmem:[%s7276_s1] sm:$0xff]  ;;  %v3056_v36 = vor.u32 %v3746_v26, %v3053_v27  ;;  %v3324_v37 = vor.u32 %v3736_v29, %v3323_v28 }
  0x18   :  { %340 = vmatpush.bf16.msra.mxu0 %v3076_v4  ;;  %v3315_v38 = vld [vmem:[%s7275_s4 + $0xe0] sm:$0xf]  ;;  %v3735_v39 = vld [vmem:[%s7275_s4 + $0xec] sm:$0xf0]  ;;  %v3733_v40 = vld [vmem:[%s7275_s4 + $0xe4] sm:$0xf]  ;;  %v3328_v41 = vor.u32 %v3734_v31, %v3325_v32 }
  0x19   :  { %389 = vmatpush.bf16.msra.mxu1 %v3080_v5  ;;  %438 = vmatpush.bf16.msra.mxu2 %v3084_v6  ;;  %v3317_v42 = vld [vmem:[%s7275_s4 + $0xf0] sm:$0xf0]  ;;  %v3307_v43 = vld [vmem:[%s7275_s4 + $0xc8] sm:$0xf]  ;;  %v3732_v44 = vld [vmem:[%s7275_s4 + $0xd4] sm:$0xf0]  ;;  %v3316_v47 = vor.u32 %v3735_v39, %v3315_v38 }
  0x1a   :  { %487 = vmatpush.bf16.msra.mxu3 %v3088_v10  ;;  %v3730_v45 = vld [vmem:[%s7275_s4 + $0xcc] sm:$0xf]  ;;  %v3309_v46 = vld [vmem:[%s7275_s4 + $0xd8] sm:$0xf0]  ;;  %v3320_v48 = vor.u32 %v3733_v40, %v3317_v42  ;;  %v3308_v49 = vor.u32 %v3732_v44, %v3307_v43  ;;  %v3299_v51 = vld [vmem:[%s7275_s4 + $0xc0] sm:$0xf] }
  0x1b   :  { %v3312_v50 = vor.u32 %v3730_v45, %v3309_v46  ;;  %v3731_v52 = vld [vmem:[%s7275_s4 + $0xcc] sm:$0xf0]  ;;  %v3729_v53 = vld [vmem:[%s7275_s4 + $0xc4] sm:$0xf]  ;;  %v3301_v55 = vld [vmem:[%s7275_s4 + $0xd0] sm:$0xf0] }
  0x1c   :  { %341 = vmatpush.bf16.msra.mxu0 %v3060_v16  ;;  %v3300_v54 = vor.u32 %v3731_v52, %v3299_v51  ;;  %v3291_v56 = vld [vmem:[%s7275_s4 + $0xa8] sm:$0xf]  ;;  %v3728_v57 = vld [vmem:[%s7275_s4 + $0xb4] sm:$0xf0]  ;;  %v3304_v58 = vor.u32 %v3729_v53, %v3301_v55  ;;  %v3726_v60 = vld [vmem:[%s7275_s4 + $0xac] sm:$0xf] }
  0x1d   :  { %390 = vmatpush.bf16.msra.mxu1 %v3064_v18  ;;  %439 = vmatpush.bf16.msra.mxu2 %v3068_v19  ;;  %v3292_v59 = vor.u32 %v3728_v57, %v3291_v56  ;;  %v3293_v61 = vld [vmem:[%s7275_s4 + $0xb8] sm:$0xf0]  ;;  %v3738_v63 = vld [vmem:[%s7276_s1 + $0x8] sm:$0xff]  ;;  %v3283_v0 = vld [vmem:[%s7275_s4 + $0xa0] sm:$0xf] }
  0x1e   :  { %488 = vmatpush.bf16.msra.mxu3 %v3072_v23  ;;  %v3296_v62 = vor.u32 %v3726_v60, %v3293_v61  ;;  %v3727_v1 = vld [vmem:[%s7275_s4 + $0xac] sm:$0xf0]  ;;  %v3725_v2 = vld [vmem:[%s7275_s4 + $0xa4] sm:$0xf]  ;;  %v3285_v4 = vld [vmem:[%s7275_s4 + $0xb0] sm:$0xf0] }
  0x1f   :  { %v3284_v3 = vor.u32 %v3727_v1, %v3283_v0  ;;  %v3275_v5 = vld [vmem:[%s7275_s4 + $0x88] sm:$0xf]  ;;  %v3724_v6 = vld [vmem:[%s7275_s4 + $0x94] sm:$0xf0]  ;;  %v3288_v7 = vor.u32 %v3725_v2, %v3285_v4  ;;  %v3722_v9 = vld [vmem:[%s7275_s4 + $0x8c] sm:$0xf] }
  0x20   :  { %342 = vmatpush.bf16.msra.mxu0 %v3044_v30  ;;  %v3276_v8 = vor.u32 %v3724_v6, %v3275_v5  ;;  %v3277_v10 = vld [vmem:[%s7275_s4 + $0x98] sm:$0xf0]  ;;  %v3739_v12 = vld [vmem:[%s7276_s1 + $0x10] sm:$0xff]  ;;  %v3267_v13 = vld [vmem:[%s7275_s4 + $0x80] sm:$0xf] }
  0x21   :  { %391 = vmatpush.bf16.msra.mxu1 %v3048_v33  ;;  %440 = vmatpush.bf16.msra.mxu2 %v3052_v34  ;;  %v3280_v11 = vor.u32 %v3722_v9, %v3277_v10  ;;  %v3723_v14 = vld [vmem:[%s7275_s4 + $0x8c] sm:$0xf0]  ;;  %v3721_v15 = vld [vmem:[%s7275_s4 + $0x84] sm:$0xf]  ;;  %v3269_v17 = vld [vmem:[%s7275_s4 + $0x90] sm:$0xf0] }
  0x22   :  { %489 = vmatpush.bf16.msra.mxu3 %v3056_v36  ;;  %v3268_v16 = vor.u32 %v3723_v14, %v3267_v13  ;;  %v3259_v18 = vld [vmem:[%s7275_s4 + $0x68] sm:$0xf]  ;;  %v3720_v19 = vld [vmem:[%s7275_s4 + $0x74] sm:$0xf0]  ;;  %v3272_v20 = vor.u32 %v3721_v15, %v3269_v17  ;;  %v3718_v22 = vld [vmem:[%s7275_s4 + $0x6c] sm:$0xf] }
  0x23   :  { %343 = vmatmul.bf16.vlgmr.msra.gmra.mxu0 %v3737_v35  ;;  %v3260_v21 = vor.u32 %v3720_v19, %v3259_v18  ;;  %v3261_v23 = vld [vmem:[%s7275_s4 + $0x78] sm:$0xf0]  ;;  %v3251_v26 = vld [vmem:[%s7275_s4 + $0x60] sm:$0xf]  ;;  %v3719_v27 = vld [vmem:[%s7275_s4 + $0x6c] sm:$0xf0] }
  0x24   :  { %392 = vmatmul.bf16.vlgmr.msra.gmra.mxu1 %v3737_v35  ;;  %441 = vmatmul.bf16.vlgmr.msra.gmra.mxu2 %v3737_v35  ;;  %v3264_v24 = vor.u32 %v3718_v22, %v3261_v23  ;;  %v3740_v25 = vld [vmem:[%s7276_s1 + $0x18] sm:$0xff]  ;;  %v3717_v28 = vld [vmem:[%s7275_s4 + $0x64] sm:$0xf]  ;;  %v3252_v29 = vor.u32 %v3719_v27, %v3251_v26  ;;  %v3253_v30 = vld [vmem:[%s7275_s4 + $0x70] sm:$0xf0] }
  0x25   :  { %837 = vmatpush.bf16.msrb.mxu2 %v3324_v37  ;;  %490 = vmatmul.bf16.vlgmr.msra.gmra.mxu3 %v3737_v35  ;;  %v3243_v31 = vld [vmem:[%s7275_s4 + $0x48] sm:$0xf]  ;;  %v3716_v32 = vld [vmem:[%s7275_s4 + $0x54] sm:$0xf0]  ;;  %v3256_v33 = vor.u32 %v3717_v28, %v3253_v30  ;;  %v3714_v35 = vld [vmem:[%s7275_s4 + $0x4c] sm:$0xf] }
  0x26   :  { %886 = vmatpush.bf16.msrb.mxu3 %v3328_v41  ;;  %739 = vmatpush.bf16.msrb.mxu0 %v3316_v47  ;;  %v3244_v34 = vor.u32 %v3716_v32, %v3243_v31  ;;  %v3245_v36 = vld [vmem:[%s7275_s4 + $0x58] sm:$0xf0]  ;;  %v3741_v38 = vld [vmem:[%s7276_s1 + $0x20] sm:$0xff]  ;;  %v3715_v40 = vld [vmem:[%s7275_s4 + $0x4c] sm:$0xf0] }
  0x27   :  { %788 = vmatpush.bf16.msrb.mxu1 %v3320_v48  ;;  %v3248_v37 = vor.u32 %v3714_v35, %v3245_v36  ;;  %v3235_v39 = vld [vmem:[%s7275_s4 + $0x40] sm:$0xf]  ;;  %v3713_v41 = vld [vmem:[%s7275_s4 + $0x44] sm:$0xf]  ;;  %v3237_v43 = vld [vmem:[%s7275_s4 + $0x50] sm:$0xf0] }
  0x28   :  { %v3236_v42 = vor.u32 %v3715_v40, %v3235_v39  ;;  %v3227_v44 = vld [vmem:[%s7275_s4 + $0x28] sm:$0xf]  ;;  %v3712_v45 = vld [vmem:[%s7275_s4 + $0x34] sm:$0xf0]  ;;  %v3240_v46 = vor.u32 %v3713_v41, %v3237_v43  ;;  %v3710_v48 = vld [vmem:[%s7275_s4 + $0x2c] sm:$0xf] }
  0x29   :  { %838 = vmatpush.bf16.msrb.mxu2 %v3308_v49  ;;  %v3228_v47 = vor.u32 %v3712_v45, %v3227_v44  ;;  %v3229_v49 = vld [vmem:[%s7275_s4 + $0x38] sm:$0xf0]  ;;  %v3742_v51 = vld [vmem:[%s7276_s1 + $0x28] sm:$0xff]  ;;  %v3219_v52 = vld [vmem:[%s7275_s4 + $0x20] sm:$0xf] }
  0x2a   :  { %887 = vmatpush.bf16.msrb.mxu3 %v3312_v50  ;;  %740 = vmatpush.bf16.msrb.mxu0 %v3300_v54  ;;  %v3232_v50 = vor.u32 %v3710_v48, %v3229_v49  ;;  %v3711_v53 = vld [vmem:[%s7275_s4 + $0x2c] sm:$0xf0]  ;;  %v3709_v54 = vld [vmem:[%s7275_s4 + $0x24] sm:$0xf]  ;;  %v3221_v56 = vld [vmem:[%s7275_s4 + $0x30] sm:$0xf0] }
  0x2b   :  { %789 = vmatpush.bf16.msrb.mxu1 %v3304_v58  ;;  %v3220_v55 = vor.u32 %v3711_v53, %v3219_v52  ;;  %v3211_v57 = vld [vmem:[%s7275_s4 + $0x8] sm:$0xf]  ;;  %v3708_v58 = vld [vmem:[%s7275_s4 + $0x14] sm:$0xf0]  ;;  %v3706_v61 = vld [vmem:[%s7275_s4 + $0xc] sm:$0xf] }
  0x2c   :  { %v3212_v60 = vor.u32 %v3708_v58, %v3211_v57  ;;  %v3743_v0 = vld [vmem:[%s7276_s1 + $0x30] sm:$0xff]  ;;  %v3203_v1 = vld [vmem:[%s7275_s4] sm:$0xf]  ;;  %v3853_v9 = vld [vmem:[%s7277_s6 + $0x1e4] sm:$0xf] }
  0x2d   :  { %839 = vmatpush.bf16.msrb.mxu2 %v3292_v59  ;;  %v3224_v59 = vor.u32 %v3709_v54, %v3221_v56  ;;  %v3707_v2 = vld [vmem:[%s7275_s4 + $0xc] sm:$0xf0]  ;;  %v3205_v5 = vld [vmem:[%s7275_s4 + $0x10] sm:$0xf0]  ;;  %v3744_v13 = vld [vmem:[%s7276_s1 + $0x38] sm:$0xff] }
  0x2e   :  { %888 = vmatpush.bf16.msrb.mxu3 %v3296_v62  ;;  %741 = vmatpush.bf16.msrb.mxu0 %v3284_v3  ;;  %v3213_v62 = vld [vmem:[%s7275_s4 + $0x18] sm:$0xf0]  ;;  %v3705_v3 = vld [vmem:[%s7275_s4 + $0x4] sm:$0xf]  ;;  %v3204_v4 = vor.u32 %v3707_v2, %v3203_v1  ;;  %v3507_v14 = vld [vmem:[%s7277_s6 + $0xe0] sm:$0xf] }
  0x2f   :  { %790 = vmatpush.bf16.msrb.mxu1 %v3288_v7  ;;  %v3208_v6 = vor.u32 %v3705_v3, %v3205_v5  ;;  %v3821_v7 = vld [vmem:[%s7277_s6 + $0xe4] sm:$0xf]  ;;  %v3823_v15 = vld [vmem:[%s7277_s6 + $0xec] sm:$0xf0]  ;;  %v3619_v31 = vld [vmem:[%s7277_s6 + $0x1c0] sm:$0xf] }
  0x30   :  { %v3508_v17 = vor.u32 %v3823_v15, %v3507_v14  ;;  %v3855_v18 = vld [vmem:[%s7277_s6 + $0x1ec] sm:$0xf0]  ;;  %v3817_v19 = vld [vmem:[%s7277_s6 + $0xc4] sm:$0xf]  ;;  %v3477_v35 = vld [vmem:[%s7277_s6 + $0xb0] sm:$0xf0] }
  0x31   :  { %840 = vmatpush.bf16.msrb.mxu2 %v3276_v8  ;;  %v3509_v8 = vld [vmem:[%s7277_s6 + $0xf0] sm:$0xf0]  ;;  %v3849_v23 = vld [vmem:[%s7277_s6 + $0x1c4] sm:$0xf]  ;;  %v3819_v30 = vld [vmem:[%s7277_s6 + $0xcc] sm:$0xf0] }
  0x32   :  { %889 = vmatpush.bf16.msrb.mxu3 %v3280_v11  ;;  %742 = vmatpush.bf16.msrb.mxu0 %v3268_v16  ;;  %v3512_v10 = vor.u32 %v3821_v7, %v3509_v8  ;;  %v3637_v11 = vld [vmem:[%s7277_s6 + $0x1f0] sm:$0xf0]  ;;  %v3635_v16 = vld [vmem:[%s7277_s6 + $0x1e0] sm:$0xf]  ;;  %v3845_v39 = vld [vmem:[%s7277_s6 + $0x1a4] sm:$0xf] }
  0x33   :  { %348 = vmatmul.bf16.gmra.mxu0 %v3738_v63  ;;  %791 = vmatpush.bf16.msrb.mxu1 %v3272_v20  ;;  %v3493_v20 = vld [vmem:[%s7277_s6 + $0xd0] sm:$0xf0]  ;;  %v3697_v26 = vld [vmem:[%s7278_s0] sm:$0xff]  ;;  %v3847_v54 = vld [vmem:[%s7277_s6 + $0x1ac] sm:$0xf0] }
  0x34   :  { %397 = vmatmul.bf16.gmra.mxu1 %v3738_v63  ;;  %446 = vmatmul.bf16.gmra.mxu2 %v3738_v63  ;;  %v3496_v22 = vor.u32 %v3817_v19, %v3493_v20  ;;  %v3605_v40 = vld [vmem:[%s7277_s6 + $0x1b0] sm:$0xf0]  ;;  %v3603_v52 = vld [vmem:[%s7277_s6 + $0x1a0] sm:$0xf]  ;;  %v3811_v8 = vld [vmem:[%s7277_s6 + $0x8c] sm:$0xf0] }
  0x35   :  { %495 = vmatmul.bf16.gmra.mxu3 %v3738_v63  ;;  %841 = vmatpush.bf16.msrb.mxu2 %v3260_v21  ;;  %v3216_v63 = vor.u32 %v3706_v61, %v3213_v62  ;;  %v3636_v21 = vor.u32 %v3855_v18, %v3635_v16  ;;  %v3608_v43 = vor.u32 %v3845_v39, %v3605_v40  ;;  %v3461_v56 = vld [vmem:[%s7277_s6 + $0x90] sm:$0xf0]  ;;  %v3459_v7 = vld [vmem:[%s7277_s6 + $0x80] sm:$0xf] }
  0x36   :  { %890 = vmatpush.bf16.msrb.mxu3 %v3264_v24  ;;  %743 = vmatpush.bf16.msrb.mxu0 %v3252_v29  ;;  %v3621_v24 = vld [vmem:[%s7277_s6 + $0x1d0] sm:$0xf0]  ;;  %v3491_v29 = vld [vmem:[%s7277_s6 + $0xc0] sm:$0xf]  ;;  %v3604_v58 = vor.u32 %v3847_v54, %v3603_v52 }
  0x37   :  { %792 = vmatpush.bf16.msrb.mxu1 %v3256_v33  ;;  %v3492_v32 = vor.u32 %v3819_v30, %v3491_v29  ;;  %v3851_v33 = vld [vmem:[%s7277_s6 + $0x1cc] sm:$0xf0]  ;;  %v3589_v61 = vld [vmem:[%s7277_s6 + $0x190] sm:$0xf0]  ;;  %v3443_v30 = vld [vmem:[%s7277_s6 + $0x60] sm:$0xf] }
  0x38   :  { %v3699_v3 = vld [vmem:[%s7278_s0 + $0x10] sm:$0xff] }
  0x39   :  { %842 = vmatpush.bf16.msrb.mxu2 %v3244_v34  ;;  %v3813_v34 = vld [vmem:[%s7277_s6 + $0xa4] sm:$0xf]  ;;  %v3573_v18 = vld [vmem:[%s7277_s6 + $0x170] sm:$0xf0] }
  0x3a   :  { %891 = vmatpush.bf16.msrb.mxu3 %v3248_v37  ;;  %744 = vmatpush.bf16.msrb.mxu0 %v3236_v42  ;;  %v3620_v37 = vor.u32 %v3851_v33, %v3619_v31  ;;  %v3807_v31 = vld [vmem:[%s7277_s6 + $0x6c] sm:$0xf0] }
  0x3b   :  { %793 = vmatpush.bf16.msrb.mxu1 %v3240_v46  ;;  %v3698_v46 = vld [vmem:[%s7278_s0 + $0x8] sm:$0xff]  ;;  %v3444_v33 = vor.u32 %v3807_v31, %v3443_v30 }
  0x3c   :  { %v3702_v30 = vld [vmem:[%s7278_s0 + $0x28] sm:$0xff] }
  0x3d   :  { %843 = vmatpush.bf16.msrb.mxu2 %v3228_v47 }
  0x3e   :  { %892 = vmatpush.bf16.msrb.mxu3 %v3232_v50  ;;  %745 = vmatpush.bf16.msrb.mxu0 %v3220_v55  ;;  %v3475_v50 = vld [vmem:[%s7277_s6 + $0xa0] sm:$0xf]  ;;  %v3809_v55 = vld [vmem:[%s7277_s6 + $0x84] sm:$0xf] }
  0x3f   :  { %794 = vmatpush.bf16.msrb.mxu1 %v3224_v59  ;;  %v3464_v59 = vor.u32 %v3809_v55, %v3461_v56  ;;  %v3701_v55 = vld [vmem:[%s7278_s0 + $0x20] sm:$0xff] }
  0x41   :  { %844 = vmatpush.bf16.msrb.mxu2 %v3212_v60  ;;  %v3841_v60 = vld [vmem:[%s7277_s6 + $0x184] sm:$0xf] }
  0x42   :  { %893 = vmatpush.bf16.msrb.mxu3 %v3216_v63  ;;  %746 = vmatpush.bf16.msrb.mxu0 %v3204_v4 }
  0x43   :  { %353 = vmatmul.bf16.gmra.mxu0 %v3739_v12  ;;  %795 = vmatpush.bf16.msrb.mxu1 %v3208_v6 }
  0x44   :  { %402 = vmatmul.bf16.gmra.mxu1 %v3739_v12  ;;  %451 = vmatmul.bf16.gmra.mxu2 %v3739_v12 }
  0x45   :  { %500 = vmatmul.bf16.gmra.mxu3 %v3739_v12  ;;  %v3640_v12 = vor.u32 %v3853_v9, %v3637_v11  ;;  %1513 = vmatpush.bf16.msra.mxu2 %v3512_v10  ;;  %v3587_v9 = vld [vmem:[%s7277_s6 + $0x180] sm:$0xf]  ;;  %v3460_v10 = vor.u32 %v3811_v8, %v3459_v7  ;;  %v3843_v11 = vld [vmem:[%s7277_s6 + $0x18c] sm:$0xf0]  ;;  %v3797_v8 = vld [vmem:[%s7277_s6 + $0x24] sm:$0xf] }
  0x46   :  { %1415 = vmatpush.bf16.msra.mxu0 %v3508_v17  ;;  %v3588_v15 = vor.u32 %v3843_v11, %v3587_v9  ;;  %v3837_v17 = vld [vmem:[%s7277_s6 + $0x164] sm:$0xf]  ;;  %v3835_v7 = vld [vmem:[%s7277_s6 + $0x14c] sm:$0xf0]  ;;  %v3413_v9 = vld [vmem:[%s7277_s6 + $0x30] sm:$0xf0] }
  0x47   :  { %1562 = vmatpush.bf16.msra.mxu3 %v3640_v12  ;;  %1464 = vmatpush.bf16.msra.mxu1 %v3636_v21  ;;  %v3805_v12 = vld [vmem:[%s7277_s6 + $0x64] sm:$0xf]  ;;  %v3576_v21 = vor.u32 %v3837_v17, %v3573_v18 }
  0x49   :  { %1514 = vmatpush.bf16.msra.mxu2 %v3496_v22 }
  0x4a   :  { %1416 = vmatpush.bf16.msra.mxu0 %v3492_v32  ;;  %v3571_v32 = vld [vmem:[%s7277_s6 + $0x160] sm:$0xf] }
  0x4b   :  { %1465 = vmatpush.bf16.msra.mxu1 %v3620_v37  ;;  %v3429_v37 = vld [vmem:[%s7277_s6 + $0x50] sm:$0xf0] }
  0x4f   :  { %1466 = vmatpush.bf16.msra.mxu1 %v3604_v58 }
  0x53   :  { %358 = vmatmul.bf16.gmra.mxu0 %v3740_v25  ;;  %1467 = vmatpush.bf16.msra.mxu1 %v3588_v15  ;;  %v3541_v15 = vld [vmem:[%s7277_s6 + $0x130] sm:$0xf0] }
  0x54   :  { %407 = vmatmul.bf16.gmra.mxu1 %v3740_v25  ;;  %456 = vmatmul.bf16.gmra.mxu2 %v3740_v25 }
  0x55   :  { %505 = vmatmul.bf16.gmra.mxu3 %v3740_v25  ;;  %v3624_v25 = vor.u32 %v3849_v23, %v3621_v24  ;;  %v3700_v24 = vld [vmem:[%s7278_s0 + $0x18] sm:$0xff] }
  0x57   :  { %1563 = vmatpush.bf16.msra.mxu3 %v3624_v25 }
  0x5b   :  { %1564 = vmatpush.bf16.msra.mxu3 %v3608_v43  ;;  %v3833_v43 = vld [vmem:[%s7277_s6 + $0x144] sm:$0xf] }
  0x63   :  { %363 = vmatmul.bf16.gmra.mxu0 %v3741_v38 }
  0x64   :  { %412 = vmatmul.bf16.gmra.mxu1 %v3741_v38  ;;  %461 = vmatmul.bf16.gmra.mxu2 %v3741_v38 }
  0x65   :  { %510 = vmatmul.bf16.gmra.mxu3 %v3741_v38  ;;  %v3480_v38 = vor.u32 %v3813_v34, %v3477_v35  ;;  %v3839_v34 = vld [vmem:[%s7277_s6 + $0x16c] sm:$0xf0]  ;;  %v3801_v35 = vld [vmem:[%s7277_s6 + $0x44] sm:$0xf] }
  0x66   :  { %v3572_v39 = vor.u32 %v3839_v34, %v3571_v32  ;;  %v3432_v40 = vor.u32 %v3801_v35, %v3429_v37  ;;  %v3411_v34 = vld [vmem:[%s7277_s6 + $0x20] sm:$0xf]  ;;  %v3799_v35 = vld [vmem:[%s7277_s6 + $0x2c] sm:$0xf0] }
  0x67   :  { %1515 = vmatpush.bf16.msra.mxu2 %v3480_v38  ;;  %v3539_v37 = vld [vmem:[%s7277_s6 + $0x120] sm:$0xf] }
  0x68   :  { %1468 = vmatpush.bf16.msra.mxu1 %v3572_v39  ;;  %v3412_v39 = vor.u32 %v3799_v35, %v3411_v34 }
  0x6b   :  { %1516 = vmatpush.bf16.msra.mxu2 %v3464_v59 }
  0x73   :  { %368 = vmatmul.bf16.gmra.mxu0 %v3742_v51 }
  0x74   :  { %417 = vmatmul.bf16.gmra.mxu1 %v3742_v51  ;;  %466 = vmatmul.bf16.gmra.mxu2 %v3742_v51 }
  0x75   :  { %515 = vmatmul.bf16.gmra.mxu3 %v3742_v51  ;;  %v3815_v51 = vld [vmem:[%s7277_s6 + $0xac] sm:$0xf0] }
  0x76   :  { %v3476_v53 = vor.u32 %v3815_v51, %v3475_v50 }
  0x78   :  { %1417 = vmatpush.bf16.msra.mxu0 %v3476_v53 }
  0x7c   :  { %1418 = vmatpush.bf16.msra.mxu0 %v3460_v10 }
  0x80   :  { %1419 = vmatpush.bf16.msra.mxu0 %v3444_v33 }
  0x83   :  { %373 = vmatmul.bf16.gmra.mxu0 %v3743_v0 }
  0x84   :  { %422 = vmatmul.bf16.gmra.mxu1 %v3743_v0  ;;  %471 = vmatmul.bf16.gmra.mxu2 %v3743_v0 }
  0x85   :  { %520 = vmatmul.bf16.gmra.mxu3 %v3743_v0  ;;  %v3592_v0 = vor.u32 %v3841_v60, %v3589_v61  ;;  %v3427_v60 = vld [vmem:[%s7277_s6 + $0x40] sm:$0xf]  ;;  %v3803_v61 = vld [vmem:[%s7277_s6 + $0x4c] sm:$0xf0] }
  0x87   :  { %1565 = vmatpush.bf16.msra.mxu3 %v3592_v0  ;;  %v3555_v0 = vld [vmem:[%s7277_s6 + $0x140] sm:$0xf] }
  0x88   :  { %v3556_v11 = vor.u32 %v3835_v7, %v3555_v0  ;;  %v3525_v0 = vld [vmem:[%s7277_s6 + $0x110] sm:$0xf0] }
  0x8a   :  { %1469 = vmatpush.bf16.msra.mxu1 %v3556_v11  ;;  %v3703_v11 = vld [vmem:[%s7278_s0 + $0x30] sm:$0xff] }
  0x8b   :  { %1566 = vmatpush.bf16.msra.mxu3 %v3576_v21 }
  0x93   :  { %378 = vmatmul.bf16.gmra.mxu0 %v3744_v13 }
  0x94   :  { %427 = vmatmul.bf16.gmra.mxu1 %v3744_v13  ;;  %476 = vmatmul.bf16.gmra.mxu2 %v3744_v13 }
  0x95   :  { %525 = vmatmul.bf16.gmra.mxu3 %v3744_v13  ;;  %v3445_v13 = vld [vmem:[%s7277_s6 + $0x70] sm:$0xf0] }
  0x96   :  { %v3448_v16 = vor.u32 %v3805_v12, %v3445_v13  ;;  %v3416_v12 = vor.u32 %v3797_v8, %v3413_v9  ;;  %v3829_v13 = vld [vmem:[%s7277_s6 + $0x124] sm:$0xf] }
  0x97   :  { %v3544_v18 = vor.u32 %v3829_v13, %v3541_v15  ;;  %v3395_v13 = vld [vmem:[%s7277_s6] sm:$0xf]  ;;  %v3795_v15 = vld [vmem:[%s7277_s6 + $0xc] sm:$0xf0] }
  0x98   :  { %1517 = vmatpush.bf16.msra.mxu2 %v3448_v16  ;;  %v3396_v35 = vor.u32 %v3795_v15, %v3395_v13 }
  0x9c   :  { %1518 = vmatpush.bf16.msra.mxu2 %v3432_v40  ;;  %v3831_v40 = vld [vmem:[%s7277_s6 + $0x12c] sm:$0xf0] }
  0xa0   :  { %v4611_v27 = vpop.f32.mrf.mxu0  ;;  %1519 = vmatpush.bf16.msra.mxu2 %v3416_v12 }
  0xa1   :  { %v4613_v28 = vpop.f32.mrf.mxu1 }
  0xa3   :  { %747 = vmatmul.bf16.vlgmr.msrb.gmra.mxu0 %v3697_v26 }
  0xa4   :  { %796 = vmatmul.bf16.vlgmr.msrb.gmra.mxu1 %v3697_v26  ;;  %845 = vmatmul.bf16.vlgmr.msrb.gmra.mxu2 %v3697_v26 }
  0xa5   :  { %894 = vmatmul.bf16.vlgmr.msrb.gmra.mxu3 %v3697_v26 }
  0xa7   :  { %v4633_v36 = vpop.f32.mrf.mxu2 }
  0xa8   :  { %v4641_v41 = vpop.f32.mrf.mxu3  ;;  %v4643_v42 = vpop.f32.mrf.mxu0 }
  0xa9   :  { %v4645_v44 = vpop.f32.mrf.mxu1 }
  0xaf   :  { %v4647_v45 = vpop.f32.mrf.mxu2 }
  0xb0   :  { %v4652_v47 = vpop.f32.mrf.mxu3  ;;  %v4654_v48 = vpop.f32.mrf.mxu0 }
  0xb1   :  { %v4656_v49 = vpop.f32.mrf.mxu1 }
  0xb3   :  { %752 = vmatmul.bf16.gmra.mxu0 %v3698_v46 }
  0xb4   :  { %801 = vmatmul.bf16.gmra.mxu1 %v3698_v46  ;;  %850 = vmatmul.bf16.gmra.mxu2 %v3698_v46 }
  0xb5   :  { %899 = vmatmul.bf16.gmra.mxu3 %v3698_v46  ;;  %v3557_v46 = vld [vmem:[%s7277_s6 + $0x150] sm:$0xf0] }
  0xb6   :  { %v3560_v52 = vor.u32 %v3833_v43, %v3557_v46  ;;  %v3793_v43 = vld [vmem:[%s7277_s6 + $0x4] sm:$0xf]  ;;  %v3397_v46 = vld [vmem:[%s7277_s6 + $0x10] sm:$0xf0] }
  0xb7   :  { %v4676_v57 = vpop.f32.mrf.mxu2 }
  0xb8   :  { %v4684_v62 = vpop.f32.mrf.mxu3  ;;  %v4686_v63 = vpop.f32.mrf.mxu0  ;;  %1567 = vmatpush.bf16.msra.mxu3 %v3560_v52 }
  0xb9   :  { %v4688_v1 = vpop.f32.mrf.mxu1 }
  0xbc   :  { %1568 = vmatpush.bf16.msra.mxu3 %v3544_v18  ;;  %v3523_v18 = vld [vmem:[%s7277_s6 + $0x100] sm:$0xf] }
  0xbf   :  { %v4690_v2 = vpop.f32.mrf.mxu2 }
  0xc0   :  { %v4695_v4 = vpop.f32.mrf.mxu3  ;;  %v4697_v5 = vpop.f32.mrf.mxu0 }
  0xc1   :  { %v4699_v6 = vpop.f32.mrf.mxu1 }
  0xc3   :  { %757 = vmatmul.bf16.gmra.mxu0 %v3699_v3 }
  0xc4   :  { %806 = vmatmul.bf16.gmra.mxu1 %v3699_v3  ;;  %855 = vmatmul.bf16.gmra.mxu2 %v3699_v3 }
  0xc5   :  { %904 = vmatmul.bf16.gmra.mxu3 %v3699_v3  ;;  %v3428_v3 = vor.u32 %v3803_v61, %v3427_v60  ;;  %v3400_v60 = vor.u32 %v3793_v43, %v3397_v46  ;;  %v3825_v61 = vld [vmem:[%s7277_s6 + $0x104] sm:$0xf]  ;;  %v3822_v43 = vld [vmem:[%s7277_s6 + $0xec] sm:$0xf]  ;;  %v3517_v46 = vld [vmem:[%s7277_s6 + $0xf8] sm:$0xf0] }
  0xc6   :  { %v3528_v8 = vor.u32 %v3825_v61, %v3525_v0  ;;  %v3645_v61 = vld [vmem:[%s7277_s6 + $0x1f8] sm:$0xf0] }
  0xc7   :  { %v4719_v14 = vpop.f32.mrf.mxu2  ;;  %1420 = vmatpush.bf16.msra.mxu0 %v3428_v3  ;;  %1520 = vmatpush.bf16.msra.mxu2 %v3400_v60  ;;  %v3520_v60 = vor.u32 %v3822_v43, %v3517_v46  ;;  %v3515_v46 = vld [vmem:[%s7277_s6 + $0xe8] sm:$0xf] }
  0xc8   :  { %v4727_v19 = vpop.f32.mrf.mxu3  ;;  %v4729_v20 = vpop.f32.mrf.mxu0  ;;  %1569 = vmatpush.bf16.msra.mxu3 %v3528_v8 }
  0xc9   :  { %v4731_v22 = vpop.f32.mrf.mxu1 }
  0xcb   :  { %1421 = vmatpush.bf16.msra.mxu0 %v3412_v39  ;;  %1709 = vmatpush.bf16.msrb.mxu2 %v3520_v60  ;;  %v3643_v60 = vld [vmem:[%s7277_s6 + $0x1e8] sm:$0xf] }
  0xcf   :  { %v4733_v23 = vpop.f32.mrf.mxu2  ;;  %1422 = vmatpush.bf16.msra.mxu0 %v3396_v35  ;;  %v3704_v35 = vld [vmem:[%s7278_s0 + $0x38] sm:$0xff] }
  0xd0   :  { %7337 = vst [vmem:[#allocation2_spill] sm:$0xff] %v4733_v23  ;;  %v4738_v25 = vpop.f32.mrf.mxu3  ;;  %v4740_v26 = vpop.f32.mrf.mxu0 }
  0xd1   :  { %7338 = vst [vmem:[#allocation3_spill] sm:$0xff] %v4738_v25  ;;  %v4742_v29 = vpop.f32.mrf.mxu1 }
  0xd2   :  { %7339 = vst [vmem:[#allocation4_spill] sm:$0xff] %v4740_v26 }
  0xd3   :  { %7340 = vst [vmem:[#allocation5_spill] sm:$0xff] %v4742_v29  ;;  %762 = vmatmul.bf16.gmra.mxu0 %v3700_v24 }
  0xd4   :  { %811 = vmatmul.bf16.gmra.mxu1 %v3700_v24  ;;  %860 = vmatmul.bf16.gmra.mxu2 %v3700_v24 }
  0xd5   :  { %909 = vmatmul.bf16.gmra.mxu3 %v3700_v24 }
  0xd7   :  { %v4762_v38 = vpop.f32.mrf.mxu2 }
  0xd8   :  { %7341 = vst [vmem:[#allocation6_spill] sm:$0xff] %v4762_v38  ;;  %v4770_v50 = vpop.f32.mrf.mxu3  ;;  %v4772_v51 = vpop.f32.mrf.mxu0 }
  0xd9   :  { %7342 = vst [vmem:[#allocation7_spill] sm:$0xff] %v4770_v50  ;;  %v4774_v53 = vpop.f32.mrf.mxu1  ;;  %v3840_v50 = vld [vmem:[%s7277_s6 + $0x174] sm:$0xf0] }
  0xda   :  { %7343 = vst [vmem:[#allocation8_spill] sm:$0xff] %v4772_v51 }
  0xdb   :  { %7344 = vst [vmem:[#allocation9_spill] sm:$0xff] %v4774_v53 }
  0xdf   :  { %v4776_v54 = vpop.f32.mrf.mxu2 }
  0xe0   :  { %7345 = vst [vmem:[#allocation10_spill] sm:$0xff] %v4776_v54  ;;  %v4781_v56 = vpop.f32.mrf.mxu3  ;;  %v4783_v58 = vpop.f32.mrf.mxu0 }
  0xe1   :  { %7346 = vst [vmem:[#allocation11_spill] sm:$0xff] %v4781_v56  ;;  %v4785_v59 = vpop.f32.mrf.mxu1 }
  0xe2   :  { %7347 = vst [vmem:[#allocation12_spill] sm:$0xff] %v4783_v58 }
  0xe3   :  { %7348 = vst [vmem:[#allocation13_spill] sm:$0xff] %v4785_v59  ;;  %767 = vmatmul.bf16.gmra.mxu0 %v3701_v55 }
  0xe4   :  { %816 = vmatmul.bf16.gmra.mxu1 %v3701_v55  ;;  %865 = vmatmul.bf16.gmra.mxu2 %v3701_v55 }
  0xe5   :  { %914 = vmatmul.bf16.gmra.mxu3 %v3701_v55  ;;  %v3540_v55 = vor.u32 %v3831_v40, %v3539_v37  ;;  %v3827_v37 = vld [vmem:[%s7277_s6 + $0x10c] sm:$0xf0] }
  0xe6   :  { %v3524_v40 = vor.u32 %v3827_v37, %v3523_v18 }
  0xe7   :  { %v4805_v10 = vpop.f32.mrf.mxu2  ;;  %1470 = vmatpush.bf16.msra.mxu1 %v3540_v55  ;;  %v3854_v55 = vld [vmem:[%s7277_s6 + $0x1ec] sm:$0xf] }
  0xe8   :  { %7349 = vst [vmem:[#allocation14_spill] sm:$0xff] %v4805_v10  ;;  %v4813_v16 = vpop.f32.mrf.mxu3  ;;  %v4815_v17 = vpop.f32.mrf.mxu0  ;;  %v3648_v8 = vor.u32 %v3854_v55, %v3645_v61  ;;  %v3824_v55 = vld [vmem:[%s7277_s6 + $0xf4] sm:$0xf0] }
  0xe9   :  { %7350 = vst [vmem:[#allocation15_spill] sm:$0xff] %v4813_v16  ;;  %v4817_v21 = vpop.f32.mrf.mxu1  ;;  %v3516_v61 = vor.u32 %v3824_v55, %v3515_v46  ;;  %v3850_v46 = vld [vmem:[%s7277_s6 + $0x1cc] sm:$0xf]  ;;  %v3629_v55 = vld [vmem:[%s7277_s6 + $0x1d8] sm:$0xf0] }
  0xea   :  { %7351 = vst [vmem:[#allocation16_spill] sm:$0xff] %v4815_v17  ;;  %1758 = vmatpush.bf16.msrb.mxu3 %v3648_v8  ;;  %v3856_v8 = vld [vmem:[%s7277_s6 + $0x1f4] sm:$0xf0] }
  0xeb   :  { %7352 = vst [vmem:[#allocation17_spill] sm:$0xff] %v4817_v21  ;;  %1471 = vmatpush.bf16.msra.mxu1 %v3524_v40  ;;  %1611 = vmatpush.bf16.msrb.mxu0 %v3516_v61  ;;  %v3333_v61 = vld [vmem:[%s7279_s3 + $0x8] sm:$0xf0]  ;;  %v3844_v16 = vld [vmem:[%s7277_s6 + $0x194] sm:$0xf0] }
  0xef   :  { %v4819_v24 = vpop.f32.mrf.mxu2 }
  0xf0   :  { %7353 = vst [vmem:[#allocation18_spill] sm:$0xff] %v4819_v24  ;;  %v4824_v31 = vpop.f32.mrf.mxu3  ;;  %v4826_v32 = vpop.f32.mrf.mxu0 }
  0xf1   :  { %7354 = vst [vmem:[#allocation19_spill] sm:$0xff] %v4824_v31  ;;  %v4828_v33 = vpop.f32.mrf.mxu1 }
  0xf2   :  { %7355 = vst [vmem:[#allocation20_spill] sm:$0xff] %v4826_v32 }
  0xf3   :  { %7356 = vst [vmem:[#allocation21_spill] sm:$0xff] %v4828_v33  ;;  %772 = vmatmul.bf16.gmra.mxu0 %v3702_v30 }
  0xf4   :  { %821 = vmatmul.bf16.gmra.mxu1 %v3702_v30  ;;  %870 = vmatmul.bf16.gmra.mxu2 %v3702_v30 }
  0xf5   :  { %919 = vmatmul.bf16.gmra.mxu3 %v3702_v30 }
  0xf7   :  { %v4848_v52 = vpop.f32.mrf.mxu2 }
  0xf8   :  { %7357 = vst [vmem:[#allocation22_spill] sm:$0xff] %v4848_v52  ;;  %v4856_v3 = vpop.f32.mrf.mxu3  ;;  %v4858_v7 = vpop.f32.mrf.mxu0 }
  0xf9   :  { %7358 = vst [vmem:[#allocation23_spill] sm:$0xff] %v4856_v3  ;;  %v4860_v9 = vpop.f32.mrf.mxu1  ;;  %v3469_v3 = vld [vmem:[%s7277_s6 + $0x98] sm:$0xf0] }
  0xfa   :  { %7359 = vst [vmem:[#allocation24_spill] sm:$0xff] %v4858_v7  ;;  %v3810_v7 = vld [vmem:[%s7277_s6 + $0x8c] sm:$0xf] }
  0xfb   :  { %7360 = vst [vmem:[#allocation25_spill] sm:$0xff] %v4860_v9  ;;  %v3848_v9 = vld [vmem:[%s7277_s6 + $0x1b4] sm:$0xf0]  ;;  %v3472_v32 = vor.u32 %v3810_v7, %v3469_v3  ;;  %v3347_v3 = vld [vmem:[%s7279_s3 + $0x20] sm:$0xf] }
  0xfc   :  { %v3782_v7 = vld [vmem:[%s7279_s3 + $0x24] sm:$0xf0] }
  0xff   :  { %v4865_v12 = vpop.f32.mrf.mxu2 }
 0x100   :  { %7361 = vst [vmem:[#allocation26_spill] sm:$0xff] %v4865_v12  ;;  %v4876_v30 = vpop.f32.mrf.mxu3  ;;  %v4878_v34 = vpop.f32.mrf.mxu0 }
 0x101   :  { %7362 = vst [vmem:[#allocation27_spill] sm:$0xff] %v4876_v30  ;;  %v4883_v39 = vpop.f32.mrf.mxu1 }
 0x102   :  { %7363 = vst [vmem:[#allocation28_spill] sm:$0xff] %v4878_v34 }
 0x103   :  { %7364 = vst [vmem:[#allocation29_spill] sm:$0xff] %v4883_v39  ;;  %777 = vmatmul.bf16.gmra.mxu0 %v3703_v11 }
 0x104   :  { %826 = vmatmul.bf16.gmra.mxu1 %v3703_v11  ;;  %875 = vmatmul.bf16.gmra.mxu2 %v3703_v11 }
 0x105   :  { %924 = vmatmul.bf16.gmra.mxu3 %v3703_v11 }
 0x107   :  { %v4897_v0 = vpop.f32.mrf.mxu2 }
 0x108   :  { %7365 = vst [vmem:[#allocation30_spill] sm:$0xff] %v4897_v0  ;;  %v4899_v11 = vpop.f32.mrf.mxu3  ;;  %v4901_v13 = vpop.f32.mrf.mxu0 }
 0x109   :  { %7366 = vst [vmem:[#allocation31_spill] sm:$0xff] %v4899_v11  ;;  %v4903_v15 = vpop.f32.mrf.mxu1  ;;  %v3632_v11 = vor.u32 %v3850_v46, %v3629_v55 }
 0x10a   :  { %7367 = vst [vmem:[#allocation32_spill] sm:$0xff] %v4901_v13 }
 0x10b   :  { %7368 = vst [vmem:[#allocation33_spill] sm:$0xff] %v4903_v15  ;;  %1759 = vmatpush.bf16.msrb.mxu3 %v3632_v11 }
 0x10f   :  { %v4905_v18 = vpop.f32.mrf.mxu2 }
 0x110   :  { %7369 = vst [vmem:[#allocation34_spill] sm:$0xff] %v4905_v18  ;;  %v4910_v37 = vpop.f32.mrf.mxu3  ;;  %v4912_v40 = vpop.f32.mrf.mxu0 }
 0x111   :  { %7370 = vst [vmem:[#allocation35_spill] sm:$0xff] %v4910_v37  ;;  %v4914_v43 = vpop.f32.mrf.mxu1  ;;  %v3644_v37 = vor.u32 %v3856_v8, %v3643_v60  ;;  %v3778_v60 = vld [vmem:[%s7279_s3 + $0x4] sm:$0xf0]  ;;  %v3777_v8 = vld [vmem:[%s7279_s3 + $0x4] sm:$0xf] }
 0x112   :  { %7371 = vst [vmem:[#allocation36_spill] sm:$0xff] %v4912_v40  ;;  %v4968_v46 = vor.u32 %v3777_v8, %v3333_v61  ;;  %v3627_v8 = vld [vmem:[%s7277_s6 + $0x1c8] sm:$0xf] }
 0x113   :  { %7372 = vst [vmem:[#allocation37_spill] sm:$0xff] %v4914_v43  ;;  %782 = vmatmul.bf16.gmra.mxu0 %v3704_v35  ;;  %v3501_v43 = vld [vmem:[%s7277_s6 + $0xd8] sm:$0xf0]  ;;  %1660 = vmatpush.bf16.msrb.mxu1 %v3644_v37 }
 0x114   :  { %831 = vmatmul.bf16.gmra.mxu1 %v3704_v35  ;;  %880 = vmatmul.bf16.gmra.mxu2 %v3704_v35 }
 0x115   :  { %929 = vmatmul.bf16.gmra.mxu3 %v3704_v35  ;;  %v3818_v35 = vld [vmem:[%s7277_s6 + $0xcc] sm:$0xf] }
 0x116   :  { %v3504_v18 = vor.u32 %v3818_v35, %v3501_v43  ;;  %v3331_v43 = vld [vmem:[%s7279_s3] sm:$0xf] }
 0x117   :  { %v4934_v40 = vpop.f32.mrf.mxu2 }
 0x118   :  { %7373 = vst [vmem:[#allocation38_spill] sm:$0xff] %v4934_v40  ;;  %v4942_v15 = vpop.f32.mrf.mxu3  ;;  %v4944_v13 = vpop.f32.mrf.mxu0  ;;  %1710 = vmatpush.bf16.msrb.mxu2 %v3504_v18  ;;  %v4962_v18 = vor.u32 %v3778_v60, %v3331_v43  ;;  %v3499_v43 = vld [vmem:[%s7277_s6 + $0xc8] sm:$0xf]  ;;  %v3820_v60 = vld [vmem:[%s7277_s6 + $0xd4] sm:$0xf0] }
 0x119   :  { %7374 = vst [vmem:[#allocation39_spill] sm:$0xff] %v4942_v15  ;;  %v4946_v0 = vpop.f32.mrf.mxu1  ;;  %v3500_v61 = vor.u32 %v3820_v60, %v3499_v43  ;;  %v3846_v43 = vld [vmem:[%s7277_s6 + $0x1ac] sm:$0xf]  ;;  %v3613_v60 = vld [vmem:[%s7277_s6 + $0x1b8] sm:$0xf0] }
 0x11a   :  { %7375 = vst [vmem:[#allocation40_spill] sm:$0xff] %v4944_v13  ;;  %v3616_v30 = vor.u32 %v3846_v43, %v3613_v60 }
 0x11b   :  { %7376 = vst [vmem:[#allocation41_spill] sm:$0xff] %v4946_v0  ;;  %v3485_v0 = vld [vmem:[%s7277_s6 + $0xb8] sm:$0xf0]  ;;  %1612 = vmatpush.bf16.msrb.mxu0 %v3500_v61 }
 0x11c   :  { %1760 = vmatpush.bf16.msrb.mxu3 %v3616_v30 }
 0x11f   :  { %v4960_v35 = vpop.f32.mrf.mxu2 }
 0x120   :  { %7377 = vst [vmem:[#allocation42_spill] sm:$0xff] %v4960_v35  ;;  %v4964_v11 = vpop.f32.mrf.mxu3  ;;  %v4966_v37 = vpop.f32.mrf.mxu0  ;;  %v3814_v35 = vld [vmem:[%s7277_s6 + $0xac] sm:$0xf] }
 0x121   :  { %7378 = vst [vmem:[#allocation43_spill] sm:$0xff] %v4964_v11  ;;  %v4970_v55 = vpop.f32.mrf.mxu1  ;;  %v3852_v11 = vld [vmem:[%s7277_s6 + $0x1d4] sm:$0xf0]  ;;  %v3488_v40 = vor.u32 %v3814_v35, %v3485_v0  ;;  %v3339_v0 = vld [vmem:[%s7279_s3 + $0x10] sm:$0xf] }
 0x122   :  { %v3628_v15 = vor.u32 %v3852_v11, %v3627_v8  ;;  %v3780_v35 = vld [vmem:[%s7279_s3 + $0x14] sm:$0xf0]  ;;  %v3779_v11 = vld [vmem:[%s7279_s3 + $0x14] sm:$0xf]  ;;  %v3341_v8 = vld [vmem:[%s7279_s3 + $0x18] sm:$0xf0] }
 0x123   :  { %1423 = vmatmul.bf16.vlgmr.msra.gmra.mxu0 %v4962_v18  ;;  %1711 = vmatpush.bf16.msrb.mxu2 %v3488_v40  ;;  %v5028_v43 = vor.u32 %v3779_v11, %v3341_v8  ;;  %v3611_v11 = vld [vmem:[%s7277_s6 + $0x1a8] sm:$0xf] }
 0x124   :  { %1472 = vmatmul.bf16.vlgmr.msra.gmra.mxu1 %v4968_v46  ;;  %1521 = vmatmul.bf16.vlgmr.msra.gmra.mxu2 %v4962_v18  ;;  %v3612_v33 = vor.u32 %v3848_v9, %v3611_v11  ;;  %v3781_v9 = vld [vmem:[%s7279_s3 + $0x24] sm:$0xf]  ;;  %v3349_v11 = vld [vmem:[%s7279_s3 + $0x28] sm:$0xf0] }
 0x125   :  { %1570 = vmatmul.bf16.vlgmr.msra.gmra.mxu3 %v4968_v46  ;;  %1661 = vmatpush.bf16.msrb.mxu1 %v3628_v15  ;;  %v5022_v15 = vor.u32 %v3780_v35, %v3339_v0  ;;  %v3483_v0 = vld [vmem:[%s7277_s6 + $0xa8] sm:$0xf]  ;;  %v3816_v35 = vld [vmem:[%s7277_s6 + $0xb4] sm:$0xf0] }
 0x126   :  { %v3484_v8 = vor.u32 %v3816_v35, %v3483_v0  ;;  %v3842_v0 = vld [vmem:[%s7277_s6 + $0x18c] sm:$0xf]  ;;  %v3597_v35 = vld [vmem:[%s7277_s6 + $0x198] sm:$0xf0] }
 0x127   :  { %v4994_v13 = vpop.f32.mrf.mxu2  ;;  %v3600_v21 = vor.u32 %v3842_v0, %v3597_v35  ;;  %1712 = vmatpush.bf16.msrb.mxu2 %v3472_v32  ;;  %v5082_v32 = vor.u32 %v3782_v7, %v3347_v3  ;;  %v5088_v0 = vor.u32 %v3781_v9, %v3349_v11  ;;  %v3467_v3 = vld [vmem:[%s7277_s6 + $0x88] sm:$0xf]  ;;  %v3812_v7 = vld [vmem:[%s7277_s6 + $0x94] sm:$0xf0] }
 0x128   :  { %v5002_v39 = vpop.f32.mrf.mxu3  ;;  %v5004_v34 = vpop.f32.mrf.mxu0  ;;  %1613 = vmatpush.bf16.msrb.mxu0 %v3484_v8  ;;  %v3595_v9 = vld [vmem:[%s7277_s6 + $0x188] sm:$0xf]  ;;  %v3468_v11 = vor.u32 %v3812_v7, %v3467_v3  ;;  %v3838_v3 = vld [vmem:[%s7277_s6 + $0x16c] sm:$0xf]  ;;  %v3581_v7 = vld [vmem:[%s7277_s6 + $0x178] sm:$0xf0] }
 0x129   :  { %v5006_v12 = vpop.f32.mrf.mxu1  ;;  %1662 = vmatpush.bf16.msrb.mxu1 %v3612_v33  ;;  %1761 = vmatpush.bf16.msrb.mxu3 %v3600_v21  ;;  %7379 = vst [vmem:[#allocation44_spill] sm:$0xff] %v5082_v32  ;;  %v3596_v59 = vor.u32 %v3844_v16, %v3595_v9  ;;  %v3584_v53 = vor.u32 %v3838_v3, %v3581_v7  ;;  %v3355_v16 = vld [vmem:[%s7279_s3 + $0x30] sm:$0xf]  ;;  %v3357_v9 = vld [vmem:[%s7279_s3 + $0x38] sm:$0xf0] }
 0x12a   :  { %7380 = vst [vmem:[#allocation45_spill] sm:$0xff] %v5088_v0 }
 0x12c   :  { %1614 = vmatpush.bf16.msrb.mxu0 %v3468_v11 }
 0x12d   :  { %1663 = vmatpush.bf16.msrb.mxu1 %v3596_v59  ;;  %1762 = vmatpush.bf16.msrb.mxu3 %v3584_v53 }
 0x12f   :  { %v5020_v61 = vpop.f32.mrf.mxu2 }
 0x130   :  { %v5024_v30 = vpop.f32.mrf.mxu3  ;;  %v5026_v40 = vpop.f32.mrf.mxu0 }
 0x131   :  { %v5030_v60 = vpop.f32.mrf.mxu1 }
 0x133   :  { %1428 = vmatmul.bf16.gmra.mxu0 %v5022_v15 }
 0x134   :  { %1477 = vmatmul.bf16.gmra.mxu1 %v5028_v43  ;;  %1526 = vmatmul.bf16.gmra.mxu2 %v5022_v15 }
 0x135   :  { %1575 = vmatmul.bf16.gmra.mxu3 %v5028_v43 }
 0x137   :  { %v5054_v52 = vpop.f32.mrf.mxu2 }
 0x138   :  { %v5062_v31 = vpop.f32.mrf.mxu3  ;;  %v5064_v24 = vpop.f32.mrf.mxu0 }
 0x139   :  { %v5066_v17 = vpop.f32.mrf.mxu1 }
 0x13f   :  { %v5080_v8 = vpop.f32.mrf.mxu2 }
 0x140   :  { %v5084_v21 = vpop.f32.mrf.mxu3  ;;  %v5086_v33 = vpop.f32.mrf.mxu0 }
 0x141   :  { %v5090_v35 = vpop.f32.mrf.mxu1 }
 0x143   :  { %1433 = vmatmul.bf16.gmra.mxu0 %v5082_v32 }
 0x144   :  { %1482 = vmatmul.bf16.gmra.mxu1 %v5088_v0  ;;  %1531 = vmatmul.bf16.gmra.mxu2 %v5082_v32  ;;  %v3453_v32 = vld [vmem:[%s7277_s6 + $0x78] sm:$0xf0] }
 0x145   :  { %1580 = vmatmul.bf16.gmra.mxu3 %v5088_v0  ;;  %v3806_v0 = vld [vmem:[%s7277_s6 + $0x6c] sm:$0xf] }
 0x146   :  { %v3456_v58 = vor.u32 %v3806_v0, %v3453_v32  ;;  %v3784_v32 = vld [vmem:[%s7279_s3 + $0x34] sm:$0xf0]  ;;  %v3783_v0 = vld [vmem:[%s7279_s3 + $0x34] sm:$0xf] }
 0x147   :  { %v5114_v10 = vpop.f32.mrf.mxu2  ;;  %v5148_v3 = vor.u32 %v3783_v0, %v3357_v9  ;;  %v3579_v0 = vld [vmem:[%s7277_s6 + $0x168] sm:$0xf] }
 0x148   :  { %v5122_v56 = vpop.f32.mrf.mxu3  ;;  %v5124_v54 = vpop.f32.mrf.mxu0  ;;  %1713 = vmatpush.bf16.msrb.mxu2 %v3456_v58  ;;  %v5142_v58 = vor.u32 %v3784_v32, %v3355_v16  ;;  %v3451_v16 = vld [vmem:[%s7277_s6 + $0x68] sm:$0xf]  ;;  %v3808_v32 = vld [vmem:[%s7277_s6 + $0x74] sm:$0xf0] }
 0x149   :  { %v5126_v51 = vpop.f32.mrf.mxu1  ;;  %7385 = vst [vmem:[#allocation50_spill] sm:$0xff] %v5148_v3  ;;  %v3452_v9 = vor.u32 %v3808_v32, %v3451_v16  ;;  %v3834_v16 = vld [vmem:[%s7277_s6 + $0x14c] sm:$0xf]  ;;  %v3565_v32 = vld [vmem:[%s7277_s6 + $0x158] sm:$0xf0] }
 0x14a   :  { %7382 = vst [vmem:[#allocation47_spill] sm:$0xff] %v5142_v58 }
 0x14b   :  { %1615 = vmatpush.bf16.msrb.mxu0 %v3452_v9 }
 0x14f   :  { %v5140_v11 = vpop.f32.mrf.mxu2 }
 0x150   :  { %7381 = vst [vmem:[#allocation46_spill] sm:$0xff] %v5140_v11  ;;  %v5144_v53 = vpop.f32.mrf.mxu3  ;;  %v5146_v59 = vpop.f32.mrf.mxu0 }
 0x151   :  { %7383 = vst [vmem:[#allocation48_spill] sm:$0xff] %v5144_v53  ;;  %v5150_v7 = vpop.f32.mrf.mxu1  ;;  %v3568_v53 = vor.u32 %v3834_v16, %v3565_v32 }
 0x152   :  { %7384 = vst [vmem:[#allocation49_spill] sm:$0xff] %v5146_v59 }
 0x153   :  { %7386 = vst [vmem:[#allocation51_spill] sm:$0xff] %v5150_v7  ;;  %1438 = vmatmul.bf16.gmra.mxu0 %v5142_v58  ;;  %v3580_v7 = vor.u32 %v3840_v50, %v3579_v0  ;;  %1763 = vmatpush.bf16.msrb.mxu3 %v3568_v53  ;;  %v3363_v50 = vld [vmem:[%s7279_s3 + $0x40] sm:$0xf]  ;;  %v3365_v0 = vld [vmem:[%s7279_s3 + $0x48] sm:$0xf0] }
 0x154   :  { %1487 = vmatmul.bf16.gmra.mxu1 %v5148_v3  ;;  %1536 = vmatmul.bf16.gmra.mxu2 %v5142_v58  ;;  %v3437_v58 = vld [vmem:[%s7277_s6 + $0x58] sm:$0xf0] }
 0x155   :  { %1585 = vmatmul.bf16.gmra.mxu3 %v5148_v3  ;;  %v3802_v3 = vld [vmem:[%s7277_s6 + $0x4c] sm:$0xf]  ;;  %1664 = vmatpush.bf16.msrb.mxu1 %v3580_v7 }
 0x156   :  { %v3440_v29 = vor.u32 %v3802_v3, %v3437_v58  ;;  %v3786_v58 = vld [vmem:[%s7279_s3 + $0x44] sm:$0xf0]  ;;  %v3785_v3 = vld [vmem:[%s7279_s3 + $0x44] sm:$0xf] }
 0x157   :  { %v5174_v38 = vpop.f32.mrf.mxu2  ;;  %v5208_v16 = vor.u32 %v3785_v3, %v3365_v0  ;;  %v3563_v3 = vld [vmem:[%s7277_s6 + $0x148] sm:$0xf] }
 0x158   :  { %7387 = vst [vmem:[#allocation52_spill] sm:$0xff] %v5174_v38  ;;  %v5182_v59 = vpop.f32.mrf.mxu3  ;;  %v5184_v26 = vpop.f32.mrf.mxu0  ;;  %1714 = vmatpush.bf16.msrb.mxu2 %v3440_v29  ;;  %v5202_v29 = vor.u32 %v3786_v58, %v3363_v50  ;;  %v3435_v50 = vld [vmem:[%s7277_s6 + $0x48] sm:$0xf]  ;;  %v3804_v58 = vld [vmem:[%s7277_s6 + $0x54] sm:$0xf0] }
 0x159   :  { %7388 = vst [vmem:[#allocation53_spill] sm:$0xff] %v5182_v59  ;;  %v5186_v25 = vpop.f32.mrf.mxu1  ;;  %v3436_v0 = vor.u32 %v3804_v58, %v3435_v50  ;;  %v3830_v50 = vld [vmem:[%s7277_s6 + $0x12c] sm:$0xf]  ;;  %v3549_v58 = vld [vmem:[%s7277_s6 + $0x138] sm:$0xf0] }
 0x15a   :  { %7389 = vst [vmem:[#allocation54_spill] sm:$0xff] %v5184_v26  ;;  %v3552_v59 = vor.u32 %v3830_v50, %v3549_v58 }
 0x15b   :  { %7390 = vst [vmem:[#allocation55_spill] sm:$0xff] %v5186_v25  ;;  %1616 = vmatpush.bf16.msrb.mxu0 %v3436_v0 }
 0x15c   :  { %7392 = vst [vmem:[#allocation57_spill] sm:$0xff] %v5202_v29  ;;  %1764 = vmatpush.bf16.msrb.mxu3 %v3552_v59 }
 0x15d   :  { %7395 = vst [vmem:[#allocation60_spill] sm:$0xff] %v5208_v16 }
 0x15f   :  { %v5200_v9 = vpop.f32.mrf.mxu2 }
 0x160   :  { %7391 = vst [vmem:[#allocation56_spill] sm:$0xff] %v5200_v9  ;;  %v5204_v53 = vpop.f32.mrf.mxu3  ;;  %v5206_v7 = vpop.f32.mrf.mxu0 }
 0x161   :  { %7393 = vst [vmem:[#allocation58_spill] sm:$0xff] %v5204_v53  ;;  %v5210_v32 = vpop.f32.mrf.mxu1 }
 0x162   :  { %7394 = vst [vmem:[#allocation59_spill] sm:$0xff] %v5206_v7 }
 0x163   :  { %7396 = vst [vmem:[#allocation61_spill] sm:$0xff] %v5210_v32  ;;  %1443 = vmatmul.bf16.gmra.mxu0 %v5202_v29  ;;  %v3836_v32 = vld [vmem:[%s7277_s6 + $0x154] sm:$0xf0] }
 0x164   :  { %1492 = vmatmul.bf16.gmra.mxu1 %v5208_v16  ;;  %1541 = vmatmul.bf16.gmra.mxu2 %v5202_v29  ;;  %v3421_v29 = vld [vmem:[%s7277_s6 + $0x38] sm:$0xf0]  ;;  %v3564_v53 = vor.u32 %v3836_v32, %v3563_v3  ;;  %v3787_v32 = vld [vmem:[%s7279_s3 + $0x54] sm:$0xf] }
 0x165   :  { %1590 = vmatmul.bf16.gmra.mxu3 %v5208_v16  ;;  %v3798_v16 = vld [vmem:[%s7277_s6 + $0x2c] sm:$0xf]  ;;  %v3373_v3 = vld [vmem:[%s7279_s3 + $0x58] sm:$0xf0] }
 0x166   :  { %v3424_v9 = vor.u32 %v3798_v16, %v3421_v29  ;;  %1665 = vmatpush.bf16.msrb.mxu1 %v3564_v53  ;;  %v3371_v29 = vld [vmem:[%s7279_s3 + $0x50] sm:$0xf]  ;;  %v3788_v16 = vld [vmem:[%s7279_s3 + $0x54] sm:$0xf0]  ;;  %v5268_v50 = vor.u32 %v3787_v32, %v3373_v3  ;;  %v3547_v32 = vld [vmem:[%s7277_s6 + $0x128] sm:$0xf] }
 0x167   :  { %v5234_v7 = vpop.f32.mrf.mxu2 }
 0x168   :  { %7397 = vst [vmem:[#allocation62_spill] sm:$0xff] %v5234_v7  ;;  %v5242_v25 = vpop.f32.mrf.mxu3  ;;  %v5244_v26 = vpop.f32.mrf.mxu0  ;;  %1715 = vmatpush.bf16.msrb.mxu2 %v3424_v9  ;;  %v5262_v9 = vor.u32 %v3788_v16, %v3371_v29  ;;  %v3419_v29 = vld [vmem:[%s7277_s6 + $0x28] sm:$0xf]  ;;  %v3800_v16 = vld [vmem:[%s7277_s6 + $0x34] sm:$0xf0] }
 0x169   :  { %7398 = vst [vmem:[#allocation63_spill] sm:$0xff] %v5242_v25  ;;  %v5246_v38 = vpop.f32.mrf.mxu1  ;;  %v3420_v3 = vor.u32 %v3800_v16, %v3419_v29  ;;  %v3826_v29 = vld [vmem:[%s7277_s6 + $0x10c] sm:$0xf]  ;;  %v3533_v16 = vld [vmem:[%s7277_s6 + $0x118] sm:$0xf0] }
 0x16a   :  { %7399 = vst [vmem:[#allocation64_spill] sm:$0xff] %v5244_v26  ;;  %v3536_v25 = vor.u32 %v3826_v29, %v3533_v16  ;;  %v3531_v29 = vld [vmem:[%s7277_s6 + $0x108] sm:$0xf] }
 0x16b   :  { %7400 = vst [vmem:[#allocation65_spill] sm:$0xff] %v5246_v38  ;;  %1617 = vmatpush.bf16.msrb.mxu0 %v3420_v3 }
 0x16c   :  { %7402 = vst [vmem:[#allocation67_spill] sm:$0xff] %v5262_v9  ;;  %1765 = vmatpush.bf16.msrb.mxu3 %v3536_v25  ;;  %v3403_v25 = vld [vmem:[%s7277_s6 + $0x8] sm:$0xf] }
 0x16d   :  { %7405 = vst [vmem:[#allocation70_spill] sm:$0xff] %v5268_v50 }
 0x16f   :  { %v5260_v0 = vpop.f32.mrf.mxu2 }
 0x170   :  { %7401 = vst [vmem:[#allocation66_spill] sm:$0xff] %v5260_v0  ;;  %v5264_v59 = vpop.f32.mrf.mxu3  ;;  %v5266_v53 = vpop.f32.mrf.mxu0 }
 0x171   :  { %7403 = vst [vmem:[#allocation68_spill] sm:$0xff] %v5264_v59  ;;  %v5270_v58 = vpop.f32.mrf.mxu1 }
 0x172   :  { %7404 = vst [vmem:[#allocation69_spill] sm:$0xff] %v5266_v53 }
 0x173   :  { %7406 = vst [vmem:[#allocation71_spill] sm:$0xff] %v5270_v58  ;;  %1448 = vmatmul.bf16.gmra.mxu0 %v5262_v9  ;;  %v3832_v58 = vld [vmem:[%s7277_s6 + $0x134] sm:$0xf0] }
 0x174   :  { %1497 = vmatmul.bf16.gmra.mxu1 %v5268_v50  ;;  %1546 = vmatmul.bf16.gmra.mxu2 %v5262_v9  ;;  %v3405_v9 = vld [vmem:[%s7277_s6 + $0x18] sm:$0xf0]  ;;  %v3548_v59 = vor.u32 %v3832_v58, %v3547_v32  ;;  %v3789_v58 = vld [vmem:[%s7279_s3 + $0x64] sm:$0xf]  ;;  %v3381_v32 = vld [vmem:[%s7279_s3 + $0x68] sm:$0xf0] }
 0x175   :  { %1595 = vmatmul.bf16.gmra.mxu3 %v5268_v50  ;;  %v3794_v50 = vld [vmem:[%s7277_s6 + $0xc] sm:$0xf] }
 0x176   :  { %v3408_v0 = vor.u32 %v3794_v50, %v3405_v9  ;;  %1666 = vmatpush.bf16.msrb.mxu1 %v3548_v59  ;;  %v3379_v9 = vld [vmem:[%s7279_s3 + $0x60] sm:$0xf]  ;;  %v3790_v50 = vld [vmem:[%s7279_s3 + $0x64] sm:$0xf0]  ;;  %v3796_v59 = vld [vmem:[%s7277_s6 + $0x14] sm:$0xf0] }
 0x177   :  { %v5294_v53 = vpop.f32.mrf.mxu2 }
 0x178   :  { %7407 = vst [vmem:[#allocation72_spill] sm:$0xff] %v5294_v53  ;;  %v5302_v38 = vpop.f32.mrf.mxu3  ;;  %v5304_v26 = vpop.f32.mrf.mxu0  ;;  %1716 = vmatpush.bf16.msrb.mxu2 %v3408_v0  ;;  %v5322_v0 = vor.u32 %v3790_v50, %v3379_v9  ;;  %v3404_v9 = vor.u32 %v3796_v59, %v3403_v25  ;;  %v3828_v50 = vld [vmem:[%s7277_s6 + $0x114] sm:$0xf0] }
 0x179   :  { %7408 = vst [vmem:[#allocation73_spill] sm:$0xff] %v5302_v38  ;;  %v5306_v7 = vpop.f32.mrf.mxu1  ;;  %v3532_v38 = vor.u32 %v3828_v50, %v3531_v29  ;;  %v3387_v29 = vld [vmem:[%s7279_s3 + $0x70] sm:$0xf]  ;;  %v3389_v50 = vld [vmem:[%s7279_s3 + $0x78] sm:$0xf0] }
 0x17a   :  { %7409 = vst [vmem:[#allocation74_spill] sm:$0xff] %v5304_v26  ;;  %v5337_v26 = vor.u32 %v3789_v58, %v3381_v32  ;;  %1618 = vmatpush.bf16.msrb.mxu0 %v3404_v9  ;;  %v3791_v9 = vld [vmem:[%s7279_s3 + $0x74] sm:$0xf] }
 0x17b   :  { %7410 = vst [vmem:[#allocation75_spill] sm:$0xff] %v5306_v7  ;;  %1667 = vmatpush.bf16.msrb.mxu1 %v3532_v38  ;;  %v3792_v38 = vld [vmem:[%s7279_s3 + $0x74] sm:$0xf0] }
 0x17c   :  { %7412 = vst [vmem:[#allocation77_spill] sm:$0xff] %v5322_v0 }
 0x17d   :  { %7415 = vst [vmem:[#allocation80_spill] sm:$0xff] %v5337_v26 }
 0x17f   :  { %v5320_v3 = vpop.f32.mrf.mxu2 }
 0x180   :  { %7411 = vst [vmem:[#allocation76_spill] sm:$0xff] %v5320_v3  ;;  %v5333_v16 = vpop.f32.mrf.mxu3  ;;  %v5335_v7 = vpop.f32.mrf.mxu0 }
 0x181   :  { %7413 = vst [vmem:[#allocation78_spill] sm:$0xff] %v5333_v16  ;;  %v5342_v3 = vpop.f32.mrf.mxu1 }
 0x182   :  { %7414 = vst [vmem:[#allocation79_spill] sm:$0xff] %v5335_v7 }
 0x183   :  { %7416 = vst [vmem:[#allocation81_spill] sm:$0xff] %v5342_v3  ;;  %1453 = vmatmul.bf16.gmra.mxu0 %v5322_v0 }
 0x184   :  { %1502 = vmatmul.bf16.gmra.mxu1 %v5337_v26  ;;  %1551 = vmatmul.bf16.gmra.mxu2 %v5322_v0  ;;  %v5370_v0 = vor.u32 %v3792_v38, %v3387_v29 }
 0x185   :  { %1600 = vmatmul.bf16.gmra.mxu3 %v5337_v26 }
 0x186   :  { %7422 = vst [vmem:[#allocation87_spill] sm:$0xff] %v5370_v0 }
 0x187   :  { %v5348_v58 = vpop.f32.mrf.mxu2 }
 0x188   :  { %7417 = vst [vmem:[#allocation82_spill] sm:$0xff] %v5348_v58  ;;  %v5350_v32 = vpop.f32.mrf.mxu3  ;;  %v5352_v25 = vpop.f32.mrf.mxu0 }
 0x189   :  { %7418 = vst [vmem:[#allocation83_spill] sm:$0xff] %v5350_v32  ;;  %v5354_v59 = vpop.f32.mrf.mxu1  ;;  %v5376_v32 = vor.u32 %v3791_v9, %v3389_v50 }
 0x18a   :  { %7419 = vst [vmem:[#allocation84_spill] sm:$0xff] %v5352_v25 }
 0x18b   :  { %7420 = vst [vmem:[#allocation85_spill] sm:$0xff] %v5354_v59 }
 0x18c   :  { %7425 = vst [vmem:[#allocation90_spill] sm:$0xff] %v5376_v32 }
 0x18f   :  { %v5368_v26 = vpop.f32.mrf.mxu2 }
 0x190   :  { %7421 = vst [vmem:[#allocation86_spill] sm:$0xff] %v5368_v26  ;;  %v5372_v59 = vpop.f32.mrf.mxu3  ;;  %v5374_v25 = vpop.f32.mrf.mxu0 }
 0x191   :  { %7423 = vst [vmem:[#allocation88_spill] sm:$0xff] %v5372_v59  ;;  %v5378_v58 = vpop.f32.mrf.mxu1 }
 0x192   :  { %7424 = vst [vmem:[#allocation89_spill] sm:$0xff] %v5374_v25  ;;  %v1871_v25 = vld [vmem:[%s7280_s7] sm:$0xf] }
 0x193   :  { %7426 = vst [vmem:[#allocation91_spill] sm:$0xff] %v5378_v58  ;;  %1458 = vmatmul.bf16.gmra.mxu0 %v5370_v0  ;;  %v5401_v26 = vperm.slane %v1871_v25, 0 }
 0x194   :  { %1507 = vmatmul.bf16.gmra.mxu1 %v5376_v32  ;;  %1556 = vmatmul.bf16.gmra.mxu2 %v5370_v0 }
 0x195   :  { %1605 = vmatmul.bf16.gmra.mxu3 %v5376_v32  ;;  %v749_v32 = vadd.f32 %v4966_v37, %v4611_v27  ;;  %v798_v27 = vadd.f32 %v4970_v55, %v4613_v28  ;;  %v5418_v55 = vadd.f32 %v4994_v13, %v4633_v36  ;;  %v5434_v36 = vadd.f32 %v5024_v30, %v4652_v47 }
 0x197   :  { %v5384_v3 = vpop.f32.mrf.mxu2  ;;  %7434 = vst [vmem:[#allocation99_spill] sm:$0xff] %v5434_v36 }
 0x198   :  { %7427 = vst [vmem:[#allocation92_spill] sm:$0xff] %v5384_v3  ;;  %v5386_v29 = vpop.f32.mrf.mxu3  ;;  %v5388_v38 = vpop.f32.mrf.mxu0 }
 0x199   :  { %7428 = vst [vmem:[#allocation93_spill] sm:$0xff] %v5386_v29  ;;  %v5390_v59 = vpop.f32.mrf.mxu1 }
 0x19a   :  { %7429 = vst [vmem:[#allocation94_spill] sm:$0xff] %v5388_v38 }
 0x19b   :  { %7430 = vst [vmem:[#allocation95_spill] sm:$0xff] %v5390_v59 }
 0x19f   :  { %v5392_v9 = vpop.f32.mrf.mxu2 }
 0x1a0   :  { %7431 = vst [vmem:[#allocation96_spill] sm:$0xff] %v5392_v9  ;;  %v5394_v50 = vpop.f32.mrf.mxu3  ;;  %v1424_v58 = vpop.f32.mrf.mxu0 }
 0x1a1   :  { %7432 = vst [vmem:[#allocation97_spill] sm:$0xff] %v5394_v50  ;;  %v1473_v0 = vpop.f32.mrf.mxu1 }
 0x1a2   :  { %v1474_v3 = vadd.f32 %v1473_v0, %v1424_v58  ;;  %v5410_v0 = vperm.slane %v1871_v25, 1 }
 0x1a3   :  { %1619 = vmatmul.bf16.vlgmr.msrb.gmra.mxu0 %v4962_v18 }
 0x1a4   :  { %v1807_v38 = vadd.f32 %v1474_v3, %v749_v32  ;;  %1668 = vmatmul.bf16.vlgmr.msrb.gmra.mxu1 %v4968_v46  ;;  %1717 = vmatmul.bf16.vlgmr.msrb.gmra.mxu2 %v4962_v18  ;;  %v751_v3 = vadd.f32 %v5004_v34, %v4643_v42  ;;  %v800_v42 = vadd.f32 %v5006_v12, %v4645_v44 }
 0x1a5   :  { %1766 = vmatmul.bf16.vlgmr.msrb.gmra.mxu3 %v4968_v46  ;;  %v803_v44 = vadd.f32 %v5030_v60, %v4656_v49 }
 0x1a6   :  { %v1881_v50 = vadd.f32 %v5401_v26, %v1807_v38 }
 0x1a7   :  { %v1522_v9 = vpop.f32.mrf.mxu2 }
 0x1a8   :  { %v1571_v59 = vpop.f32.mrf.mxu3  ;;  %v1426_v29 = vpop.f32.mrf.mxu0  ;;  %v3649_v7 = vmul.f32 -1.442695, %v1881_v50  ;;  %v7455_v50 = vld [vmem:[#allocation53_spill] sm:$0xff] }
 0x1a9   :  { %v1572_v37 = vadd.f32 %v1571_v59, %v1522_v9  ;;  %v1475_v58 = vpop.f32.mrf.mxu1  ;;  %v5424_v59 = vadd.f32 %v5002_v39, %v4641_v41  ;;  %v7441_v39 = vld [vmem:[#allocation2_spill] sm:$0xff]  ;;  %v7454_v9 = vld [vmem:[#allocation7_spill] sm:$0xff] }
 0x1aa   :  { %v1476_v32 = vadd.f32 %v1475_v58, %v1426_v29  ;;  %3857 = vpow2.f32 %v3649_v7  ;;  %v5428_v7 = vadd.f32 %v5020_v61, %v4647_v45  ;;  %v5445_v45 = vadd.f32 %v5062_v31, %v4684_v62  ;;  %v7458_v58 = vld [vmem:[#allocation54_spill] sm:$0xff] }
 0x1ab   :  { %v1808_v18 = vadd.f32 %v1572_v37, %v798_v27  ;;  %v5461_v62 = vadd.f32 %v5084_v21, %v4695_v4  ;;  %v5479_v4 = vadd.f32 %v5122_v56, %v4727_v19  ;;  %v5483_v31 = vadd.f32 %v5124_v54, %v4729_v20  ;;  %v7447_v19 = vld [vmem:[#allocation4_spill] sm:$0xff]  ;;  %v7448_v56 = vld [vmem:[#allocation49_spill] sm:$0xff] }
 0x1ac   :  { %v1811_v16 = vadd.f32 %v1476_v32, %v751_v3  ;;  %7433 = vst [vmem:[#allocation98_spill] sm:$0xff] %v5428_v7  ;;  %v7452_v21 = vld [vmem:[#allocation52_spill] sm:$0xff]  ;;  %v5514_v27 = vadd.f32 %v7455_v50, %v7454_v9  ;;  %v7481_v50 = vld [vmem:[#allocation18_spill] sm:$0xff]  ;;  %v7551_v7 = vld [vmem:[#allocation47_spill] sm:$0xff] }
 0x1ad   :  { %v1882_v46 = vadd.f32 %v5410_v0, %v1808_v18  ;;  %7436 = vst [vmem:[#allocation101_spill] sm:$0xff] %v5445_v45  ;;  %v7457_v37 = vld [vmem:[#allocation8_spill] sm:$0xff]  ;;  %v7459_v18 = vld [vmem:[#allocation9_spill] sm:$0xff] }
 0x1ae   :  { %v1885_v11 = vadd.f32 %v5401_v26, %v1811_v16  ;;  %v754_v16 = vadd.f32 %v5026_v40, %v4654_v48  ;;  %v756_v48 = vadd.f32 %v5064_v24, %v4686_v63  ;;  %7438 = vst [vmem:[#allocation103_spill] sm:$0xff] %v5461_v62  ;;  %v5467_v24 = vadd.f32 %v5086_v33, %v4697_v5 }
 0x1af   :  { %v3665_v38 = vmul.f32 -1.442695, %v1882_v46  ;;  %v1524_v53 = vpop.f32.mrf.mxu2  ;;  %7440 = vst [vmem:[#allocation105_spill] sm:$0xff] %v5479_v4  ;;  %v5487_v5 = vadd.f32 %v5126_v51, %v4731_v22  ;;  %v5499_v40 = vadd.f32 %v7448_v56, %v7447_v19  ;;  %v7449_v51 = vld [vmem:[#allocation5_spill] sm:$0xff]  ;;  %v5518_v3 = vadd.f32 %v7458_v58, %v7457_v37  ;;  %v7460_v46 = vld [vmem:[#allocation55_spill] sm:$0xff]  ;;  %v7485_v58 = vld [vmem:[#allocation68_spill] sm:$0xff] }
 0x1b0   :  { %v1573_v23 = vpop.f32.mrf.mxu3  ;;  %v1429_v28 = vpop.f32.mrf.mxu0  ;;  %v3650_v12 = vmul.f32 -1.442695, %v1885_v11 }
 0x1b1   :  { %3859 = vpow2.f32 %v3665_v38  ;;  %v1574_v34 = vadd.f32 %v1573_v23, %v1524_v53  ;;  %v1478_v25 = vpop.f32.mrf.mxu1  ;;  %v5440_v23 = vadd.f32 %v5054_v52, %v4676_v57  ;;  %v3858_v49 = vpop.eup %3857  ;;  %v5453_v57 = vadd.f32 %v5066_v17, %v4688_v1 }
 0x1b2   :  { %v1479_v29 = vadd.f32 %v1478_v25, %v1429_v28  ;;  %v5457_v52 = vadd.f32 %v5080_v8, %v4690_v2  ;;  %v5471_v1 = vadd.f32 %v5090_v35, %v4699_v6  ;;  %v5475_v2 = vadd.f32 %v5114_v10, %v4719_v14  ;;  %v7442_v6 = vld [vmem:[#allocation46_spill] sm:$0xff]  ;;  %v7444_v10 = vld [vmem:[#allocation3_spill] sm:$0xff] }
 0x1b3   :  { %7435 = vst [vmem:[#allocation100_spill] sm:$0xff] %v5440_v23  ;;  %v1812_v41 = vadd.f32 %v1574_v34, %v800_v42  ;;  %1624 = vmatmul.bf16.gmra.mxu0 %v5022_v15  ;;  %v5491_v13 = vadd.f32 %v7442_v6, %v7441_v39  ;;  %v5501_v20 = vadd.f32 1.0, %v3858_v49  ;;  %3861 = vpow2.f32 %v3650_v12  ;;  %v7451_v8 = vld [vmem:[#allocation6_spill] sm:$0xff]  ;;  %v7462_v42 = vld [vmem:[#allocation56_spill] sm:$0xff]  ;;  %v7468_v49 = vld [vmem:[#allocation59_spill] sm:$0xff] }
 0x1b4   :  { %v1815_v47 = vadd.f32 %v1479_v29, %v754_v16  ;;  %1673 = vmatmul.bf16.gmra.mxu1 %v5028_v43  ;;  %1722 = vmatmul.bf16.gmra.mxu2 %v5022_v15  ;;  %7437 = vst [vmem:[#allocation102_spill] sm:$0xff] %v5457_v52  ;;  %v7445_v15 = vld [vmem:[#allocation48_spill] sm:$0xff]  ;;  %v5509_v33 = vadd.f32 %v7452_v21, %v7451_v8  ;;  %v7461_v28 = vld [vmem:[#allocation10_spill] sm:$0xff]  ;;  %v7464_v29 = vld [vmem:[#allocation11_spill] sm:$0xff] }
 0x1b5   :  { %v1886_v63 = vadd.f32 %v5410_v0, %v1812_v41  ;;  %1771 = vmatmul.bf16.gmra.mxu3 %v5028_v43  ;;  %7439 = vst [vmem:[#allocation104_spill] sm:$0xff] %v5475_v2  ;;  %v5495_v30 = vadd.f32 %v7445_v15, %v7444_v10  ;;  %v7450_v43 = vld [vmem:[#allocation51_spill] sm:$0xff]  ;;  %v5524_v38 = vadd.f32 %v7460_v46, %v7459_v18  ;;  %v7465_v41 = vld [vmem:[#allocation58_spill] sm:$0xff]  ;;  %v7470_v39 = vld [vmem:[#allocation61_spill] sm:$0xff]  ;;  %vm2014_vm0 = vweird.f32 %v5501_v20 }
 0x1b6   :  { %7443 = vst [vmem:[#allocation2_spill] sm:$0xff] %v5491_v13  ;;  %v5505_v60 = vadd.f32 %v7450_v43, %v7449_v51  ;;  %v1889_v35 = vadd.f32 %v5401_v26, %v1815_v47  ;;  %v5528_v34 = vadd.f32 %v7462_v42, %v7461_v28  ;;  %v5532_v12 = vadd.f32 %v7465_v41, %v7464_v29  ;;  %v7467_v47 = vld [vmem:[#allocation12_spill] sm:$0xff]  ;;  %v7488_v28 = vld [vmem:[#allocation69_spill] sm:$0xff] }
 0x1b7   :  { %v3860_v17 = vpop.eup %3859  ;;  %v3666_v61 = vmul.f32 -1.442695, %v1886_v63  ;;  %v1527_v14 = vpop.f32.mrf.mxu2  ;;  %7446 = vst [vmem:[#allocation46_spill] sm:$0xff] %v5495_v30  ;;  %v5536_v63 = vadd.f32 %v7468_v49, %v7467_v47  ;;  %v7477_v43 = vld [vmem:[#allocation16_spill] sm:$0xff]  ;;  %v7489_v41 = vld [vmem:[#allocation21_spill] sm:$0xff]  ;;  %v7490_v47 = vld [vmem:[#allocation71_spill] sm:$0xff] }
 0x1b8   :  { %v1576_v54 = vpop.f32.mrf.mxu3  ;;  %v1431_v22 = vpop.f32.mrf.mxu0  ;;  %7453 = vst [vmem:[#allocation3_spill] sm:$0xff] %v5509_v33  ;;  %v5520_v32 = vadd.f32 1.0, %v3860_v17  ;;  %v7469_v17 = vld [vmem:[#allocation13_spill] sm:$0xff]  ;;  %v7478_v8 = vld [vmem:[#allocation64_spill] sm:$0xff]  ;;  %v5575_v49 = vadd.f32 %v7490_v47, %v7489_v41  ;;  %v7501_v47 = vld [vmem:[#allocation26_spill] sm:$0xff] }
 0x1b9   :  { %v1577_v11 = vadd.f32 %v1576_v54, %v1527_v14  ;;  %v1480_v53 = vpop.f32.mrf.mxu1  ;;  %7456 = vst [vmem:[#allocation48_spill] sm:$0xff] %v5514_v27  ;;  %3863 = vpow2.f32 %v3666_v61  ;;  %v5540_v6 = vadd.f32 %v7470_v39, %v7469_v17  ;;  %v7471_v61 = vld [vmem:[#allocation14_spill] sm:$0xff]  ;;  %v3862_v56 = vpop.eup %3861  ;;  %v7474_v54 = vld [vmem:[#allocation15_spill] sm:$0xff]  ;;  %v5554_v21 = vadd.f32 %v7478_v8, %v7477_v43  ;;  %v7487_v46 = vld [vmem:[#allocation20_spill] sm:$0xff] }
 0x1ba   :  { %7463 = vst [vmem:[#allocation4_spill] sm:$0xff] %v5528_v34  ;;  %v1481_v16 = vadd.f32 %v1480_v53, %v1431_v22  ;;  %3865 = vrcp.f32 %v5501_v20  ;;  %v7472_v14 = vld [vmem:[#allocation62_spill] sm:$0xff]  ;;  %v7475_v22 = vld [vmem:[#allocation63_spill] sm:$0xff]  ;;  %v7480_v53 = vld [vmem:[#allocation65_spill] sm:$0xff]  ;;  %v5571_v42 = vadd.f32 %v7488_v28, %v7487_v46  ;;  %vm2318_vm1 = vweird.f32 %v5520_v32 }
 0x1bb   :  { %v1816_v25 = vadd.f32 %v1577_v11, %v803_v44  ;;  %7466 = vst [vmem:[#allocation49_spill] sm:$0xff] %v5532_v12  ;;  %v5545_v10 = vadd.f32 %v7472_v14, %v7471_v61  ;;  %v3651_v44 = vmul.f32 -1.442695, %v1889_v35  ;;  %v5550_v51 = vadd.f32 %v7475_v22, %v7474_v54  ;;  %v7479_v11 = vld [vmem:[#allocation17_spill] sm:$0xff]  ;;  %v7482_v35 = vld [vmem:[#allocation66_spill] sm:$0xff]  ;;  %v7492_v39 = vld [vmem:[#allocation72_spill] sm:$0xff] }
 0x1bc   :  { %v1819_v19 = vadd.f32 %v1481_v16, %v756_v48  ;;  %v5558_v9 = vadd.f32 %v7480_v53, %v7479_v11  ;;  %3867 = vrcp.f32 %v5520_v32  ;;  %v5563_v37 = vadd.f32 %v7482_v35, %v7481_v50  ;;  %v7484_v48 = vld [vmem:[#allocation19_spill] sm:$0xff]  ;;  %v7491_v17 = vld [vmem:[#allocation22_spill] sm:$0xff]  ;;  %v7495_v54 = vld [vmem:[#allocation73_spill] sm:$0xff] }
 0x1bd   :  { %7473 = vst [vmem:[#allocation5_spill] sm:$0xff] %v5545_v10  ;;  %v1890_v15 = vadd.f32 %v5410_v0, %v1816_v25  ;;  %v5567_v18 = vadd.f32 %v7485_v58, %v7484_v48  ;;  %v5579_v61 = vadd.f32 %v7492_v39, %v7491_v17  ;;  %v7494_v14 = vld [vmem:[#allocation23_spill] sm:$0xff]  ;;  %v7497_v43 = vld [vmem:[#allocation24_spill] sm:$0xff]  ;;  %v7498_v8 = vld [vmem:[#allocation74_spill] sm:$0xff]  ;;  %v5593_v58 = vadd.f32 1.0, %v3862_v56 }
 0x1be   :  { %7476 = vst [vmem:[#allocation51_spill] sm:$0xff] %v5550_v51  ;;  %v5583_v22 = vadd.f32 %v7495_v54, %v7494_v14  ;;  %v5587_v11 = vadd.f32 %v7498_v8, %v7497_v43  ;;  %v7499_v50 = vld [vmem:[#allocation25_spill] sm:$0xff]  ;;  %v7500_v35 = vld [vmem:[#allocation75_spill] sm:$0xff]  ;;  %3869 = vpow2.f32 %v3651_v44  ;;  %v1893_v46 = vadd.f32 %v5401_v26, %v1819_v19  ;;  %v7502_v17 = vld [vmem:[#allocation76_spill] sm:$0xff] }
 0x1bf   :  { %7483 = vst [vmem:[#allocation6_spill] sm:$0xff] %v5563_v37  ;;  %v3667_v25 = vmul.f32 -1.442695, %v1890_v15  ;;  %v1529_v16 = vpop.f32.mrf.mxu2  ;;  %v3864_v29 = vpop.eup %3863  ;;  %v5591_v48 = vadd.f32 %v7500_v35, %v7499_v50  ;;  %v5600_v39 = vadd.f32 %v7502_v17, %v7501_v47  ;;  %v7504_v14 = vld [vmem:[#allocation27_spill] sm:$0xff]  ;;  %v7505_v54 = vld [vmem:[#allocation78_spill] sm:$0xff]  ;;  %v7507_v8 = vld [vmem:[#allocation28_spill] sm:$0xff]  ;;  %vm2029_vm7 = vweird.f32 %v5593_v58 }
 0x1c0   :  { %7486 = vst [vmem:[#allocation52_spill] sm:$0xff] %v5567_v18  ;;  %v1578_v53 = vpop.f32.mrf.mxu3  ;;  %v1434_v15 = vpop.f32.mrf.mxu0  ;;  %v5604_v43 = vadd.f32 %v7505_v54, %v7504_v14  ;;  %v7509_v56 = vld [vmem:[#allocation29_spill] sm:$0xff]  ;;  %v7511_v19 = vld [vmem:[#allocation30_spill] sm:$0xff]  ;;  %v5618_v37 = vadd.f32 1.0, %v3864_v29  ;;  %v7514_v17 = vld [vmem:[#allocation44_spill] sm:$0xff]  ;;  %v2020_v10 = vand.u32 2147483648, %v5501_v20 }
 0x1c1   :  { %7493 = vst [vmem:[#allocation7_spill] sm:$0xff] %v5579_v61  ;;  %v1483_v28 = vpop.f32.mrf.mxu1  ;;  %v5596_v41 = vpop.eup %3865  ;;  %v7510_v35 = vld [vmem:[#allocation81_spill] sm:$0xff]  ;;  %v7512_v61 = vld [vmem:[#allocation82_spill] sm:$0xff]  ;;  %3871 = vpow2.f32 %v3667_v25  ;;  %v1579_v47 = vadd.f32 %v1578_v53, %v1529_v16  ;;  %v7515_v54 = vld [vmem:[#allocation31_spill] sm:$0xff]  ;;  %v3652_v16 = vmul.f32 -1.442695, %v1893_v46 }
 0x1c2   :  { %7496 = vst [vmem:[#allocation53_spill] sm:$0xff] %v5583_v22  ;;  %v7508_v22 = vld [vmem:[#allocation79_spill] sm:$0xff]  ;;  %v5612_v44 = vadd.f32 %v7510_v35, %v7509_v56  ;;  %v5616_v18 = vadd.f32 %v7512_v61, %v7511_v19  ;;  %v5621_v14 = vpop.eup %3867  ;;  %v1484_v35 = vadd.f32 %v1483_v28, %v1434_v15  ;;  %v7520_v51 = vld [vmem:[#allocation45_spill] sm:$0xff]  ;;  %v2010_v25 = vmul.f32 %v5596_v41, %v5501_v20  ;;  %v7524_v15 = vld [vmem:[#allocation86_spill] sm:$0xff] }
 0x1c3   :  { %7503 = vst [vmem:[#allocation8_spill] sm:$0xff] %v5600_v39  ;;  %v5608_v50 = vadd.f32 %v7508_v22, %v7507_v8  ;;  %1629 = vmatmul.bf16.gmra.mxu0 %v7514_v17  ;;  %v7518_v8 = vld [vmem:[#allocation32_spill] sm:$0xff]  ;;  %3873 = vrcp.f32 %v5593_v58  ;;  %v1820_v29 = vadd.f32 %v1579_v47, %v5453_v57  ;;  %v7521_v61 = vld [vmem:[#allocation33_spill] sm:$0xff]  ;;  %v7526_v19 = vld [vmem:[#allocation35_spill] sm:$0xff]  ;;  %vm2015_vm2 = vweird.f32 %v5596_v41 }
 0x1c4   :  { %7506 = vst [vmem:[#allocation54_spill] sm:$0xff] %v5604_v43  ;;  %v7516_v43 = vld [vmem:[#allocation83_spill] sm:$0xff]  ;;  %v7519_v39 = vld [vmem:[#allocation84_spill] sm:$0xff]  ;;  %1678 = vmatmul.bf16.gmra.mxu1 %v7520_v51  ;;  %1727 = vmatmul.bf16.gmra.mxu2 %v7514_v17  ;;  %v7522_v53 = vld [vmem:[#allocation85_spill] sm:$0xff]  ;;  %3875 = vrcp.f32 %v5618_v37  ;;  %v2011_v34 = vsub.f32 1.0, %v2010_v25  ;;  %vm2319_vm4 = vweird.f32 %v5621_v14  ;;  %vm2333_vm10 = vweird.f32 %v5618_v37 }
 0x1c5   :  { %7513 = vst [vmem:[#allocation9_spill] sm:$0xff] %v5616_v18  ;;  %v5625_v22 = vadd.f32 %v7516_v43, %v7515_v54  ;;  %v5629_v56 = vadd.f32 %v7519_v39, %v7518_v8  ;;  %1776 = vmatmul.bf16.gmra.mxu3 %v7520_v51  ;;  %v5640_v43 = vadd.f32 %v7522_v53, %v7521_v61  ;;  %v7523_v39 = vld [vmem:[#allocation34_spill] sm:$0xff]  ;;  %v7527_v17 = vld [vmem:[#allocation88_spill] sm:$0xff]  ;;  %v7530_v18 = vld [vmem:[#allocation89_spill] sm:$0xff]  ;;  %3877 = vpow2.f32 %v3652_v16 }
 0x1c6   :  { %v5644_v28 = vadd.f32 %v7524_v15, %v7523_v39  ;;  %v5648_v54 = vadd.f32 %v7527_v17, %v7526_v19  ;;  %v1823_v8 = vadd.f32 %v1484_v35, %v5467_v24  ;;  %v7529_v46 = vld [vmem:[#allocation36_spill] sm:$0xff]  ;;  %v2314_v51 = vmul.f32 %v5621_v14, %v5520_v32  ;;  %v7531_v53 = vld [vmem:[#allocation37_spill] sm:$0xff]  ;;  %v7532_v39 = vld [vmem:[#allocation91_spill] sm:$0xff] }
 0x1c7   :  { %7517 = vst [vmem:[#allocation55_spill] sm:$0xff] %v5625_v22  ;;  %v3870_v22 = vpop.eup %3869  ;;  %v5653_v57 = vadd.f32 %v7530_v18, %v7529_v46  ;;  %v1894_v47 = vadd.f32 %v5410_v0, %v1820_v29  ;;  %v1532_v61 = vpop.f32.mrf.mxu2  ;;  %v5661_v15 = vadd.f32 %v7532_v39, %v7531_v53  ;;  %v7533_v19 = vld [vmem:[#allocation38_spill] sm:$0xff]  ;;  %v7534_v17 = vld [vmem:[#allocation92_spill] sm:$0xff]  ;;  %v7536_v35 = vld [vmem:[#allocation39_spill] sm:$0xff] }
 0x1c8   :  { %7525 = vst [vmem:[#allocation10_spill] sm:$0xff] %v5644_v28  ;;  %v5665_v24 = vadd.f32 %v7534_v17, %v7533_v19  ;;  %v1581_v46 = vpop.f32.mrf.mxu3  ;;  %v1436_v28 = vpop.f32.mrf.mxu0  ;;  %v7539_v53 = vld [vmem:[#allocation40_spill] sm:$0xff]  ;;  %v7540_v39 = vld [vmem:[#allocation94_spill] sm:$0xff]  ;;  %v7541_v19 = vld [vmem:[#allocation41_spill] sm:$0xff]  ;;  %v5684_v13 = vadd.f32 1.0, %v3870_v22 }
 0x1c9   :  { %7528 = vst [vmem:[#allocation56_spill] sm:$0xff] %v5648_v54  ;;  %v7537_v54 = vld [vmem:[#allocation93_spill] sm:$0xff]  ;;  %v3872_v12 = vpop.eup %3871  ;;  %v3668_v29 = vmul.f32 -1.442695, %v1894_v47  ;;  %v1582_v27 = vadd.f32 %v1581_v46, %v1532_v61  ;;  %v1485_v33 = vpop.f32.mrf.mxu1  ;;  %v5674_v30 = vadd.f32 %v7540_v39, %v7539_v53  ;;  %v7542_v17 = vld [vmem:[#allocation95_spill] sm:$0xff]  ;;  %v2315_v61 = vsub.f32 1.0, %v2314_v51  ;;  %vm5738_vm5 = vmor %vm2014_vm0, %vm2015_vm2 }
 0x1ca   :  { %7535 = vst [vmem:[#allocation11_spill] sm:$0xff] %v5665_v24  ;;  %v5669_v18 = vadd.f32 %v7537_v54, %v7536_v35  ;;  %v5678_v24 = vadd.f32 %v7542_v17, %v7541_v19  ;;  %v7543_v54 = vld [vmem:[#allocation42_spill] sm:$0xff]  ;;  %v7544_v35 = vld [vmem:[#allocation96_spill] sm:$0xff]  ;;  %v5686_v4 = vpop.eup %3873  ;;  %v7546_v25 = vld [vmem:[#allocation43_spill] sm:$0xff]  ;;  %v2018_v53 = vand.u32 2147483647, %v5501_v20  ;;  %v1897_v19 = vadd.f32 %v5401_v26, %v1823_v8 }
 0x1cb   :  { %v7547_v16 = vld [vmem:[#allocation97_spill] sm:$0xff]  ;;  %v1824_v46 = vadd.f32 %v1582_v27, %v5471_v1  ;;  %v5694_v39 = vadd.f32 1.0, %v3872_v12  ;;  %v1486_v17 = vadd.f32 %v1485_v33, %v1436_v28  ;;  %v5698_v22 = vpop.eup %3875  ;;  %3879 = vpow2.f32 %v3668_v29  ;;  %vm5762_vm9 = vmor %vm2318_vm1, %vm2319_vm4 }
 0x1cc   :  { %7538 = vst [vmem:[#allocation58_spill] sm:$0xff] %v5669_v18  ;;  %v5682_v18 = vadd.f32 %v7544_v35, %v7543_v54  ;;  %v5690_v47 = vadd.f32 %v7547_v16, %v7546_v25  ;;  %v2324_v54 = vand.u32 2147483648, %v5520_v32  ;;  %v2012_v35 = vmul.f32 %v5596_v41, %v2011_v34  ;;  %v3878_v27 = vpop.eup %3877 }
 0x1cd   :  { %v5702_v25 = vor.u32 1.1754944e-38, %v2020_v10  ;;  %v2025_v1 = vmul.f32 %v5686_v4, %v5593_v58  ;;  %3881 = vrcp.f32 %v5684_v13  ;;  %v1827_v33 = vadd.f32 %v1486_v17, %v5483_v31 }
 0x1ce   :  { %7545 = vst [vmem:[#allocation12_spill] sm:$0xff] %v5682_v18  ;;  %v2316_v12 = vmul.f32 %v5621_v14, %v2315_v61  ;;  %v1898_v28 = vadd.f32 %v5410_v0, %v1824_v46  ;;  %vm5712_vm3 = vcmp.eq.f32.partialorder %v2018_v53, 8.507059e+37  ;;  %v2322_v10 = vand.u32 2147483647, %v5520_v32 }
 0x1cf   :  { %7548 = vst [vmem:[#allocation59_spill] sm:$0xff] %v5690_v47  ;;  %v1534_v8 = vpop.f32.mrf.mxu2  ;;  %v2329_v51 = vmul.f32 %v5698_v22, %v5618_v37  ;;  %3883 = vrcp.f32 %v5694_v39  ;;  %v3653_v31 = vmul.f32 -1.442695, %v1897_v19  ;;  %v2035_v61 = vand.u32 2147483648, %v5593_v58 }
 0x1d0   :  { %v1583_v29 = vpop.f32.mrf.mxu3  ;;  %v1439_v16 = vpop.f32.mrf.mxu0  ;;  %v2325_v46 = vor.u32 1.1754944e-38, %v2324_v54  ;;  %v2013_v53 = vadd.f32 %v5596_v41, %v2012_v35  ;;  %v2033_v18 = vand.u32 2147483647, %v5593_v58  ;;  %v2026_v2 = vsub.f32 1.0, %v2025_v1 }
 0x1d1   :  { %v1584_v17 = vadd.f32 %v1583_v29, %v1534_v8  ;;  %v1488_v47 = vpop.f32.mrf.mxu1  ;;  %v5724_v62 = vadd.f32 1.0, %v3878_v27  ;;  %v3880_v45 = vpop.eup %3879  ;;  %v3669_v23 = vmul.f32 -1.442695, %v1898_v28  ;;  %v1901_v19 = vadd.f32 %v5401_v26, %v1827_v33  ;;  %v7552_v29 = vld [vmem:[#allocation50_spill] sm:$0xff] }
 0x1d2   :  { %v1489_v52 = vadd.f32 %v1488_v47, %v1439_v16  ;;  %v2317_v54 = vadd.f32 %v5621_v14, %v2316_v12  ;;  %v2330_v35 = vsub.f32 1.0, %v2329_v51  ;;  %3885 = vpow2.f32 %v3653_v31 }
 0x1d3   :  { %v1828_v36 = vadd.f32 %v1584_v17, %v5487_v5  ;;  %1634 = vmatmul.bf16.gmra.mxu0 %v7551_v7  ;;  %v5730_v8 = vpop.eup %3881  ;;  %vm5742_vm6 = vcmp.eq.f32.partialorder %v2322_v10, 8.507059e+37  ;;  %v5747_v1 = vor.u32 1.1754944e-38, %v2035_v61  ;;  %v2339_v33 = vand.u32 2147483648, %v5618_v37 }
 0x1d4   :  { %1683 = vmatmul.bf16.gmra.mxu1 %v7552_v29  ;;  %1732 = vmatmul.bf16.gmra.mxu2 %v7551_v7  ;;  %v2017_v20 = vsel %vm5738_vm5, %v5596_v41, %v2013_v53  ;;  %vm2030_vm8 = vweird.f32 %v5686_v4  ;;  %3887 = vrcp.f32 %v5724_v62  ;;  %v1831_v41 = vadd.f32 %v1489_v52, %v5499_v40 }
 0x1d5   :  { %v1902_v7 = vadd.f32 %v5410_v0, %v1828_v36  ;;  %1781 = vmatmul.bf16.gmra.mxu3 %v7552_v29  ;;  %v5756_v27 = vpop.eup %3883  ;;  %v5768_v36 = vadd.f32 1.0, %v3880_v45  ;;  %v2027_v28 = vmul.f32 %v5686_v4, %v2026_v2  ;;  %v2040_v10 = vmul.f32 %v5730_v8, %v5684_v13  ;;  %vm5812_vm13 = vmor %vm2029_vm7, %vm2030_vm8 }
 0x1d6   :  { %3889 = vpow2.f32 %v3669_v23  ;;  %v3654_v51 = vmul.f32 -1.442695, %v1901_v19  ;;  %v2321_v31 = vsel %vm5762_vm9, %v5621_v14, %v2317_v54  ;;  %v2331_v16 = vmul.f32 %v5698_v22, %v2330_v35 }
 0x1d7   :  { %v1537_v32 = vpop.f32.mrf.mxu2  ;;  %v3670_v61 = vmul.f32 -1.442695, %v1902_v7  ;;  %v1905_v45 = vadd.f32 %v5401_v26, %v1831_v41  ;;  %v5782_v52 = vsel %vm5712_vm3, %v5702_v25, %v2017_v20  ;;  %vm5784_vm11 = vcmp.eq.f32.partialorder %v2033_v18, 8.507059e+37 }
 0x1d8   :  { %v1586_v17 = vpop.f32.mrf.mxu3  ;;  %v1441_v53 = vpop.f32.mrf.mxu0  ;;  %v2344_v2 = vmul.f32 %v5756_v27, %v5694_v39  ;;  %v2337_v19 = vand.u32 2147483647, %v5618_v37  ;;  %v2340_v54 = vor.u32 1.1754944e-38, %v2339_v33  ;;  %v2354_v29 = vand.u32 2147483648, %v5694_v39 }
 0x1d9   :  { %v1587_v40 = vadd.f32 %v1586_v17, %v1537_v32  ;;  %v1490_v14 = vpop.f32.mrf.mxu1  ;;  %v3886_v35 = vpop.eup %3885  ;;  %3891 = vrcp.f32 %v5768_v36  ;;  %v2326_v25 = vsel %vm5742_vm6, %v2325_v46, %v2321_v31  ;;  %v2028_v18 = vadd.f32 %v5686_v4, %v2027_v28 }
 0x1da   :  { %v2041_v34 = vsub.f32 1.0, %v2040_v10  ;;  %3893 = vpow2.f32 %v3654_v51  ;;  %v1491_v7 = vadd.f32 %v1490_v14, %v1441_v53  ;;  %v5797_v20 = vpop.eup %3887  ;;  %v3655_v12 = vmul.f32 -1.442695, %v1905_v45 }
 0x1db   :  { %v1832_v47 = vadd.f32 %v1587_v40, %v5505_v60  ;;  %3895 = vpow2.f32 %v3670_v61  ;;  %v2332_v33 = vadd.f32 %v5698_v22, %v2331_v16  ;;  %vm2334_vm12 = vweird.f32 %v5698_v22  ;;  %v2873_v60 = vld [vmem:[%s7281_s2] sm:$0xff] }
 0x1dc   :  { %v3890_v41 = vpop.eup %3889  ;;  %v2345_v32 = vsub.f32 1.0, %v2344_v2  ;;  %v5801_v17 = vadd.f32 1.0, %v3886_v35  ;;  %v1835_v5 = vadd.f32 %v1491_v7, %v5518_v3  ;;  %v2032_v10 = vsel %vm5812_vm13, %v5686_v4, %v2028_v18  ;;  %vm5834_vm1 = vmor %vm2333_vm10, %vm2334_vm12 }
 0x1dd   :  { %v1906_v46 = vadd.f32 %v5410_v0, %v1832_v47  ;;  %vm5819_vm14 = vcmp.eq.f32.partialorder %v2337_v19, 8.507059e+37  ;;  %vm2044_vm15 = vweird.f32 %v5684_v13  ;;  %v2048_v3 = vand.u32 2147483647, %v5684_v13 }
 0x1de   :  { %vm2348_vm0 = vweird.f32 %v5694_v39  ;;  %v5826_v31 = vor.u32 1.1754944e-38, %v2354_v29  ;;  %v2055_v58 = vmul.f32 %v5797_v20, %v5724_v62  ;;  %v2042_v61 = vmul.f32 %v5730_v8, %v2041_v34 }
 0x1df   :  { %v1539_v16 = vpop.f32.mrf.mxu2  ;;  %v5839_v45 = vpop.eup %3891  ;;  %v5841_v53 = vadd.f32 1.0, %v3890_v41  ;;  %3897 = vpow2.f32 %v3655_v12  ;;  %v5843_v14 = vmul.f32 %v2873_v60, %v2326_v25  ;;  %v2336_v19 = vsel %vm5834_vm1, %v5698_v22, %v2332_v33  ;;  %v7567_v33 = vld [vmem:[#allocation57_spill] sm:$0xff]  ;;  %v2874_v60 = vld [vmem:[%s7281_s2 + $0x8] sm:$0xff] }
 0x1e0   :  { %v1588_v2 = vpop.f32.mrf.mxu3  ;;  %v1444_v40 = vpop.f32.mrf.mxu0  ;;  %v2346_v35 = vmul.f32 %v5756_v27, %v2345_v32  ;;  %3899 = vrcp.f32 %v5801_v17  ;;  %v3671_v29 = vmul.f32 -1.442695, %v1906_v46  ;;  %v5853_v34 = vsel %vm5784_vm11, %v5747_v1, %v2032_v10 }
 0x1e1   :  { %v3894_v37 = vpop.eup %3893  ;;  %v1493_v18 = vpop.f32.mrf.mxu1  ;;  %vm2349_vm2 = vweird.f32 %v5756_v27  ;;  %v1909_v25 = vadd.f32 %v5401_v26, %v1835_v5  ;;  %v1589_v7 = vadd.f32 %v1588_v2, %v1539_v16  ;;  %vm2045_vm3 = vweird.f32 %v5730_v8  ;;  %v7568_v5 = vld [vmem:[#allocation60_spill] sm:$0xff] }
 0x1e2   :  { %v3896_v47 = vpop.eup %3895  ;;  %v2056_v22 = vsub.f32 1.0, %v2055_v58  ;;  %v1494_v12 = vadd.f32 %v1493_v18, %v1444_v40  ;;  %v2341_v41 = vsel %vm5819_vm14, %v2340_v54, %v2336_v19  ;;  %v2043_v32 = vadd.f32 %v5730_v8, %v2042_v61  ;;  %vm5882_vm4 = vmor %vm2044_vm15, %vm2045_vm3 }
 0x1e3   :  { %1639 = vmatmul.bf16.gmra.mxu0 %v7567_v33  ;;  %v2359_v1 = vmul.f32 %v5839_v45, %v5768_v36  ;;  %3901 = vrcp.f32 %v5841_v53  ;;  %v5865_v23 = vadd.f32 1.0, %v3894_v37  ;;  %v1836_v46 = vadd.f32 %v1589_v7, %v5524_v38  ;;  %vm5905_vm6 = vmor %vm2348_vm0, %vm2349_vm2 }
 0x1e4   :  { %1688 = vmatmul.bf16.gmra.mxu1 %v7568_v5  ;;  %1737 = vmatmul.bf16.gmra.mxu2 %v7567_v33  ;;  %v5873_v54 = vadd.f32 1.0, %v3896_v47  ;;  %3903 = vpow2.f32 %v3671_v29  ;;  %v1839_v28 = vadd.f32 %v1494_v12, %v5536_v63  ;;  %v2347_v10 = vadd.f32 %v5756_v27, %v2346_v35 }
 0x1e5   :  { %1786 = vmatmul.bf16.gmra.mxu3 %v7568_v5  ;;  %v3898_v51 = vpop.eup %3897  ;;  %v3656_v58 = vmul.f32 -1.442695, %v1909_v25  ;;  %vm5886_vm5 = vcmp.eq.f32.partialorder %v2048_v3, 8.507059e+37  ;;  %v2050_v63 = vand.u32 2147483648, %v5684_v13  ;;  %v2352_v4 = vand.u32 2147483647, %v5694_v39 }
 0x1e6   :  { %v5892_v61 = vpop.eup %3899  ;;  %v2369_v2 = vand.u32 2147483648, %v5768_v36  ;;  %v1910_v40 = vadd.f32 %v5410_v0, %v1836_v46  ;;  %v5896_v37 = vmul.f32 %v2874_v60, %v2341_v41  ;;  %v2047_v3 = vsel %vm5882_vm4, %v5730_v8, %v2043_v32 }
 0x1e7   :  { %v1542_v19 = vpop.f32.mrf.mxu2  ;;  %v2360_v35 = vsub.f32 1.0, %v2359_v1  ;;  %v2384_v29 = vand.u32 2147483648, %v5841_v53  ;;  %3905 = vrcp.f32 %v5865_v23  ;;  %v2057_v25 = vmul.f32 %v5797_v20, %v2056_v22 }
 0x1e8   :  { %v1591_v18 = vpop.f32.mrf.mxu3  ;;  %v1446_v47 = vpop.f32.mrf.mxu0  ;;  %3907 = vrcp.f32 %v5873_v54  ;;  %v5913_v8 = vadd.f32 1.0, %v3898_v51  ;;  %v2351_v39 = vsel %vm5905_vm6, %v5756_v27, %v2347_v10  ;;  %v5922_v41 = vmul.f32 %v5892_v61, %v5801_v17 }
 0x1e9   :  { %v1592_v7 = vadd.f32 %v1591_v18, %v1542_v19  ;;  %v1495_v12 = vpop.f32.mrf.mxu1  ;;  %v5918_v33 = vpop.eup %3901  ;;  %3909 = vpow2.f32 %v3656_v58  ;;  %v2051_v32 = vor.u32 1.1754944e-38, %v2050_v63  ;;  %vm2353_vm7 = vcmp.eq.f32.partialorder %v2352_v4, 8.507059e+37  ;;  %v2875_v63 = vld [vmem:[%s7281_s2 + $0x10] sm:$0xff] }
 0x1ea   :  { %v3904_v22 = vpop.eup %3903  ;;  %v3672_v1 = vmul.f32 -1.442695, %v1910_v40  ;;  %v1913_v46 = vadd.f32 %v5401_v26, %v1839_v28  ;;  %v1496_v60 = vadd.f32 %v1495_v12, %v1446_v47  ;;  %v2361_v51 = vmul.f32 %v5839_v45, %v2360_v35 }
 0x1eb   :  { %v1840_v5 = vadd.f32 %v1592_v7, %v5540_v6  ;;  %vm2363_vm8 = vweird.f32 %v5768_v36  ;;  %v5928_v27 = vor.u32 1.1754944e-38, %v2384_v29  ;;  %v5932_v10 = vsel %vm5886_vm5, %v2051_v32, %v2047_v3 }
 0x1ec   :  { %7575 = vst [vmem:[#allocation13_spill] sm:$0xff] %v5932_v10  ;;  %v2356_v58 = vsel %vm2353_vm7, %v5826_v31, %v2351_v39  ;;  %v2374_v38 = vmul.f32 %v5918_v33, %v5841_v53  ;;  %3911 = vrcp.f32 %v5913_v8  ;;  %v1843_v28 = vadd.f32 %v1496_v60, %v5554_v21 }
 0x1ed   :  { %v1914_v6 = vadd.f32 %v5410_v0, %v1840_v5  ;;  %v5943_v4 = vpop.eup %3905  ;;  %v2071_v16 = vsub.f32 1.0, %v5922_v41  ;;  %v5946_v40 = vadd.f32 1.0, %v3904_v22  ;;  %v5949_v31 = vadd.f32 %v5797_v20, %v2057_v25 }
 0x1ee   :  { %vm2059_vm9 = vweird.f32 %v5724_v62  ;;  %v5952_v19 = vpop.eup %3907  ;;  %3913 = vpow2.f32 %v3672_v1  ;;  %v3657_v3 = vmul.f32 -1.442695, %v1913_v46  ;;  %vm2060_vm10 = vweird.f32 %v5797_v20 }
 0x1ef   :  { %v1544_v21 = vpop.f32.mrf.mxu2  ;;  %v2063_v13 = vand.u32 2147483647, %v5724_v62  ;;  %v3910_v35 = vpop.eup %3909  ;;  %v3673_v18 = vmul.f32 -1.442695, %v1914_v6  ;;  %v1917_v47 = vadd.f32 %v5401_v26, %v1843_v28  ;;  %v5958_v12 = vmul.f32 %v2875_v63, %v2356_v58  ;;  %vm5970_vm12 = vmor %vm2059_vm9, %vm2060_vm10 }
 0x1f0   :  { %v1593_v7 = vpop.f32.mrf.mxu3  ;;  %v1449_v25 = vpop.f32.mrf.mxu0  ;;  %v2375_v39 = vsub.f32 1.0, %v2374_v38  ;;  %v2065_v32 = vand.u32 2147483648, %v5724_v62  ;;  %v2362_v22 = vadd.f32 %v5839_v45, %v2361_v51  ;;  %vm2364_vm11 = vweird.f32 %v5839_v45  ;;  %v7579_v38 = vld [vmem:[#allocation67_spill] sm:$0xff] }
 0x1f1   :  { %7576 = vst [vmem:[#allocation61_spill] sm:$0xff] %v5958_v12  ;;  %v1498_v41 = vpop.f32.mrf.mxu1  ;;  %v2389_v1 = vmul.f32 %v5952_v19, %v5873_v54  ;;  %3915 = vrcp.f32 %v5946_v40  ;;  %v1594_v46 = vadd.f32 %v1593_v7, %v1544_v21  ;;  %v5976_v51 = vadd.f32 1.0, %v3910_v35  ;;  %vm6004_vm15 = vmor %vm2363_vm8, %vm2364_vm11 }
 0x1f2   :  { %v1499_v5 = vadd.f32 %v1498_v41, %v1449_v25  ;;  %v5974_v58 = vpop.eup %3911  ;;  %3917 = vpow2.f32 %v3657_v3  ;;  %v2062_v6 = vsel %vm5970_vm12, %v5797_v20, %v5949_v31  ;;  %vm5983_vm13 = vcmp.eq.f32.partialorder %v2063_v13, 8.507059e+37  ;;  %v7582_v3 = vld [vmem:[#allocation70_spill] sm:$0xff] }
 0x1f3   :  { %1644 = vmatmul.bf16.gmra.mxu0 %v7579_v38  ;;  %vm2379_vm14 = vweird.f32 %v5918_v33  ;;  %v5990_v62 = vmul.f32 %v5943_v4, %v5865_v23  ;;  %3919 = vpow2.f32 %v3673_v18  ;;  %v3658_v63 = vmul.f32 -1.442695, %v1917_v47 }
 0x1f4   :  { %1693 = vmatmul.bf16.gmra.mxu1 %v7582_v3  ;;  %1742 = vmatmul.bf16.gmra.mxu2 %v7579_v38  ;;  %v2367_v21 = vand.u32 2147483647, %v5768_v36  ;;  %v3914_v35 = vpop.eup %3913  ;;  %v2376_v20 = vmul.f32 %v5918_v33, %v2375_v39  ;;  %v2414_v31 = vand.u32 2147483648, %v5946_v40  ;;  %v1844_v13 = vadd.f32 %v1594_v46, %v5558_v9 }
 0x1f5   :  { %v1847_v7 = vadd.f32 %v1499_v5, %v5571_v42  ;;  %1791 = vmatmul.bf16.gmra.mxu3 %v7582_v3  ;;  %vm2378_vm0 = vweird.f32 %v5841_v53  ;;  %v2390_v47 = vsub.f32 1.0, %v2389_v1  ;;  %v6011_v25 = vmul.f32 %v5974_v58, %v5913_v8 }
 0x1f6   :  { %v2066_v9 = vor.u32 1.1754944e-38, %v2065_v32  ;;  %v2366_v42 = vsel %vm6004_vm15, %v5839_v45, %v2362_v22  ;;  %3921 = vrcp.f32 %v5976_v51  ;;  %v1918_v39 = vadd.f32 %v5410_v0, %v1844_v13  ;;  %vm6070_vm5 = vmor %vm2378_vm0, %vm2379_vm14 }
 0x1f7   :  { %v1547_v41 = vpop.f32.mrf.mxu2  ;;  %v2370_v46 = vor.u32 1.1754944e-38, %v2369_v2  ;;  %v2072_v5 = vmul.f32 %v5892_v61, %v2071_v16  ;;  %v6021_v1 = vpop.eup %3915  ;;  %v6024_v38 = vadd.f32 1.0, %v3914_v35  ;;  %3923 = vpow2.f32 %v3658_v63 }
 0x1f8   :  { %v1596_v32 = vpop.f32.mrf.mxu3  ;;  %v1451_v3 = vpop.f32.mrf.mxu0  ;;  %vm2368_vm1 = vcmp.eq.f32.partialorder %v2367_v21, 8.507059e+37  ;;  %v6026_v22 = vor.u32 1.1754944e-38, %v2414_v31  ;;  %v6030_v36 = vsel %vm5983_vm13, %v2066_v9, %v2062_v6  ;;  %v6033_v29 = vmul.f32 %v5952_v19, %v2390_v47  ;;  %v2876_v47 = vld [vmem:[%s7281_s2 + $0x18] sm:$0xff] }
 0x1f9   :  { %v3918_v45 = vpop.eup %3917  ;;  %v1597_v13 = vadd.f32 %v1596_v32, %v1547_v41  ;;  %v1500_v18 = vpop.f32.mrf.mxu1  ;;  %7585 = vst [vmem:[#allocation14_spill] sm:$0xff] %v6030_v36  ;;  %v2371_v2 = vsel %vm2368_vm1, %v2370_v46, %v2366_v42  ;;  %v3674_v63 = vmul.f32 -1.442695, %v1918_v39  ;;  %v1921_v60 = vadd.f32 %v5401_v26, %v1847_v7 }
 0x1fa   :  { %v3920_v16 = vpop.eup %3919  ;;  %v1501_v31 = vadd.f32 %v1500_v18, %v1451_v3  ;;  %v6039_v41 = vadd.f32 %v5892_v61, %v2072_v5  ;;  %vm2075_vm2 = vweird.f32 %v5892_v61  ;;  %v2404_v6 = vmul.f32 %v6021_v1, %v5946_v40 }
 0x1fb   :  { %v1848_v21 = vadd.f32 %v1597_v13, %v5575_v49  ;;  %3925 = vrcp.f32 %v6024_v38  ;;  %v6045_v28 = vadd.f32 1.0, %v3918_v45  ;;  %v2377_v7 = vadd.f32 %v5918_v33, %v2376_v20 }
 0x1fc   :  { %v6051_v49 = vpop.eup %3921  ;;  %v6053_v9 = vadd.f32 1.0, %v3920_v16  ;;  %vm2074_vm3 = vweird.f32 %v5801_v17  ;;  %v2078_v39 = vand.u32 2147483647, %v5801_v17  ;;  %3927 = vpow2.f32 %v3674_v63 }
 0x1fd   :  { %v1922_v42 = vadd.f32 %v5410_v0, %v1848_v21  ;;  %v3924_v46 = vpop.eup %3923  ;;  %v3659_v5 = vmul.f32 -1.442695, %v1921_v60  ;;  %v1851_v32 = vadd.f32 %v1501_v31, %v5587_v11  ;;  %vm6061_vm4 = vmor %vm2074_vm3, %vm2075_vm2  ;;  %v2382_v20 = vand.u32 2147483647, %v5841_v53 }
 0x1fe   :  { %v6074_v18 = vmul.f32 %v2876_v47, %v2371_v2  ;;  %v2077_v11 = vsel %vm6061_vm4, %v5892_v61, %v6039_v41  ;;  %v2080_v16 = vand.u32 2147483648, %v5801_v17  ;;  %v2405_v63 = vsub.f32 1.0, %v2404_v6 }
 0x1ff   :  { %v3675_v13 = vmul.f32 -1.442695, %v1922_v42  ;;  %v1549_v60 = vpop.f32.mrf.mxu2  ;;  %v6083_v21 = vmul.f32 %v6051_v49, %v5976_v51  ;;  %3929 = vrcp.f32 %v6045_v28  ;;  %v2381_v2 = vsel %vm6070_vm5, %v5918_v33, %v2377_v7  ;;  %v7593_v7 = vld [vmem:[#allocation77_spill] sm:$0xff] }
 0x200   :  { %7590 = vst [vmem:[#allocation62_spill] sm:$0xff] %v6074_v18  ;;  %v1598_v53 = vpop.f32.mrf.mxu3  ;;  %v1454_v31 = vpop.f32.mrf.mxu0  ;;  %3931 = vrcp.f32 %v6053_v9  ;;  %v6090_v47 = vadd.f32 1.0, %v3924_v46  ;;  %vm6092_vm6 = vcmp.eq.f32.partialorder %v2078_v39, 8.507059e+37  ;;  %v1925_v42 = vadd.f32 %v5401_v26, %v1851_v32  ;;  %v2877_v39 = vld [vmem:[%s7281_s2 + $0x20] sm:$0xff] }
 0x201   :  { %v1599_v61 = vadd.f32 %v1598_v53, %v1549_v60  ;;  %v1503_v41 = vpop.f32.mrf.mxu1  ;;  %v6096_v6 = vpop.eup %3925  ;;  %3933 = vpow2.f32 %v3659_v5  ;;  %vm2383_vm7 = vcmp.eq.f32.partialorder %v2382_v20, 8.507059e+37  ;;  %v7594_v45 = vsub.f32 1.0, %v5990_v62 }
 0x202   :  { %v1504_v3 = vadd.f32 %v1503_v41, %v1454_v31  ;;  %3935 = vpow2.f32 %v3675_v13  ;;  %v2386_v46 = vsel %vm2383_vm7, %v5928_v27, %v2381_v2  ;;  %v3928_v5 = vpop.eup %3927  ;;  %v6109_v32 = vmul.f32 %v6021_v1, %v2405_v63  ;;  %v7595_v13 = vld [vmem:[#allocation80_spill] sm:$0xff] }
 0x203   :  { %v1852_v33 = vadd.f32 %v1599_v61, %v5591_v48  ;;  %1649 = vmatmul.bf16.gmra.mxu0 %v7593_v7  ;;  %v2087_v60 = vmul.f32 %v5943_v4, %v7594_v45  ;;  %v2444_v48 = vand.u32 2147483648, %v6053_v9  ;;  %v2081_v27 = vor.u32 1.1754944e-38, %v2080_v16 }
 0x204   :  { %1698 = vmatmul.bf16.gmra.mxu1 %v7595_v13  ;;  %1747 = vmatmul.bf16.gmra.mxu2 %v7593_v7  ;;  %v2419_v62 = vmul.f32 %v6096_v6, %v6024_v38  ;;  %3937 = vrcp.f32 %v6090_v47  ;;  %v3660_v2 = vmul.f32 -1.442695, %v1925_v42  ;;  %v1855_v61 = vadd.f32 %v1504_v3, %v5608_v50 }
 0x205   :  { %v1926_v31 = vadd.f32 %v5410_v0, %v1852_v33  ;;  %1796 = vmatmul.bf16.gmra.mxu3 %v7595_v13  ;;  %v6121_v63 = vpop.eup %3929  ;;  %v6126_v41 = vsel %vm6092_vm6, %v2081_v27, %v2077_v11  ;;  %v6128_v16 = vmul.f32 %v2877_v39, %v2386_v46  ;;  %vm2393_vm8 = vweird.f32 %v5873_v54 }
 0x206   :  { %7596 = vst [vmem:[#allocation15_spill] sm:$0xff] %v6126_v41  ;;  %v6130_v7 = vpop.eup %3931  ;;  %v6133_v45 = vadd.f32 1.0, %v3928_v5  ;;  %v2088_v13 = vadd.f32 %v5943_v4, %v2087_v60  ;;  %vm2089_vm9 = vweird.f32 %v5865_v23  ;;  %v6137_v50 = vor.u32 1.1754944e-38, %v2444_v48 }
 0x207   :  { %7597 = vst [vmem:[#allocation63_spill] sm:$0xff] %v6128_v16  ;;  %v3676_v33 = vmul.f32 -1.442695, %v1926_v31  ;;  %v1552_v20 = vpop.f32.mrf.mxu2  ;;  %v3934_v42 = vpop.eup %3933  ;;  %v1929_v11 = vadd.f32 %v5401_v26, %v1855_v61  ;;  %vm2090_vm10 = vweird.f32 %v5943_v4  ;;  %v2093_v46 = vand.u32 2147483647, %v5865_v23 }
 0x208   :  { %v1601_v17 = vpop.f32.mrf.mxu3  ;;  %v1456_v3 = vpop.f32.mrf.mxu0  ;;  %v2420_v5 = vsub.f32 1.0, %v2419_v62  ;;  %v6144_v27 = vmul.f32 %v6121_v63, %v6045_v28  ;;  %v2434_v48 = vmul.f32 %v6130_v7, %v6053_v9  ;;  %v2095_v53 = vand.u32 2147483648, %v5865_v23  ;;  %vm6159_vm11 = vmor %vm2089_vm9, %vm2090_vm10 }
 0x209   :  { %v3936_v39 = vpop.eup %3935  ;;  %3939 = vpow2.f32 %v3676_v33  ;;  %v1602_v60 = vadd.f32 %v1601_v17, %v1552_v20  ;;  %v1505_v31 = vpop.f32.mrf.mxu1  ;;  %v3661_v61 = vmul.f32 -1.442695, %v1929_v11  ;;  %v6152_v16 = vadd.f32 1.0, %v3934_v42 }
 0x20a   :  { %3941 = vpow2.f32 %v3660_v2  ;;  %v6149_v35 = vpop.eup %3937  ;;  %v1506_v41 = vadd.f32 %v1505_v31, %v1456_v3  ;;  %v6163_v2 = vadd.f32 1.0, %v3936_v39  ;;  %v2092_v33 = vsel %vm6159_vm11, %v5943_v4, %v2088_v13 }
 0x20b   :  { %3943 = vrcp.f32 %v6133_v45  ;;  %7598 = vst [vmem:[#allocation16_spill] sm:$0xff] %v6152_v16  ;;  %v1856_v62 = vadd.f32 %v1602_v60, %v5612_v44  ;;  %vm6168_vm12 = vcmp.eq.f32.partialorder %v2093_v46, 8.507059e+37  ;;  %v2392_v44 = vadd.f32 %v5952_v19, %v6033_v29 }
 0x20c   :  { %7601 = vst [vmem:[#allocation64_spill] sm:$0xff] %v6163_v2  ;;  %3945 = vpow2.f32 %v3661_v61  ;;  %v1859_v11 = vadd.f32 %v1506_v41, %v5629_v56  ;;  %vm2394_vm13 = vweird.f32 %v5952_v19  ;;  %v6178_v17 = vmul.f32 %v6096_v6, %v2420_v5 }
 0x20d   :  { %v1930_v23 = vadd.f32 %v5410_v0, %v1856_v62  ;;  %v2435_v3 = vsub.f32 1.0, %v2434_v48  ;;  %v6182_v4 = vmul.f32 %v6149_v35, %v6090_v47  ;;  %v2096_v13 = vor.u32 1.1754944e-38, %v2095_v53  ;;  %vm6198_vm14 = vmor %vm2393_vm8, %vm2394_vm13 }
 0x20e   :  { %3947 = vrcp.f32 %v6152_v16  ;;  %v1933_v60 = vadd.f32 %v5401_v26, %v1859_v11  ;;  %v2397_v62 = vand.u32 2147483647, %v5873_v54  ;;  %v2474_v12 = vand.u32 2147483648, %v6163_v2 }
 0x20f   :  { %v3940_v46 = vpop.eup %3939  ;;  %v3677_v29 = vmul.f32 -1.442695, %v1930_v23  ;;  %v1554_v56 = vpop.f32.mrf.mxu2  ;;  %3949 = vrcp.f32 %v6163_v2  ;;  %v6192_v61 = vsel %vm6168_vm12, %v2096_v13, %v2092_v33  ;;  %v2459_v23 = vand.u32 2147483648, %v6133_v45 }
 0x210   :  { %v3942_v41 = vpop.eup %3941  ;;  %v6188_v5 = vadd.f32 1.0, %v3940_v46  ;;  %v1603_v31 = vpop.f32.mrf.mxu3  ;;  %7605 = vst [vmem:[#allocation65_spill] sm:$0xff] %v6192_v61  ;;  %v3662_v11 = vmul.f32 -1.442695, %v1933_v60  ;;  %v2396_v33 = vsel %vm6198_vm14, %v5952_v19, %v2392_v44  ;;  %v6210_v42 = vmul.f32 %v6130_v7, %v2435_v3  ;;  %v7610_v60 = vld [vmem:[#allocation87_spill] sm:$0xff]  ;;  %v7612_v3 = vld [vmem:[#allocation90_spill] sm:$0xff] }
 0x211   :  { %v1459_v48 = vpop.f32.mrf.mxu0  ;;  %v6203_v20 = vpop.eup %3943  ;;  %3951 = vpow2.f32 %v3677_v29  ;;  %v1604_v39 = vadd.f32 %v1603_v31, %v1554_v56  ;;  %v7608_v61 = vand.u32 2147483648, %v5873_v54  ;;  %v6216_v10 = vadd.f32 1.0, %v3942_v41 }
 0x212   :  { %7604 = vst [vmem:[#allocation17_spill] sm:$0xff] %v6188_v5  ;;  %v1508_v46 = vpop.f32.mrf.mxu1  ;;  %v3946_v36 = vpop.eup %3945  ;;  %v7611_v53 = vsub.f32 1.0, %v6011_v25  ;;  %vm2409_vm15 = vweird.f32 %v6021_v1  ;;  %v2449_v44 = vmul.f32 %v6203_v20, %v6133_v45  ;;  %3953 = vrcp.f32 %v6188_v5 }
 0x213   :  { %v2400_v18 = vor.u32 1.1754944e-38, %v7608_v61  ;;  %7609 = vst [vmem:[#allocation18_spill] sm:$0xff] %v6216_v10  ;;  %v1509_v29 = vadd.f32 %v1508_v46, %v1459_v48  ;;  %1654 = vmatmul.bf16.gmra.mxu0 %v7610_v60  ;;  %v1860_v54 = vadd.f32 %v1604_v39, %v5640_v43  ;;  %vm2398_vm0 = vcmp.eq.f32.partialorder %v2397_v62, 8.507059e+37  ;;  %v2878_v48 = vld [vmem:[%s7281_s2 + $0x28] sm:$0xff]  ;;  %v4113_v62 = vld [vmem:[%s7280_s7] sm:$0xf] }
 0x214   :  { %v2102_v19 = vmul.f32 %v5974_v58, %v7611_v53  ;;  %1703 = vmatmul.bf16.gmra.mxu1 %v7612_v3  ;;  %1752 = vmatmul.bf16.gmra.mxu2 %v7610_v60  ;;  %v6229_v56 = vpop.eup %3947  ;;  %v6231_v41 = vor.u32 1.1754944e-38, %v2459_v23  ;;  %3955 = vpow2.f32 %v3662_v11  ;;  %vm2408_vm1 = vweird.f32 %v5946_v40 }
 0x215   :  { %7613 = vst [vmem:[#allocation66_spill] sm:$0xff] %v6229_v56  ;;  %v1863_v25 = vadd.f32 %v1509_v29, %v5653_v57  ;;  %1801 = vmatmul.bf16.gmra.mxu3 %v7612_v3  ;;  %v2401_v31 = vsel %vm2398_vm0, %v2400_v18, %v2396_v33  ;;  %v6238_v43 = vpop.eup %3949  ;;  %v6241_v39 = vadd.f32 1.0, %v3946_v36  ;;  %v1934_v61 = vadd.f32 %v5410_v0, %v1860_v54  ;;  %vm6312_vm6 = vmor %vm2408_vm1, %vm2409_vm15 }
 0x216   :  { %7614 = vst [vmem:[#allocation19_spill] sm:$0xff] %v6231_v41  ;;  %v6247_v57 = vperm.slane %v4113_v62, 2  ;;  %vm2104_vm2 = vweird.f32 %v5913_v8  ;;  %v6250_v23 = vor.u32 1.1754944e-38, %v2474_v12  ;;  %3957 = vrcp.f32 %v6216_v10 }
 0x217   :  { %v3952_v18 = vpop.eup %3951  ;;  %v1557_v11 = vpop.f32.mrf.mxu2  ;;  %v6254_v46 = vadd.f32 %v5974_v58, %v2102_v19  ;;  %vm2105_vm3 = vweird.f32 %v5974_v58  ;;  %v2450_v36 = vsub.f32 1.0, %v2449_v44  ;;  %v3678_v33 = vmul.f32 -1.442695, %v1934_v61 }
 0x218   :  { %7615 = vst [vmem:[#allocation68_spill] sm:$0xff] %v6250_v23  ;;  %v1937_v29 = vadd.f32 %v5401_v26, %v1863_v25  ;;  %v1606_v60 = vpop.f32.mrf.mxu3  ;;  %v6258_v54 = vmul.f32 %v2878_v48, %v2401_v31  ;;  %v6262_v12 = vmul.f32 %v6229_v56, %v6152_v16  ;;  %v6264_v3 = vadd.f32 1.0, %v3952_v18  ;;  %v6268_v41 = vpop.eup %3953  ;;  %vm6281_vm4 = vmor %vm2104_vm2, %vm2105_vm3 }
 0x219   :  { %v1461_v53 = vpop.f32.mrf.mxu0  ;;  %v1607_v13 = vadd.f32 %v1606_v60, %v1557_v11  ;;  %v6266_v19 = vperm.slane %v4113_v62, 3  ;;  %v2464_v44 = vmul.f32 %v6238_v43, %v6163_v2  ;;  %3959 = vrcp.f32 %v6241_v39 }
 0x21a   :  { %7616 = vst [vmem:[#allocation20_spill] sm:$0xff] %v6258_v54  ;;  %v1510_v23 = vpop.f32.mrf.mxu1  ;;  %v2108_v25 = vand.u32 2147483647, %v5913_v8  ;;  %v2110_v31 = vand.u32 2147483648, %v5913_v8  ;;  %v3956_v48 = vpop.eup %3955  ;;  %v2489_v61 = vand.u32 2147483648, %v6188_v5  ;;  %3961 = vpow2.f32 %v3678_v33 }
 0x21b   :  { %v1864_v18 = vadd.f32 %v1607_v13, %v5661_v15  ;;  %v1511_v11 = vadd.f32 %v1510_v23, %v1461_v53  ;;  %v6286_v60 = vmul.f32 %v6203_v20, %v2450_v36  ;;  %v3663_v54 = vmul.f32 -1.442695, %v1937_v29 }
 0x21c   :  { %v2107_v33 = vsel %vm6281_vm4, %v5974_v58, %v6254_v46  ;;  %v2407_v15 = vadd.f32 %v6021_v1, %v6109_v32  ;;  %v6294_v13 = vpop.eup %3957  ;;  %3963 = vrcp.f32 %v6264_v3  ;;  %v2465_v53 = vsub.f32 1.0, %v2464_v44 }
 0x21d   :  { %7619 = vst [vmem:[#allocation69_spill] sm:$0xff] %v6294_v13  ;;  %v1938_v23 = vadd.f32 %v5410_v0, %v1864_v18  ;;  %v1867_v36 = vadd.f32 %v1511_v11, %v5674_v30  ;;  %v2479_v29 = vmul.f32 %v6268_v41, %v6188_v5  ;;  %v6302_v2 = vadd.f32 1.0, %v3956_v48 }
 0x21e   :  { %vm6304_vm5 = vcmp.eq.f32.partialorder %v2108_v25, 8.507059e+37  ;;  %v6316_v46 = vor.u32 1.1754944e-38, %v2489_v61  ;;  %v2111_v48 = vor.u32 1.1754944e-38, %v2110_v31  ;;  %v6323_v25 = vmul.f32 %v6294_v13, %v6216_v10 }
 0x21f   :  { %7620 = vst [vmem:[#allocation21_spill] sm:$0xff] %v6302_v2  ;;  %v3679_v30 = vmul.f32 -1.442695, %v1938_v23  ;;  %v1941_v44 = vadd.f32 %v5401_v26, %v1867_v36  ;;  %v1559_v18 = vpop.f32.mrf.mxu2  ;;  %v6319_v11 = vpop.eup %3959  ;;  %3965 = vpow2.f32 %v3663_v54  ;;  %v2411_v5 = vsel %vm6312_vm6, %v6021_v1, %v2407_v15 }
 0x220   :  { %7625 = vst [vmem:[#allocation71_spill] sm:$0xff] %v6316_v46  ;;  %v1608_v62 = vpop.f32.mrf.mxu3  ;;  %v2412_v61 = vand.u32 2147483647, %v5946_v40  ;;  %v3962_v23 = vpop.eup %3961  ;;  %v2504_v26 = vand.u32 2147483648, %v6264_v3  ;;  %v7626_v46 = vsub.f32 1.0, %v6083_v21  ;;  %v2480_v13 = vsub.f32 1.0, %v2479_v29 }
 0x221   :  { %v1620_v8 = vpop.f32.mrf.mxu0  ;;  %3967 = vpow2.f32 %v3679_v30  ;;  %v3664_v31 = vmul.f32 -1.442695, %v1941_v44  ;;  %v1609_v54 = vadd.f32 %v1608_v62, %v1559_v18  ;;  %vm2423_vm7 = vweird.f32 %v6024_v38 }
 0x222   :  { %v1669_v36 = vpop.f32.mrf.mxu1  ;;  %v2117_v10 = vmul.f32 %v6051_v49, %v7626_v46  ;;  %3969 = vrcp.f32 %v6302_v2  ;;  %v6334_v56 = vpop.eup %3963  ;;  %v6338_v40 = vmul.f32 %v6238_v43, %v2465_v53  ;;  %v6342_v1 = vmul.f32 %v6319_v11, %v6241_v39 }
 0x223   :  { %v1670_v16 = vadd.f32 %v1669_v36, %v1620_v8  ;;  %v6344_v15 = vadd.f32 1.0, %v3962_v23  ;;  %3971 = vpow2.f32 %v3664_v31  ;;  %v6349_v29 = vsel %vm6304_vm5, %v2111_v48, %v2107_v33 }
 0x224   :  { %vm2119_vm8 = vweird.f32 %v5976_v51  ;;  %vm2120_vm9 = vweird.f32 %v6051_v49  ;;  %v1868_v8 = vadd.f32 %v1609_v54, %v5678_v24  ;;  %vm2413_vm10 = vcmp.eq.f32.partialorder %v2412_v61, 8.507059e+37 }
 0x225   :  { %v1809_v53 = vadd.f32 %v1670_v16, %v5418_v55  ;;  %v6356_v32 = vadd.f32 %v6051_v49, %v2117_v10  ;;  %v3966_v46 = vpop.eup %3965  ;;  %v6359_v30 = vmul.f32 %v6268_v41, %v2480_v13  ;;  %v2494_v33 = vmul.f32 %v6334_v56, %v6264_v3  ;;  %v2879_v13 = vld [vmem:[%s7281_s2 + $0x30] sm:$0xff]  ;;  %vm6385_vm11 = vmor %vm2119_vm8, %vm2120_vm9 }
 0x226   :  { %v6363_v58 = vor.u32 1.1754944e-38, %v2504_v26  ;;  %v2416_v44 = vsel %vm2413_vm10, %v6026_v22, %v2411_v5  ;;  %3973 = vrcp.f32 %v6344_v15  ;;  %v1942_v55 = vadd.f32 %v5410_v0, %v1868_v8 }
 0x227   :  { %v3968_v18 = vpop.eup %3967  ;;  %v1883_v10 = vadd.f32 %v6247_v57, %v1809_v53  ;;  %v1718_v16 = vpop.f32.mrf.mxu2  ;;  %v2123_v5 = vand.u32 2147483647, %v5976_v51  ;;  %v2125_v23 = vand.u32 2147483648, %v5976_v51  ;;  %v2422_v0 = vadd.f32 %v6096_v6, %v6178_v17 }
 0x228   :  { %7627 = vst [vmem:[#allocation22_spill] sm:$0xff] %v6363_v58  ;;  %v6373_v48 = vpop.eup %3969  ;;  %v6375_v62 = vadd.f32 1.0, %v3968_v18  ;;  %v1767_v61 = vpop.f32.mrf.mxu3  ;;  %v3680_v31 = vmul.f32 -1.442695, %v1942_v55  ;;  %vm2424_vm12 = vweird.f32 %v6096_v6  ;;  %v2495_v53 = vsub.f32 1.0, %v2494_v33  ;;  %v7642_v58 = vld [vmem:[#allocation99_spill] sm:$0xff] }
 0x229   :  { %v1622_v22 = vpop.f32.mrf.mxu0  ;;  %v3972_v26 = vpop.eup %3971  ;;  %3975 = vtanh.f32 %v1883_v10  ;;  %v1768_v36 = vadd.f32 %v1767_v61, %v1718_v16  ;;  %v6390_v18 = vadd.f32 1.0, %v3966_v46  ;;  %v6392_v24 = vmul.f32 %v2879_v13, %v2416_v44  ;;  %vm6413_vm14 = vmor %vm2423_vm7, %vm2424_vm12 }
 0x22a   :  { %7628 = vst [vmem:[#allocation72_spill] sm:$0xff] %v6375_v62  ;;  %v1671_v54 = vpop.f32.mrf.mxu1  ;;  %v2122_v17 = vsel %vm6385_vm11, %v6051_v49, %v6356_v32  ;;  %v6400_v55 = vmul.f32 %v6373_v48, %v6302_v2  ;;  %3977 = vpow2.f32 %v3680_v31  ;;  %v2427_v10 = vand.u32 2147483647, %v6024_v38  ;;  %v7638_v31 = vld [vmem:[#allocation98_spill] sm:$0xff] }
 0x22b   :  { %7631 = vst [vmem:[#allocation23_spill] sm:$0xff] %v6390_v18  ;;  %v1810_v51 = vadd.f32 %v1768_v36, %v5424_v59  ;;  %3979 = vrcp.f32 %v6375_v62  ;;  %v6405_v46 = vadd.f32 1.0, %v3972_v26  ;;  %v1672_v33 = vadd.f32 %v1671_v54, %v1622_v22 }
 0x22c   :  { %vm6407_vm13 = vcmp.eq.f32.partialorder %v2123_v5, 8.507059e+37  ;;  %v6417_v32 = vpop.eup %3973  ;;  %v2126_v16 = vor.u32 1.1754944e-38, %v2125_v23  ;;  %v2426_v13 = vsel %vm6413_vm14, %v6096_v6, %v2422_v0  ;;  %v7637_v61 = vand.u32 2147483648, %v6024_v38  ;;  %v2880_v23 = vld [vmem:[%s7281_s2 + $0x38] sm:$0xff] }
 0x22d   :  { %7632 = vst [vmem:[#allocation73_spill] sm:$0xff] %v6405_v46  ;;  %v1884_v59 = vadd.f32 %v6266_v19, %v1810_v51  ;;  %vm2439_vm15 = vweird.f32 %v6130_v7  ;;  %v6427_v5 = vmul.f32 %v6334_v56, %v2495_v53  ;;  %v2519_v26 = vand.u32 2147483648, %v6344_v15 }
 0x22e   :  { %v2430_v22 = vor.u32 1.1754944e-38, %v7637_v61  ;;  %3981 = vrcp.f32 %v6390_v18  ;;  %v1813_v36 = vadd.f32 %v1672_v33, %v7638_v31  ;;  %vm2428_vm0 = vcmp.eq.f32.partialorder %v2427_v10, 8.507059e+37 }
 0x22f   :  { %v3976_v54 = vpop.eup %3975  ;;  %v3681_v8 = vmul.f32 -1.442695, %v1884_v59  ;;  %v1720_v51 = vpop.f32.mrf.mxu2  ;;  %v7639_v38 = vsub.f32 1.0, %v6144_v27  ;;  %vm2438_vm1 = vweird.f32 %v6053_v9  ;;  %v2509_v0 = vmul.f32 %v6417_v32, %v6344_v15 }
 0x230   :  { %3983 = vrcp.f32 %v6405_v46  ;;  %v2905_v53 = vmul.f32 %v3976_v54, %v5782_v52  ;;  %v1887_v33 = vadd.f32 %v6247_v57, %v1813_v36  ;;  %v1769_v49 = vpop.f32.mrf.mxu3  ;;  %v3978_v59 = vpop.eup %3977  ;;  %v2534_v10 = vand.u32 2147483648, %v6375_v62  ;;  %vm6506_vm5 = vmor %vm2438_vm1, %vm2439_vm15 }
 0x231   :  { %v2132_v6 = vmul.f32 %v6121_v63, %v7639_v38  ;;  %v1625_v61 = vpop.f32.mrf.mxu0  ;;  %3985 = vpow2.f32 %v3681_v8  ;;  %v1770_v27 = vadd.f32 %v1769_v49, %v1720_v51  ;;  %v2431_v38 = vsel %vm2428_vm0, %v2430_v22, %v2426_v13  ;;  %v6446_v21 = vpop.eup %3979 }
 0x232   :  { %v1674_v31 = vpop.f32.mrf.mxu1  ;;  %7640 = vst [vmem:[#allocation24_spill] sm:$0xff] %v6446_v21  ;;  %v6448_v2 = vadd.f32 1.0, %v3978_v59  ;;  %v6451_v52 = vadd.f32 %v2905_v53, %v5843_v14  ;;  %3987 = vtanh.f32 %v1887_v33  ;;  %v6453_v54 = vor.u32 1.1754944e-38, %v2519_v26  ;;  %v7643_v14 = vld [vmem:[#allocation100_spill] sm:$0xff] }
 0x233   :  { %v1675_v36 = vadd.f32 %v1674_v31, %v1625_v61  ;;  %v1814_v8 = vadd.f32 %v1770_v27, %v7642_v58  ;;  %v2133_v51 = vadd.f32 %v6121_v63, %v2132_v6  ;;  %vm2135_vm2 = vweird.f32 %v6121_v63 }
 0x234   :  { %7641 = vst [vmem:[#allocation74_spill] sm:$0xff] %v6448_v2  ;;  %v6458_v13 = vpop.eup %3981  ;;  %v2510_v22 = vsub.f32 1.0, %v2509_v0  ;;  %v6467_v26 = vsel %vm6407_vm13, %v2126_v16, %v2122_v17  ;;  %v6469_v33 = vmul.f32 %v2880_v23, %v2431_v38  ;;  %v2524_v58 = vmul.f32 %v6446_v21, %v6375_v62 }
 0x235   :  { %2985 = vst [vmem:[%s7282_s9] sm:$0xff] %v6451_v52  ;;  %v1817_v53 = vadd.f32 %v1675_v36, %v7643_v14  ;;  %v6473_v6 = vor.u32 1.1754944e-38, %v2534_v10  ;;  %v1888_v0 = vadd.f32 %v6266_v19, %v1814_v8  ;;  %vm2134_vm3 = vweird.f32 %v6045_v28 }
 0x236   :  { %v6477_v49 = vpop.eup %3983  ;;  %3989 = vrcp.f32 %v6448_v2  ;;  %vm6481_vm4 = vmor %vm2134_vm3, %vm2135_vm2  ;;  %v2140_v44 = vand.u32 2147483648, %v6045_v28  ;;  %v2437_v16 = vadd.f32 %v6130_v7, %v6210_v42  ;;  %v6490_v59 = vmul.f32 %v6458_v13, %v6390_v18  ;;  %v7651_v18 = vld [vmem:[#allocation101_spill] sm:$0xff] }
 0x237   :  { %7644 = vst [vmem:[#allocation25_spill] sm:$0xff] %v6473_v6  ;;  %v1891_v61 = vadd.f32 %v6247_v57, %v1817_v53  ;;  %v3986_v23 = vpop.eup %3985  ;;  %v3682_v10 = vmul.f32 -1.442695, %v1888_v0  ;;  %v1723_v27 = vpop.f32.mrf.mxu2  ;;  %v2137_v31 = vsel %vm6481_vm4, %v6121_v63, %v2133_v51  ;;  %v2138_v38 = vand.u32 2147483647, %v6045_v28 }
 0x238   :  { %7645 = vst [vmem:[#allocation75_spill] sm:$0xff] %v6477_v49  ;;  %v3988_v36 = vpop.eup %3987  ;;  %v6497_v8 = vmul.f32 %v6417_v32, %v2510_v22  ;;  %v6499_v14 = vadd.f32 1.0, %v3986_v23  ;;  %v1772_v42 = vpop.f32.mrf.mxu3  ;;  %v2442_v6 = vand.u32 2147483647, %v6053_v9  ;;  %v2525_v28 = vsub.f32 1.0, %v2524_v58 }
 0x239   :  { %3991 = vtanh.f32 %v1891_v61  ;;  %v1627_v53 = vpop.f32.mrf.mxu0  ;;  %v2906_v63 = vmul.f32 %v3988_v36, %v5853_v34  ;;  %v1773_v51 = vadd.f32 %v1772_v42, %v1723_v27  ;;  %v6513_v61 = vmul.f32 %v6477_v49, %v6405_v46 }
 0x23a   :  { %3993 = vpow2.f32 %v3682_v10  ;;  %v1676_v22 = vpop.f32.mrf.mxu1  ;;  %v2141_v17 = vor.u32 1.1754944e-38, %v2140_v44  ;;  %v2441_v9 = vsel %vm6506_vm5, %v6130_v7, %v2437_v16  ;;  %vm2139_vm6 = vcmp.eq.f32.partialorder %v2138_v38, 8.507059e+37  ;;  %v7657_v38 = vld [vmem:[#allocation61_spill] sm:$0xff] }
 0x23b   :  { %7650 = vst [vmem:[#allocation26_spill] sm:$0xff] %v6513_v61  ;;  %3995 = vrcp.f32 %v6499_v14  ;;  %v2922_v58 = vadd.f32 %v2906_v63, %v5896_v37  ;;  %v1818_v34 = vadd.f32 %v1773_v51, %v7651_v18  ;;  %vm2454_vm7 = vweird.f32 %v6203_v20  ;;  %v2881_v18 = vld [vmem:[%s7281_s2 + $0x40] sm:$0xff]  ;;  %v7656_v63 = vld [vmem:[#allocation13_spill] sm:$0xff] }
 0x23c   :  { %v6522_v10 = vpop.eup %3989  ;;  %v1677_v36 = vadd.f32 %v1676_v22, %v1627_v53  ;;  %v6526_v42 = vsel %vm2139_vm6, %v2141_v17, %v2137_v31  ;;  %vm2443_vm8 = vcmp.eq.f32.partialorder %v2442_v6, 8.507059e+37  ;;  %v6529_v44 = vmul.f32 %v6446_v21, %v2525_v28  ;;  %v7655_v53 = vld [vmem:[#allocation102_spill] sm:$0xff] }
 0x23d   :  { %7652 = vst [vmem:[#allocation76_spill] sm:$0xff] %v6522_v10  ;;  %v1892_v37 = vadd.f32 %v6266_v19, %v1818_v34  ;;  %v2446_v7 = vsel %vm2443_vm8, %v6137_v50, %v2441_v9  ;;  %v7654_v16 = vsub.f32 1.0, %v6182_v4  ;;  %vm2453_vm9 = vweird.f32 %v6133_v45 }
 0x23e   :  { %7653 = vst [vmem:[#allocation27_spill] sm:$0xff] %v6529_v44  ;;  %3997 = vtanh.f32 %v6451_v52  ;;  %v1821_v0 = vadd.f32 %v1677_v36, %v7655_v53  ;;  %vm2149_vm10 = vweird.f32 %v6090_v47  ;;  %v2539_v28 = vmul.f32 %v6522_v10, %v6448_v2  ;;  %v7661_v2 = vld [vmem:[#allocation104_spill] sm:$0xff]  ;;  %vm6595_vm0 = vmor %vm2453_vm9, %vm2454_vm7 }
 0x23f   :  { %2986 = vst [vmem:[%s7282_s9 + $0x8] sm:$0xff] %v2922_v58  ;;  %v2147_v31 = vmul.f32 %v6149_v35, %v7654_v16  ;;  %v3992_v6 = vpop.eup %3991  ;;  %v3683_v4 = vmul.f32 -1.442695, %v1892_v37  ;;  %v1725_v22 = vpop.f32.mrf.mxu2  ;;  %vm2150_vm11 = vweird.f32 %v6149_v35  ;;  %v2642_v9 = vand.u32 2147483647, %v6499_v14 }
 0x240   :  { %v3994_v50 = vpop.eup %3993  ;;  %v2907_v51 = vmul.f32 %v3992_v6, %v7656_v63  ;;  %v1895_v52 = vadd.f32 %v6247_v57, %v1821_v0  ;;  %v1774_v36 = vpop.f32.mrf.mxu3  ;;  %v6555_v53 = vmul.f32 %v2881_v18, %v2446_v7  ;;  %vm2638_vm12 = vweird.f32 %v6499_v14  ;;  %vm6582_vm15 = vmor %vm2149_vm10, %vm2150_vm11 }
 0x241   :  { %v3996_v17 = vpop.eup %3995  ;;  %v6552_v34 = vadd.f32 1.0, %v3994_v50  ;;  %v1630_v16 = vpop.f32.mrf.mxu0  ;;  %3999 = vpow2.f32 %v3683_v4  ;;  %v6560_v6 = vadd.f32 %v6149_v35, %v2147_v31  ;;  %v2644_v50 = vand.u32 2147483648, %v6499_v14 }
 0x242   :  { %v2634_v27 = vmul.f32 %v3996_v17, %v6499_v14  ;;  %v2923_v23 = vadd.f32 %v2907_v51, %v7657_v38  ;;  %v1679_v37 = vpop.f32.mrf.mxu1  ;;  %v2540_v63 = vsub.f32 1.0, %v2539_v28  ;;  %v1775_v18 = vadd.f32 %v1774_v36, %v1725_v22 }
 0x243   :  { %4001 = vrcp.f32 %v6552_v34  ;;  %v1680_v38 = vadd.f32 %v1679_v37, %v1630_v16  ;;  %vm6569_vm13 = vcmp.eq.f32.partialorder %v2642_v9, 8.507059e+37  ;;  %v2155_v4 = vand.u32 2147483648, %v6090_v47 }
 0x244   :  { %v2635_v7 = vsub.f32 1.0, %v2634_v27  ;;  %2987 = vst [vmem:[%s7282_s9 + $0x10] sm:$0xff] %v2923_v23  ;;  %v3998_v51 = vpop.eup %3997  ;;  %4003 = vtanh.f32 %v1895_v52  ;;  %v2452_v46 = vadd.f32 %v6203_v20, %v6286_v60  ;;  %vm2639_vm14 = vweird.f32 %v3996_v17  ;;  %v7660_v27 = vld [vmem:[#allocation103_spill] sm:$0xff] }
 0x245   :  { %v1822_v28 = vadd.f32 %v1775_v18, %v7660_v27  ;;  %v1825_v49 = vadd.f32 %v1680_v38, %v7661_v2  ;;  %v2645_v9 = vor.u32 1.1754944e-38, %v2644_v50  ;;  %4005 = vtanh.f32 %v2922_v58  ;;  %vm2640_vm1 = vmor %vm2638_vm12, %vm2639_vm14 }
 0x246   :  { %v2636_v0 = vmul.f32 %v3996_v17, %v2635_v7  ;;  %v2457_v52 = vand.u32 2147483647, %v6133_v45  ;;  %v6600_v16 = vmul.f32 %v6522_v10, %v2540_v63  ;;  %v7667_v50 = vsub.f32 1.0, %v6262_v12  ;;  %v7668_v7 = vld [vmem:[#allocation66_spill] sm:$0xff] }
 0x247   :  { %v4000_v36 = vpop.eup %3999  ;;  %v1896_v37 = vadd.f32 %v6266_v19, %v1822_v28  ;;  %v2657_v45 = vand.u32 2147483647, %v6552_v34  ;;  %v1728_v60 = vpop.f32.mrf.mxu2  ;;  %v6612_v63 = vor.u32 1.1754944e-38, %v2155_v4  ;;  %vm2653_vm2 = vweird.f32 %v6552_v34 }
 0x248   :  { %7666 = vst [vmem:[#allocation78_spill] sm:$0xff] %v6600_v16  ;;  %v2637_v58 = vadd.f32 %v3996_v17, %v2636_v0  ;;  %v2162_v18 = vmul.f32 %v7668_v7, %v7667_v50  ;;  %v6610_v27 = vadd.f32 1.0, %v4000_v36  ;;  %v1777_v61 = vpop.f32.mrf.mxu3  ;;  %v2456_v0 = vsel %vm6595_vm0, %v6203_v20, %v2452_v46  ;;  %v7669_v46 = vld [vmem:[#allocation14_spill] sm:$0xff] }
 0x249   :  { %v4002_v38 = vpop.eup %4001  ;;  %v3684_v50 = vmul.f32 -1.442695, %v1896_v37  ;;  %v1899_v16 = vadd.f32 %v6247_v57, %v1825_v49  ;;  %v2659_v36 = vand.u32 2147483648, %v6552_v34  ;;  %v1632_v4 = vpop.f32.mrf.mxu0  ;;  %vm6625_vm3 = vcmp.eq.f32.partialorder %v2657_v45, 8.507059e+37 }
 0x24a   :  { %v2641_v12 = vsel %vm2640_vm1, %v3996_v17, %v2637_v58  ;;  %v2649_v28 = vmul.f32 %v4002_v38, %v6552_v34  ;;  %v4004_v14 = vpop.eup %4003  ;;  %4007 = vrcp.f32 %v6610_v27  ;;  %v1681_v44 = vpop.f32.mrf.mxu1  ;;  %v1778_v31 = vadd.f32 %v1777_v61, %v1728_v60  ;;  %v7675_v61 = vld [vmem:[#allocation19_spill] sm:$0xff] }
 0x24b   :  { %v2646_v10 = vsel %vm6569_vm13, %v2645_v9, %v2641_v12  ;;  %4009 = vtanh.f32 %v2923_v23  ;;  %v2908_v17 = vmul.f32 %v4004_v14, %v7669_v46  ;;  %v4006_v58 = vpop.eup %4005  ;;  %v1682_v9 = vadd.f32 %v1681_v44, %v1632_v4  ;;  %v7672_v12 = vld [vmem:[#allocation62_spill] sm:$0xff] }
 0x24c   :  { %v2953_v2 = vmul.f32 %v3998_v51, %v2646_v10  ;;  %v2650_v20 = vsub.f32 1.0, %v2649_v28  ;;  %4011 = vpow2.f32 %v3684_v50  ;;  %vm2654_vm4 = vweird.f32 %v4002_v38  ;;  %v7673_v51 = vld [vmem:[#allocation105_spill] sm:$0xff]  ;;  %v7674_v14 = vld [vmem:[#allocation2_spill] sm:$0xff]  ;;  %v7676_v50 = vld [vmem:[#allocation16_spill] sm:$0xff] }
 0x24d   :  { %v2924_v10 = vadd.f32 %v2908_v17, %v7672_v12  ;;  %4013 = vtanh.f32 %v1899_v16  ;;  %v2660_v23 = vor.u32 1.1754944e-38, %v2659_v36  ;;  %v1826_v28 = vadd.f32 %v1778_v31, %v7673_v51  ;;  %vm2655_vm7 = vmor %vm2653_vm2, %vm2654_vm4 }
 0x24e   :  { %2969 = vst [vmem:[%s7283_s8] sm:$0xff] %v2953_v2  ;;  %v2651_v37 = vmul.f32 %v4002_v38, %v2650_v20  ;;  %v1829_v45 = vadd.f32 %v1682_v9, %v7674_v14  ;;  %vm2458_vm5 = vcmp.eq.f32.partialorder %v2457_v52, 8.507059e+37  ;;  %v6642_v60 = vadd.f32 %v7668_v7, %v2162_v18  ;;  %v7677_v14 = vld [vmem:[#allocation64_spill] sm:$0xff] }
 0x24f   :  { %2988 = vst [vmem:[%s7282_s9 + $0x18] sm:$0xff] %v2924_v10  ;;  %v6639_v44 = vsel %vm2458_vm5, %v7675_v61, %v2456_v0  ;;  %vm2164_vm6 = vweird.f32 %v7676_v50  ;;  %v1900_v36 = vadd.f32 %v6266_v19, %v1826_v28  ;;  %v1730_v4 = vpop.f32.mrf.mxu2  ;;  %vm2165_vm8 = vweird.f32 %v7668_v7 }
 0x250   :  { %v2652_v46 = vadd.f32 %v4002_v38, %v2651_v37  ;;  %v4008_v16 = vpop.eup %4007  ;;  %v1903_v52 = vadd.f32 %v6247_v57, %v1829_v45  ;;  %v1779_v2 = vpop.f32.mrf.mxu3  ;;  %v2170_v0 = vand.u32 2147483648, %v7676_v50  ;;  %vm2469_vm9 = vweird.f32 %v6238_v43  ;;  %vm6671_vm12 = vmor %vm2164_vm6, %vm2165_vm8 }
 0x251   :  { %v4010_v20 = vpop.eup %4009  ;;  %v2664_v17 = vmul.f32 %v4008_v16, %v6610_v27  ;;  %v2672_v31 = vand.u32 2147483647, %v6610_v27  ;;  %v1780_v34 = vadd.f32 %v1779_v2, %v1730_v4  ;;  %v2674_v12 = vand.u32 2147483648, %v6610_v27 }
 0x252   :  { %v2656_v18 = vsel %vm2655_vm7, %v4002_v38, %v2652_v46  ;;  %v4012_v9 = vpop.eup %4011  ;;  %v3685_v51 = vmul.f32 -1.442695, %v1900_v36  ;;  %4015 = vtanh.f32 %v1903_v52  ;;  %vm2468_vm10 = vweird.f32 %v7677_v14  ;;  %v7678_v38 = vld [vmem:[#allocation46_spill] sm:$0xff]  ;;  %v1635_v52 = vpop.f32.mrf.mxu0 }
 0x253   :  { %v2661_v37 = vsel %vm6625_vm3, %v2660_v23, %v2656_v18  ;;  %v4014_v28 = vpop.eup %4013  ;;  %v2665_v61 = vsub.f32 1.0, %v2664_v17  ;;  %v6658_v62 = vadd.f32 1.0, %v4012_v9  ;;  %v1830_v46 = vadd.f32 %v1780_v34, %v7678_v38  ;;  %v1684_v2 = vpop.f32.mrf.mxu1  ;;  %v7687_v17 = vld [vmem:[#allocation63_spill] sm:$0xff]  ;;  %vm6718_vm2 = vmor %vm2468_vm10, %vm2469_vm9 }
 0x254   :  { %v2954_v45 = vmul.f32 %v4006_v58, %v2661_v37  ;;  %v7679_v21 = vand.u32 2147483647, %v6090_v47  ;;  %v7684_v58 = vld [vmem:[#allocation15_spill] sm:$0xff]  ;;  %4017 = vpow2.f32 %v3685_v51  ;;  %v2167_v47 = vsel %vm6671_vm12, %v7668_v7, %v6642_v60 }
 0x255   :  { %v2909_v23 = vmul.f32 %v4014_v28, %v7684_v58  ;;  %v2666_v36 = vmul.f32 %v4008_v16, %v2665_v61  ;;  %vm2668_vm13 = vweird.f32 %v6610_v27  ;;  %vm2669_vm14 = vweird.f32 %v4008_v16 }
 0x256   :  { %vm6663_vm11 = vcmp.eq.f32.partialorder %v7679_v21, 8.507059e+37  ;;  %v2168_v21 = vand.u32 2147483647, %v7676_v50  ;;  %2970 = vst [vmem:[%s7283_s8 + $0x8] sm:$0xff] %v2954_v45  ;;  %4019 = vrcp.f32 %v6658_v62  ;;  %vm6686_vm0 = vcmp.eq.f32.partialorder %v2672_v31, 8.507059e+37  ;;  %vm2670_vm1 = vmor %vm2668_vm13, %vm2669_vm14  ;;  %v7688_v31 = vld [vmem:[#allocation3_spill] sm:$0xff] }
 0x257   :  { %v2925_v7 = vadd.f32 %v2909_v23, %v7687_v17  ;;  %v1904_v60 = vadd.f32 %v6266_v19, %v1830_v46  ;;  %v1685_v50 = vadd.f32 %v1684_v2, %v1635_v52  ;;  %v2667_v34 = vadd.f32 %v4008_v16, %v2666_v36  ;;  %v1733_v45 = vpop.f32.mrf.mxu2  ;;  %v7691_v23 = vld [vmem:[#allocation69_spill] sm:$0xff] }
 0x258   :  { %v2675_v9 = vor.u32 1.1754944e-38, %v2674_v12  ;;  %4021 = vtanh.f32 %v2924_v10  ;;  %v2171_v37 = vor.u32 1.1754944e-38, %v2170_v0  ;;  %v4016_v51 = vpop.eup %4015  ;;  %v1782_v61 = vpop.f32.mrf.mxu3  ;;  %v2467_v38 = vadd.f32 %v6238_v43, %v6338_v40  ;;  %v7689_v12 = vld [vmem:[#allocation65_spill] sm:$0xff]  ;;  %v2882_v40 = vld [vmem:[%s7281_s2 + $0x48] sm:$0xff] }
 0x259   :  { %2989 = vst [vmem:[%s7282_s9 + $0x20] sm:$0xff] %v2925_v7  ;;  %v3686_v27 = vmul.f32 -1.442695, %v1904_v60  ;;  %v1833_v28 = vadd.f32 %v1685_v50, %v7688_v31  ;;  %v2472_v46 = vand.u32 2147483647, %v7677_v14  ;;  %v2671_v49 = vsel %vm2670_vm1, %v4008_v16, %v2667_v34  ;;  %v7693_v31 = vld [vmem:[#allocation48_spill] sm:$0xff] }
 0x25a   :  { %v2910_v10 = vmul.f32 %v4016_v51, %v7689_v12  ;;  %v1783_v0 = vadd.f32 %v1782_v61, %v1733_v45  ;;  %v7690_v58 = vsub.f32 1.0, %v6323_v25  ;;  %v4018_v52 = vpop.eup %4017  ;;  %v2676_v2 = vsel %vm6686_vm0, %v2675_v9, %v2671_v49  ;;  %v7692_v25 = vld [vmem:[#allocation20_spill] sm:$0xff] }
 0x25b   :  { %v2687_v17 = vand.u32 2147483647, %v6658_v62  ;;  %4023 = vpow2.f32 %v3686_v27  ;;  %v1907_v60 = vadd.f32 %v6247_v57, %v1833_v28  ;;  %v2955_v50 = vmul.f32 %v4010_v20, %v2676_v2  ;;  %v1686_v61 = vpop.f32.mrf.mxu1 }
 0x25c   :  { %v2177_v36 = vmul.f32 %v7691_v23, %v7690_v58  ;;  %v4020_v16 = vpop.eup %4019  ;;  %v6710_v34 = vadd.f32 1.0, %v4018_v52  ;;  %v2926_v51 = vadd.f32 %v2910_v10, %v7692_v25  ;;  %v1834_v45 = vadd.f32 %v1783_v0, %v7693_v31  ;;  %v7699_v0 = vld [vmem:[#allocation68_spill] sm:$0xff]  ;;  %v7700_v52 = vld [vmem:[#allocation17_spill] sm:$0xff] }
 0x25d   :  { %v2679_v9 = vmul.f32 %v4020_v16, %v6658_v62  ;;  %4025 = vtanh.f32 %v1907_v60  ;;  %v7696_v20 = vsel %vm6582_vm15, %v6149_v35, %v6560_v6  ;;  %vm2169_vm3 = vcmp.eq.f32.partialorder %v2168_v21, 8.507059e+37  ;;  %2971 = vst [vmem:[%s7283_s8 + $0x10] sm:$0xff] %v2955_v50  ;;  %v1637_v21 = vpop.f32.mrf.mxu0  ;;  %v2883_v58 = vld [vmem:[%s7281_s2 + $0x50] sm:$0xff]  ;;  %v7702_v60 = vld [vmem:[#allocation18_spill] sm:$0xff] }
 0x25e   :  { %v6731_v27 = vsel %vm6663_vm11, %v6612_v63, %v7696_v20  ;;  %v4022_v28 = vpop.eup %4021  ;;  %4027 = vrcp.f32 %v6710_v34  ;;  %v6738_v14 = vmul.f32 %v2882_v40, %v6639_v44  ;;  %v6740_v22 = vsel %vm2169_vm3, %v2171_v37, %v2167_v47  ;;  %2990 = vst [vmem:[%s7282_s9 + $0x28] sm:$0xff] %v2926_v51 }
 0x25f   :  { %v2471_v35 = vsel %vm6718_vm2, %v6238_v43, %v2467_v38  ;;  %v2680_v6 = vsub.f32 1.0, %v2679_v9  ;;  %v2689_v63 = vand.u32 2147483648, %v6658_v62  ;;  %v1908_v4 = vadd.f32 %v6266_v19, %v1834_v45  ;;  %v1735_v12 = vpop.f32.mrf.mxu2 }
 0x260   :  { %vm2473_vm15 = vcmp.eq.f32.partialorder %v2472_v46, 8.507059e+37  ;;  %vm2484_vm4 = vweird.f32 %v6268_v41  ;;  %vm2683_vm5 = vweird.f32 %v6658_v62  ;;  %vm6752_vm6 = vcmp.eq.f32.partialorder %v2687_v17, 8.507059e+37  ;;  %v1784_v10 = vpop.f32.mrf.mxu3  ;;  %v7701_v17 = vld [vmem:[#allocation4_spill] sm:$0xff] }
 0x261   :  { %v1687_v43 = vadd.f32 %v1686_v61, %v1637_v21  ;;  %v6757_v47 = vadd.f32 %v7691_v23, %v2177_v36  ;;  %v4024_v37 = vpop.eup %4023  ;;  %v2681_v38 = vmul.f32 %v4020_v16, %v2680_v6  ;;  %vm2684_vm7 = vweird.f32 %v4020_v16 }
 0x262   :  { %v3687_v49 = vmul.f32 -1.442695, %v1908_v4  ;;  %v2476_v46 = vsel %vm2473_vm15, %v7699_v0, %v2471_v35  ;;  %vm2483_vm8 = vweird.f32 %v7700_v52  ;;  %4029 = vtanh.f32 %v2925_v7  ;;  %vm2685_vm10 = vmor %vm2683_vm5, %vm2684_vm7 }
 0x263   :  { %v6764_v2 = vadd.f32 1.0, %v4024_v37  ;;  %v1837_v36 = vadd.f32 %v1687_v43, %v7701_v17  ;;  %vm2179_vm9 = vweird.f32 %v7702_v60  ;;  %v4026_v40 = vpop.eup %4025  ;;  %v2682_v50 = vadd.f32 %v4020_v16, %v2681_v38  ;;  %v1689_v0 = vpop.f32.mrf.mxu1  ;;  %vm6819_vm1 = vmor %vm2483_vm8, %vm2484_vm4 }
 0x264   :  { %v2690_v25 = vor.u32 1.1754944e-38, %v2689_v63  ;;  %4031 = vpow2.f32 %v3687_v49  ;;  %v1785_v31 = vadd.f32 %v1784_v10, %v1735_v12  ;;  %v4028_v45 = vpop.eup %4027  ;;  %v2702_v18 = vand.u32 2147483647, %v6710_v34 }
 0x265   :  { %4033 = vrcp.f32 %v6764_v2  ;;  %v6773_v7 = vmul.f32 %v2883_v58, %v2476_v46  ;;  %vm2180_vm11 = vweird.f32 %v7691_v23  ;;  %v2686_v9 = vsel %vm2685_vm10, %v4020_v16, %v2682_v50  ;;  %v7703_v16 = vld [vmem:[#allocation49_spill] sm:$0xff]  ;;  %v1640_v10 = vpop.f32.mrf.mxu0 }
 0x266   :  { %v2694_v20 = vmul.f32 %v4028_v45, %v6710_v34  ;;  %v2704_v35 = vand.u32 2147483648, %v6710_v34  ;;  %v2911_v6 = vmul.f32 %v4026_v40, %v6349_v29  ;;  %v2691_v63 = vsel %vm6752_vm6, %v2690_v25, %v2686_v9  ;;  %vm6789_vm12 = vmor %vm2179_vm9, %vm2180_vm11 }
 0x267   :  { %4035 = vtanh.f32 %v2926_v51  ;;  %v1911_v62 = vadd.f32 %v6247_v57, %v1837_v36  ;;  %v2183_v4 = vand.u32 2147483647, %v7702_v60  ;;  %v2956_v21 = vmul.f32 %v4022_v28, %v2691_v63  ;;  %v1738_v58 = vpop.f32.mrf.mxu2 }
 0x268   :  { %v2695_v61 = vsub.f32 1.0, %v2694_v20  ;;  %v6784_v43 = vadd.f32 %v2911_v6, %v6392_v24  ;;  %v1838_v37 = vadd.f32 %v1785_v31, %v7703_v16  ;;  %v4030_v29 = vpop.eup %4029  ;;  %vm2698_vm13 = vweird.f32 %v6710_v34  ;;  %v1787_v17 = vpop.f32.mrf.mxu3 }
 0x269   :  { %4037 = vtanh.f32 %v1911_v62  ;;  %v2182_v51 = vsel %vm6789_vm12, %v7691_v23, %v6757_v47  ;;  %v2482_v24 = vadd.f32 %v6268_v41, %v6359_v30  ;;  %2972 = vst [vmem:[%s7283_s8 + $0x18] sm:$0xff] %v2956_v21  ;;  %vm2699_vm14 = vweird.f32 %v4028_v45  ;;  %v7712_v62 = vld [vmem:[#allocation5_spill] sm:$0xff] }
 0x26a   :  { %v4032_v28 = vpop.eup %4031  ;;  %v2696_v44 = vmul.f32 %v4028_v45, %v2695_v61  ;;  %vm6803_vm0 = vcmp.eq.f32.partialorder %v2702_v18, 8.507059e+37  ;;  %v1912_v12 = vadd.f32 %v6266_v19, %v1838_v37  ;;  %v2705_v23 = vor.u32 1.1754944e-38, %v2704_v35  ;;  %2991 = vst [vmem:[%s7282_s9 + $0x30] sm:$0xff] %v6784_v43  ;;  %vm2700_vm3 = vmor %vm2698_vm13, %vm2699_vm14 }
 0x26b   :  { %v4034_v46 = vpop.eup %4033  ;;  %v6812_v30 = vadd.f32 1.0, %v4032_v28  ;;  %v1690_v47 = vadd.f32 %v1689_v0, %v1640_v10  ;;  %v2185_v36 = vand.u32 2147483648, %v7702_v60  ;;  %vm6824_vm2 = vcmp.eq.f32.partialorder %v2183_v4, 8.507059e+37  ;;  %v7716_v0 = vld [vmem:[#allocation71_spill] sm:$0xff] }
 0x26c   :  { %v2697_v50 = vadd.f32 %v4028_v45, %v2696_v44  ;;  %v2709_v25 = vmul.f32 %v4034_v46, %v6764_v2  ;;  %v3688_v31 = vmul.f32 -1.442695, %v1912_v12  ;;  %v2717_v60 = vand.u32 2147483647, %v6764_v2 }
 0x26d   :  { %v4036_v9 = vpop.eup %4035  ;;  %4039 = vrcp.f32 %v6812_v30  ;;  %v2486_v20 = vsel %vm6819_vm1, %v6268_v41, %v2482_v24  ;;  %v2487_v35 = vand.u32 2147483647, %v7700_v52  ;;  %v1841_v4 = vadd.f32 %v1690_v47, %v7712_v62  ;;  %v2884_v47 = vld [vmem:[%s7281_s2 + $0x58] sm:$0xff] }
 0x26e   :  { %v2701_v6 = vsel %vm2700_vm3, %v4028_v45, %v2697_v50  ;;  %v2710_v63 = vsub.f32 1.0, %v2709_v25  ;;  %4041 = vpow2.f32 %v3688_v31  ;;  %vm2714_vm15 = vweird.f32 %v4034_v46  ;;  %v7715_v45 = vld [vmem:[#allocation51_spill] sm:$0xff] }
 0x26f   :  { %v4038_v21 = vpop.eup %4037  ;;  %v2706_v34 = vsel %vm6803_vm0, %v2705_v23, %v2701_v6  ;;  %v2719_v61 = vand.u32 2147483648, %v6764_v2  ;;  %v1788_v16 = vadd.f32 %v1787_v17, %v1738_v58  ;;  %v1915_v41 = vadd.f32 %v6247_v57, %v1841_v4  ;;  %v1740_v18 = vpop.f32.mrf.mxu2 }
 0x270   :  { %v2957_v37 = vmul.f32 %v4030_v29, %v2706_v34  ;;  %v2711_v38 = vmul.f32 %v4034_v46, %v2710_v63  ;;  %v2912_v28 = vmul.f32 %v4038_v21, %v6467_v26  ;;  %vm2713_vm4 = vweird.f32 %v6764_v2 }
 0x271   :  { %vm6844_vm5 = vcmp.eq.f32.partialorder %v2717_v60, 8.507059e+37  ;;  %v1842_v24 = vadd.f32 %v1788_v16, %v7715_v45  ;;  %v2186_v44 = vor.u32 1.1754944e-38, %v2185_v36  ;;  %4043 = vtanh.f32 %v1915_v41  ;;  %vm2715_vm7 = vmor %vm2713_vm4, %vm2714_vm15  ;;  %v1642_v36 = vpop.f32.mrf.mxu0  ;;  %v1789_v60 = vpop.f32.mrf.mxu3 }
 0x272   :  { %2973 = vst [vmem:[%s7283_s8 + $0x20] sm:$0xff] %v2957_v37  ;;  %v2712_v49 = vadd.f32 %v4034_v46, %v2711_v38  ;;  %v6853_v29 = vadd.f32 %v2912_v28, %v6469_v33  ;;  %vm2488_vm6 = vcmp.eq.f32.partialorder %v2487_v35, 8.507059e+37  ;;  %v2720_v2 = vor.u32 1.1754944e-38, %v2719_v61  ;;  %v7719_v61 = vld [vmem:[#allocation52_spill] sm:$0xff] }
 0x273   :  { %v4040_v26 = vpop.eup %4039  ;;  %v1916_v12 = vadd.f32 %v6266_v19, %v1842_v24  ;;  %v6859_v10 = vsel %vm6824_vm2, %v2186_v44, %v2182_v51  ;;  %v2491_v23 = vsel %vm2488_vm6, %v7716_v0, %v2486_v20  ;;  %4045 = vtanh.f32 %v6784_v43  ;;  %v1691_v51 = vpop.f32.mrf.mxu1 }
 0x274   :  { %v4042_v33 = vpop.eup %4041  ;;  %v2716_v58 = vsel %vm2715_vm7, %v4034_v46, %v2712_v49  ;;  %v2724_v17 = vmul.f32 %v4040_v26, %v6812_v30  ;;  %2992 = vst [vmem:[%s7282_s9 + $0x38] sm:$0xff] %v6853_v29  ;;  %v7717_v40 = vsub.f32 1.0, %v6342_v1  ;;  %v1692_v43 = vadd.f32 %v1691_v51, %v1642_v36 }
 0x275   :  { %v2721_v25 = vsel %vm6844_vm5, %v2720_v2, %v2716_v58  ;;  %v6876_v31 = vadd.f32 1.0, %v4042_v33  ;;  %v3689_v46 = vmul.f32 -1.442695, %v1916_v12  ;;  %v1790_v6 = vadd.f32 %v1789_v60, %v1740_v18 }
 0x276   :  { %v2192_v50 = vmul.f32 %v6319_v11, %v7717_v40  ;;  %v2958_v20 = vmul.f32 %v4036_v9, %v2721_v25  ;;  %v2725_v35 = vsub.f32 1.0, %v2724_v17  ;;  %v6878_v63 = vmul.f32 %v2884_v47, %v2491_v23  ;;  %v7718_v9 = vld [vmem:[#allocation6_spill] sm:$0xff] }
 0x277   :  { %vm2729_vm8 = vweird.f32 %v4040_v26  ;;  %v2732_v62 = vand.u32 2147483647, %v6812_v30  ;;  %v2734_v1 = vand.u32 2147483648, %v6812_v30  ;;  %4047 = vrcp.f32 %v6876_v31  ;;  %v4044_v4 = vpop.eup %4043 }
 0x278   :  { %vm2499_vm9 = vweird.f32 %v6334_v56  ;;  %2974 = vst [vmem:[%s7283_s8 + $0x28] sm:$0xff] %v2958_v20  ;;  %v2726_v21 = vmul.f32 %v4040_v26, %v2725_v35  ;;  %4049 = vpow2.f32 %v3689_v46  ;;  %v1845_v34 = vadd.f32 %v1692_v43, %v7718_v9  ;;  %v7724_v43 = vld [vmem:[#allocation7_spill] sm:$0xff] }
 0x279   :  { %v1846_v16 = vadd.f32 %v1790_v6, %v7719_v61  ;;  %vm2728_vm10 = vweird.f32 %v6812_v30  ;;  %v2913_v37 = vmul.f32 %v4044_v4, %v6526_v42  ;;  %v2193_v38 = vadd.f32 %v6319_v11, %v2192_v50  ;;  %v4046_v28 = vpop.eup %4045  ;;  %v1645_v2 = vpop.f32.mrf.mxu0 }
 0x27a   :  { %vm2195_vm11 = vweird.f32 %v6319_v11  ;;  %vm2498_vm12 = vweird.f32 %v6264_v3  ;;  %v2727_v41 = vadd.f32 %v4040_v26, %v2726_v21  ;;  %v1919_v52 = vadd.f32 %v6247_v57, %v1845_v34  ;;  %vm2730_vm13 = vmor %vm2728_vm10, %vm2729_vm8  ;;  %v1792_v17 = vpop.f32.mrf.mxu3  ;;  %v7727_v21 = vld [vmem:[#allocation53_spill] sm:$0xff] }
 0x27b   :  { %v1920_v45 = vadd.f32 %v6266_v19, %v1846_v16  ;;  %v2198_v24 = vand.u32 2147483647, %v6241_v39  ;;  %vm2733_vm14 = vcmp.eq.f32.partialorder %v2732_v62, 8.507059e+37  ;;  %v2735_v30 = vor.u32 1.1754944e-38, %v2734_v1  ;;  %v1694_v12 = vpop.f32.mrf.mxu1  ;;  %vm6942_vm5 = vmor %vm2498_vm12, %vm2499_vm9 }
 0x27c   :  { %v2929_v42 = vadd.f32 %v2913_v37, %v6555_v53  ;;  %vm2194_vm0 = vweird.f32 %v6241_v39  ;;  %v2731_v44 = vsel %vm2730_vm13, %v4040_v26, %v2727_v41  ;;  %4051 = vtanh.f32 %v1919_v52  ;;  %v1743_v26 = vpop.f32.mrf.mxu2 }
 0x27d   :  { %v3690_v49 = vmul.f32 -1.442695, %v1920_v45  ;;  %vm6902_vm1 = vmor %vm2194_vm0, %vm2195_vm11  ;;  %v2200_v23 = vand.u32 2147483648, %v6241_v39  ;;  %v4048_v47 = vpop.eup %4047  ;;  %v2736_v33 = vsel %vm2733_vm14, %v2735_v30, %v2731_v44  ;;  %v2747_v58 = vand.u32 2147483647, %v6876_v31 }
 0x27e   :  { %2993 = vst [vmem:[%s7282_s9 + $0x40] sm:$0xff] %v2929_v42  ;;  %v1695_v53 = vadd.f32 %v1694_v12, %v1645_v2  ;;  %v2197_v36 = vsel %vm6902_vm1, %v6319_v11, %v2193_v38  ;;  %v4050_v51 = vpop.eup %4049  ;;  %v2959_v40 = vmul.f32 %v4046_v28, %v2736_v33  ;;  %v2739_v50 = vmul.f32 %v4048_v47, %v6876_v31 }
 0x27f   :  { %4053 = vpow2.f32 %v3690_v49  ;;  %vm6915_vm2 = vcmp.eq.f32.partialorder %v2198_v24, 8.507059e+37  ;;  %v2749_v25 = vand.u32 2147483648, %v6876_v31  ;;  %v6920_v46 = vadd.f32 1.0, %v4050_v51 }
 0x280   :  { %v1849_v18 = vadd.f32 %v1695_v53, %v7724_v43  ;;  %v1793_v60 = vadd.f32 %v1792_v17, %v1743_v26  ;;  %2975 = vst [vmem:[%s7283_s8 + $0x30] sm:$0xff] %v2959_v40  ;;  %4055 = vtanh.f32 %v6853_v29  ;;  %v2740_v11 = vsub.f32 1.0, %v2739_v50  ;;  %v7735_v40 = vld [vmem:[#allocation21_spill] sm:$0xff] }
 0x281   :  { %v2201_v20 = vor.u32 1.1754944e-38, %v2200_v23  ;;  %v2497_v35 = vadd.f32 %v6334_v56, %v6427_v5  ;;  %vm2743_vm3 = vweird.f32 %v6876_v31  ;;  %vm6930_vm15 = vcmp.eq.f32.partialorder %v2747_v58, 8.507059e+37  ;;  %v1647_v24 = vpop.f32.mrf.mxu0  ;;  %v7733_v23 = vld [vmem:[#allocation22_spill] sm:$0xff] }
 0x282   :  { %4057 = vrcp.f32 %v6920_v46  ;;  %v2502_v62 = vand.u32 2147483647, %v6264_v3  ;;  %v4052_v1 = vpop.eup %4051  ;;  %v2741_v4 = vmul.f32 %v4048_v47, %v2740_v11  ;;  %vm2744_vm4 = vweird.f32 %v4048_v47  ;;  %v1794_v12 = vpop.f32.mrf.mxu3 }
 0x283   :  { %v1923_v29 = vadd.f32 %v6247_v57, %v1849_v18  ;;  %v1850_v9 = vadd.f32 %v1793_v60, %v7727_v21  ;;  %v2750_v34 = vor.u32 1.1754944e-38, %v2749_v25  ;;  %v2914_v61 = vmul.f32 %v4052_v1, %v6731_v27  ;;  %vm6961_vm7 = vmor %vm2743_vm3, %vm2744_vm4  ;;  %v1696_v30 = vpop.f32.mrf.mxu1 }
 0x284   :  { %v6949_v16 = vsel %vm6915_vm2, %v2201_v20, %v2197_v36  ;;  %v7730_v37 = vsub.f32 1.0, %v6400_v55  ;;  %v2742_v41 = vadd.f32 %v4048_v47, %v2741_v4  ;;  %v2501_v52 = vsel %vm6942_vm5, %v6334_v56, %v2497_v35  ;;  %v1745_v31 = vpop.f32.mrf.mxu2  ;;  %v7734_v36 = vld [vmem:[#allocation8_spill] sm:$0xff] }
 0x285   :  { %v4054_v28 = vpop.eup %4053  ;;  %4059 = vtanh.f32 %v1923_v29  ;;  %v1924_v3 = vadd.f32 %v6266_v19, %v1850_v9  ;;  %vm2514_vm6 = vweird.f32 %v6417_v32  ;;  %v2930_v55 = vadd.f32 %v2914_v61, %v6738_v14  ;;  %v7740_v29 = vld [vmem:[#allocation54_spill] sm:$0xff] }
 0x286   :  { %v2207_v38 = vmul.f32 %v6373_v48, %v7730_v37  ;;  %4061 = vtanh.f32 %v2929_v42  ;;  %v6966_v45 = vadd.f32 1.0, %v4054_v28  ;;  %vm2210_vm8 = vweird.f32 %v6373_v48  ;;  %v4056_v44 = vpop.eup %4055 }
 0x287   :  { %v2746_v56 = vsel %vm6961_vm7, %v4048_v47, %v2742_v41  ;;  %v3691_v49 = vmul.f32 -1.442695, %v1924_v3  ;;  %v1697_v2 = vadd.f32 %v1696_v30, %v1647_v24  ;;  %vm2503_vm9 = vcmp.eq.f32.partialorder %v2502_v62, 8.507059e+37  ;;  %2994 = vst [vmem:[%s7282_s9 + $0x48] sm:$0xff] %v2930_v55  ;;  %v2885_v47 = vld [vmem:[%s7281_s2 + $0x60] sm:$0xff] }
 0x288   :  { %v4058_v0 = vpop.eup %4057  ;;  %vm2513_vm10 = vweird.f32 %v6344_v15  ;;  %v2751_v14 = vsel %vm6930_vm15, %v2750_v34, %v2746_v56  ;;  %v2762_v42 = vand.u32 2147483647, %v6920_v46  ;;  %v2506_v33 = vsel %vm2503_vm9, %v7733_v23, %v2501_v52 }
 0x289   :  { %v6983_v58 = vadd.f32 %v6373_v48, %v2207_v38  ;;  %v2960_v53 = vmul.f32 %v4056_v44, %v2751_v14  ;;  %v2754_v26 = vmul.f32 %v4058_v0, %v6920_v46  ;;  %v2764_v17 = vand.u32 2147483648, %v6920_v46  ;;  %v1650_v52 = vpop.f32.mrf.mxu0  ;;  %vm7043_vm3 = vmor %vm2513_vm10, %vm2514_vm6 }
 0x28a   :  { %4063 = vrcp.f32 %v6966_v45  ;;  %v1853_v51 = vadd.f32 %v1697_v2, %v7734_v36  ;;  %vm2209_vm11 = vweird.f32 %v7735_v40  ;;  %v2213_v50 = vand.u32 2147483647, %v7735_v40 }
 0x28b   :  { %4065 = vpow2.f32 %v3691_v49  ;;  %v4060_v39 = vpop.eup %4059  ;;  %2976 = vst [vmem:[%s7283_s8 + $0x38] sm:$0xff] %v2960_v53  ;;  %v2755_v25 = vsub.f32 1.0, %v2754_v26  ;;  %vm2758_vm12 = vweird.f32 %v6920_v46  ;;  %v1795_v43 = vadd.f32 %v1794_v12, %v1745_v31  ;;  %vm6999_vm13 = vmor %vm2209_vm11, %vm2210_vm8  ;;  %v1699_v27 = vpop.f32.mrf.mxu1  ;;  %v7749_v53 = vld [vmem:[#allocation55_spill] sm:$0xff] }
 0x28c   :  { %v6995_v18 = vmul.f32 %v2885_v47, %v2506_v33  ;;  %v4062_v11 = vpop.eup %4061  ;;  %vm7003_vm14 = vcmp.eq.f32.partialorder %v2762_v42, 8.507059e+37  ;;  %v2915_v35 = vmul.f32 %v4060_v39, %v6740_v22  ;;  %v1927_v6 = vadd.f32 %v6247_v57, %v1853_v51  ;;  %v1748_v56 = vpop.f32.mrf.mxu2  ;;  %v7748_v47 = vld [vmem:[#allocation9_spill] sm:$0xff] }
 0x28d   :  { %v2212_v62 = vsel %vm6999_vm13, %v6373_v48, %v6983_v58  ;;  %v2756_v1 = vmul.f32 %v4058_v0, %v2755_v25  ;;  %vm2759_vm0 = vweird.f32 %v4058_v0  ;;  %v2765_v4 = vor.u32 1.1754944e-38, %v2764_v17  ;;  %v1797_v49 = vpop.f32.mrf.mxu3 }
 0x28e   :  { %v1854_v21 = vadd.f32 %v1795_v43, %v7740_v29  ;;  %v7015_v9 = vadd.f32 %v2915_v35, %v6773_v7  ;;  %4067 = vtanh.f32 %v1927_v6  ;;  %vm7017_vm1 = vcmp.eq.f32.partialorder %v2213_v50, 8.507059e+37  ;;  %vm7028_vm2 = vmor %vm2758_vm12, %vm2759_vm0  ;;  %v7755_v7 = vld [vmem:[#allocation10_spill] sm:$0xff] }
 0x28f   :  { %v2512_v22 = vadd.f32 %v6417_v32, %v6497_v8  ;;  %v2757_v61 = vadd.f32 %v4058_v0, %v2756_v1  ;;  %v2215_v37 = vand.u32 2147483648, %v7735_v40  ;;  %v2517_v38 = vand.u32 2147483647, %v6344_v15 }
 0x290   :  { %v4064_v34 = vpop.eup %4063  ;;  %v1928_v48 = vadd.f32 %v6266_v19, %v1854_v21  ;;  %4069 = vtanh.f32 %v2930_v55  ;;  %v2777_v8 = vand.u32 2147483647, %v6966_v45  ;;  %v2779_v3 = vand.u32 2147483648, %v6966_v45  ;;  %2995 = vst [vmem:[%s7282_s9 + $0x50] sm:$0xff] %v7015_v9 }
 0x291   :  { %v4066_v28 = vpop.eup %4065  ;;  %v2769_v41 = vmul.f32 %v4064_v34, %v6966_v45  ;;  %v2761_v55 = vsel %vm7028_vm2, %v4058_v0, %v2757_v61  ;;  %v1700_v44 = vadd.f32 %v1699_v27, %v1650_v52  ;;  %v1798_v12 = vadd.f32 %v1797_v49, %v1748_v56 }
 0x292   :  { %v7049_v24 = vadd.f32 1.0, %v4066_v28  ;;  %v3692_v30 = vmul.f32 -1.442695, %v1928_v48  ;;  %v2766_v2 = vsel %vm7003_vm14, %v2765_v4, %v2761_v55  ;;  %v2516_v15 = vsel %vm7043_vm3, %v6417_v32, %v2512_v22  ;;  %v7753_v4 = vld [vmem:[#allocation72_spill] sm:$0xff] }
 0x293   :  { %v2770_v31 = vsub.f32 1.0, %v2769_v41  ;;  %v2961_v14 = vmul.f32 %v4062_v11, %v2766_v2  ;;  %vm2518_vm15 = vcmp.eq.f32.partialorder %v2517_v38, 8.507059e+37  ;;  %v7747_v0 = vsub.f32 1.0, %v6490_v59  ;;  %v2886_v59 = vld [vmem:[%s7281_s2 + $0x68] sm:$0xff]  ;;  %v1652_v11 = vpop.f32.mrf.mxu0  ;;  %v1701_v20 = vpop.f32.mrf.mxu1 }
 0x294   :  { %4071 = vrcp.f32 %v7049_v24  ;;  %v4068_v23 = vpop.eup %4067  ;;  %vm2774_vm4 = vweird.f32 %v4064_v34  ;;  %v1857_v58 = vadd.f32 %v1700_v44, %v7748_v47  ;;  %v1858_v26 = vadd.f32 %v1798_v12, %v7749_v53  ;;  %v1750_v21 = vpop.f32.mrf.mxu2 }
 0x295   :  { %v2222_v42 = vmul.f32 %v6458_v13, %v7747_v0  ;;  %v2771_v33 = vmul.f32 %v4064_v34, %v2770_v31  ;;  %4073 = vpow2.f32 %v3692_v30  ;;  %2977 = vst [vmem:[%s7283_s8 + $0x40] sm:$0xff] %v2961_v14  ;;  %v2916_v32 = vmul.f32 %v4068_v23, %v6859_v10  ;;  %v7752_v10 = vld [vmem:[#allocation24_spill] sm:$0xff]  ;;  %v1799_v5 = vpop.f32.mrf.mxu3 }
 0x296   :  { %v2216_v17 = vor.u32 1.1754944e-38, %v2215_v37  ;;  %v2521_v36 = vsel %vm2518_vm15, %v6453_v54, %v2516_v15  ;;  %v4070_v51 = vpop.eup %4069  ;;  %vm2773_vm5 = vweird.f32 %v6966_v45  ;;  %vm7071_vm6 = vcmp.eq.f32.partialorder %v2777_v8, 8.507059e+37  ;;  %v7754_v37 = vld [vmem:[#allocation23_spill] sm:$0xff] }
 0x297   :  { %v2772_v40 = vadd.f32 %v4064_v34, %v2771_v33  ;;  %v1931_v39 = vadd.f32 %v6247_v57, %v1857_v58  ;;  %vm2529_vm7 = vweird.f32 %v7752_v10  ;;  %vm2775_vm8 = vmor %vm2773_vm5, %vm2774_vm4  ;;  %v2780_v25 = vor.u32 1.1754944e-38, %v2779_v3  ;;  %v7756_v3 = vld [vmem:[#allocation56_spill] sm:$0xff]  ;;  %v7761_v15 = vld [vmem:[#allocation27_spill] sm:$0xff] }
 0x298   :  { %v7079_v54 = vadd.f32 %v2916_v32, %v6878_v63  ;;  %v1932_v43 = vadd.f32 %v6266_v19, %v1858_v26  ;;  %v7084_v60 = vsel %vm7017_vm1, %v2216_v17, %v2212_v62  ;;  %v7086_v35 = vmul.f32 %v2886_v59, %v2521_v36 }
 0x299   :  { %v2776_v45 = vsel %vm2775_vm8, %v4064_v34, %v2772_v40  ;;  %4075 = vtanh.f32 %v1931_v39  ;;  %v7089_v6 = vadd.f32 %v6458_v13, %v2222_v42  ;;  %vm2528_vm9 = vweird.f32 %v7753_v4  ;;  %v7766_v39 = vld [vmem:[#allocation11_spill] sm:$0xff] }
 0x29a   :  { %v4072_v1 = vpop.eup %4071  ;;  %v2781_v63 = vsel %vm7071_vm6, %v2780_v25, %v2776_v45  ;;  %2996 = vst [vmem:[%s7282_s9 + $0x58] sm:$0xff] %v7079_v54  ;;  %v3693_v62 = vmul.f32 -1.442695, %v1932_v43  ;;  %v1702_v29 = vadd.f32 %v1701_v20, %v1652_v11  ;;  %vm2225_vm10 = vweird.f32 %v6458_v13  ;;  %vm7144_vm3 = vmor %vm2528_vm9, %vm2529_vm7 }
 0x29b   :  { %v4074_v22 = vpop.eup %4073  ;;  %v2962_v34 = vmul.f32 %v4070_v51, %v2781_v63  ;;  %v2784_v61 = vmul.f32 %v4072_v1, %v7049_v24  ;;  %v1800_v48 = vadd.f32 %v1799_v5, %v1750_v21  ;;  %vm2224_vm11 = vweird.f32 %v7754_v37  ;;  %v1655_v42 = vpop.f32.mrf.mxu0  ;;  %v7767_v63 = vld [vmem:[#allocation26_spill] sm:$0xff] }
 0x29c   :  { %v2792_v38 = vand.u32 2147483647, %v7049_v24  ;;  %v7102_v28 = vadd.f32 1.0, %v4074_v22  ;;  %4077 = vpow2.f32 %v3693_v62  ;;  %v1861_v41 = vadd.f32 %v1702_v29, %v7755_v7  ;;  %vm7110_vm12 = vmor %vm2224_vm11, %vm2225_vm10  ;;  %v1704_v23 = vpop.f32.mrf.mxu1  ;;  %v1753_v26 = vpop.f32.mrf.mxu2  ;;  %v7769_v29 = vld [vmem:[#allocation75_spill] sm:$0xff]  ;;  %v7770_v22 = vld [vmem:[#allocation76_spill] sm:$0xff] }
 0x29d   :  { %2978 = vst [vmem:[%s7283_s8 + $0x48] sm:$0xff] %v2962_v34  ;;  %4079 = vtanh.f32 %v7015_v9  ;;  %v2785_v8 = vsub.f32 1.0, %v2784_v61  ;;  %v1862_v52 = vadd.f32 %v1800_v48, %v7756_v3  ;;  %v2228_v46 = vand.u32 2147483647, %v7754_v37  ;;  %v1802_v17 = vpop.f32.mrf.mxu3  ;;  %v7771_v34 = vld [vmem:[#allocation25_spill] sm:$0xff]  ;;  %v2887_v48 = vld [vmem:[%s7281_s2 + $0x70] sm:$0xff] }
 0x29e   :  { %vm2788_vm13 = vweird.f32 %v7049_v24  ;;  %v2794_v55 = vand.u32 2147483648, %v7049_v24  ;;  %4081 = vrcp.f32 %v7102_v28  ;;  %v2227_v9 = vsel %vm7110_vm12, %v6458_v13, %v7089_v6  ;;  %v7773_v3 = vld [vmem:[#allocation74_spill] sm:$0xff] }
 0x29f   :  { %v4076_v30 = vpop.eup %4075  ;;  %v2786_v44 = vmul.f32 %v4072_v1, %v2785_v8  ;;  %vm2789_vm14 = vweird.f32 %v4072_v1  ;;  %v1935_v56 = vadd.f32 %v6247_v57, %v1861_v41  ;;  %v1936_v49 = vadd.f32 %v6266_v19, %v1862_v52 }
 0x2a0   :  { %vm7124_vm0 = vcmp.eq.f32.partialorder %v2792_v38, 8.507059e+37  ;;  %v2917_v31 = vmul.f32 %v4076_v30, %v6949_v16  ;;  %v2230_v12 = vand.u32 2147483648, %v7754_v37  ;;  %v2527_v14 = vadd.f32 %v7752_v10, %v7761_v15  ;;  %vm2790_vm2 = vmor %vm2788_vm13, %vm2789_vm14  ;;  %v7772_v37 = vld [vmem:[#allocation58_spill] sm:$0xff] }
 0x2a1   :  { %v2787_v0 = vadd.f32 %v4072_v1, %v2786_v44  ;;  %4083 = vtanh.f32 %v1935_v56  ;;  %v3694_v13 = vmul.f32 -1.442695, %v1936_v49  ;;  %vm7132_vm1 = vcmp.eq.f32.partialorder %v2228_v46, 8.507059e+37 }
 0x2a2   :  { %v4078_v47 = vpop.eup %4077  ;;  %v2795_v58 = vor.u32 1.1754944e-38, %v2794_v55  ;;  %v2933_v16 = vadd.f32 %v2917_v31, %v6995_v18  ;;  %v1705_v32 = vadd.f32 %v1704_v23, %v1655_v42  ;;  %v2532_v53 = vand.u32 2147483647, %v7753_v4 }
 0x2a3   :  { %v4080_v36 = vpop.eup %4079  ;;  %v2791_v51 = vsel %vm2790_vm2, %v4072_v1, %v2787_v0  ;;  %v7148_v24 = vadd.f32 1.0, %v4078_v47  ;;  %4085 = vpow2.f32 %v3694_v13  ;;  %v1803_v40 = vadd.f32 %v1802_v17, %v1753_v26  ;;  %v7777_v47 = vld [vmem:[#allocation12_spill] sm:$0xff] }
 0x2a4   :  { %v4082_v18 = vpop.eup %4081  ;;  %v2796_v50 = vsel %vm7124_vm0, %v2795_v58, %v2791_v51  ;;  %2997 = vst [vmem:[%s7282_s9 + $0x60] sm:$0xff] %v2933_v16  ;;  %v1865_v25 = vadd.f32 %v1705_v32, %v7766_v39  ;;  %v2231_v43 = vor.u32 1.1754944e-38, %v2230_v12  ;;  %v2531_v45 = vsel %vm7144_vm3, %v7752_v10, %v2527_v14  ;;  %v1706_v44 = vpop.f32.mrf.mxu1 }
 0x2a5   :  { %v2963_v11 = vmul.f32 %v4080_v36, %v2796_v50  ;;  %v2799_v20 = vmul.f32 %v4082_v18, %v7102_v28  ;;  %v2807_v6 = vand.u32 2147483647, %v7102_v28  ;;  %4087 = vrcp.f32 %v7148_v24  ;;  %v1804_v32 = vpop.f32.mrf.mxu3  ;;  %v7778_v36 = vld [vmem:[#allocation78_spill] sm:$0xff] }
 0x2a6   :  { %v2809_v1 = vand.u32 2147483648, %v7102_v28  ;;  %v1939_v4 = vadd.f32 %v6247_v57, %v1865_v25  ;;  %vm2533_vm15 = vcmp.eq.f32.partialorder %v2532_v53, 8.507059e+37  ;;  %v7768_v62 = vsub.f32 1.0, %v7767_v63 }
 0x2a7   :  { %v4084_v5 = vpop.eup %4083  ;;  %vm2544_vm4 = vweird.f32 %v7770_v22  ;;  %2979 = vst [vmem:[%s7283_s8 + $0x50] sm:$0xff] %v2963_v11  ;;  %4089 = vtanh.f32 %v7079_v54  ;;  %v2800_v10 = vsub.f32 1.0, %v2799_v20  ;;  %v2536_v61 = vsel %vm2533_vm15, %v7771_v34, %v2531_v45 }
 0x2a8   :  { %v2237_v21 = vmul.f32 %v7769_v29, %v7768_v62  ;;  %v1866_v38 = vadd.f32 %v1803_v40, %v7772_v37  ;;  %vm2803_vm5 = vweird.f32 %v7102_v28  ;;  %v2918_v7 = vmul.f32 %v4084_v5, %v7084_v60 }
 0x2a9   :  { %v2232_v41 = vsel %vm7132_vm1, %v2231_v43, %v2227_v9  ;;  %4091 = vtanh.f32 %v1939_v4  ;;  %v4086_v8 = vpop.eup %4085  ;;  %vm2543_vm6 = vweird.f32 %v7773_v3  ;;  %v2801_v54 = vmul.f32 %v4082_v18, %v2800_v10  ;;  %v1657_v9 = vpop.f32.mrf.mxu0 }
 0x2aa   :  { %vm2804_vm7 = vweird.f32 %v4082_v18  ;;  %vm7182_vm8 = vcmp.eq.f32.partialorder %v2807_v6, 8.507059e+37  ;;  %v1940_v27 = vadd.f32 %v6266_v19, %v1866_v38  ;;  %v2810_v46 = vor.u32 1.1754944e-38, %v2809_v1  ;;  %vm7233_vm14 = vmor %vm2543_vm6, %vm2544_vm4 }
 0x2ab   :  { %v7188_v55 = vadd.f32 %v2918_v7, %v7086_v35  ;;  %v7190_v60 = vadd.f32 1.0, %v4086_v8  ;;  %v2903_v30 = vmul.f32 %v2887_v48, %v2536_v61  ;;  %v4088_v56 = vpop.eup %4087  ;;  %v2802_v49 = vadd.f32 %v4082_v18, %v2801_v54  ;;  %vm2805_vm9 = vmor %vm2803_vm5, %vm2804_vm7  ;;  %v7776_v35 = vld [vmem:[#allocation73_spill] sm:$0xff] }
 0x2ac   :  { %v3695_v2 = vmul.f32 -1.442695, %v1940_v27  ;;  %v1707_v31 = vadd.f32 %v1706_v44, %v1657_v9  ;;  %v7193_v12 = vadd.f32 %v7769_v29, %v2237_v21  ;;  %4093 = vtanh.f32 %v2933_v16  ;;  %v1755_v16 = vpop.f32.mrf.mxu2 }
 0x2ad   :  { %v2814_v15 = vmul.f32 %v4088_v56, %v7148_v24  ;;  %2998 = vst [vmem:[%s7282_s9 + $0x68] sm:$0xff] %v7188_v55  ;;  %vm2239_vm10 = vweird.f32 %v7776_v35  ;;  %vm2240_vm11 = vweird.f32 %v7769_v29  ;;  %v4090_v14 = vpop.eup %4089  ;;  %v2806_v0 = vsel %vm2805_vm9, %v4082_v18, %v2802_v49 }
 0x2ae   :  { %v2822_v13 = vand.u32 2147483647, %v7148_v24  ;;  %v2824_v42 = vand.u32 2147483648, %v7148_v24  ;;  %4095 = vrcp.f32 %v7190_v60  ;;  %v2811_v23 = vsel %vm7182_vm8, %v2810_v46, %v2806_v0  ;;  %vm7224_vm13 = vmor %vm2239_vm10, %vm2240_vm11 }
 0x2af   :  { %v4092_v28 = vpop.eup %4091  ;;  %v2815_v33 = vsub.f32 1.0, %v2814_v15  ;;  %4097 = vpow2.f32 %v3695_v2  ;;  %v1869_v58 = vadd.f32 %v1707_v31, %v7777_v47  ;;  %v2964_v53 = vmul.f32 %v4090_v14, %v2811_v23 }
 0x2b0   :  { %v2919_v26 = vmul.f32 %v4092_v28, %v2232_v41  ;;  %v2243_v17 = vand.u32 2147483647, %v7776_v35  ;;  %v2542_v59 = vadd.f32 %v7770_v22, %v7778_v36  ;;  %vm2819_vm12 = vweird.f32 %v4088_v56 }
 0x2b1   :  { %v2816_v51 = vmul.f32 %v4088_v56, %v2815_v33  ;;  %v1943_v40 = vadd.f32 %v6247_v57, %v1869_v58  ;;  %v2245_v18 = vand.u32 2147483648, %v7776_v35  ;;  %v7779_v50 = vand.u32 2147483648, %v7773_v3  ;;  %2980 = vst [vmem:[%s7283_s8 + $0x58] sm:$0xff] %v2964_v53 }
 0x2b2   :  { %v2935_v25 = vadd.f32 %v2919_v26, %v2903_v30  ;;  %v2547_v57 = vand.u32 2147483647, %v7773_v3  ;;  %v1805_v45 = vadd.f32 %v1804_v32, %v1755_v16  ;;  %v4094_v11 = vpop.eup %4093  ;;  %vm2818_vm0 = vweird.f32 %v7148_v24  ;;  %v7784_v24 = vld [vmem:[#allocation59_spill] sm:$0xff] }
 0x2b3   :  { %v2550_v39 = vor.u32 1.1754944e-38, %v7779_v50  ;;  %v2817_v6 = vadd.f32 %v4088_v56, %v2816_v51  ;;  %v2242_v1 = vsel %vm7224_vm13, %v7769_v29, %v7193_v12  ;;  %4099 = vtanh.f32 %v1943_v40  ;;  %vm2820_vm1 = vmor %vm2818_vm0, %vm2819_vm12 }
 0x2b4   :  { %v4096_v4 = vpop.eup %4095  ;;  %vm2823_vm2 = vcmp.eq.f32.partialorder %v2822_v13, 8.507059e+37  ;;  %v2825_v63 = vor.u32 1.1754944e-38, %v2824_v42  ;;  %2999 = vst [vmem:[%s7282_s9 + $0x70] sm:$0xff] %v2935_v25  ;;  %v2546_v62 = vsel %vm7233_vm14, %v7770_v22, %v2542_v59  ;;  %v1870_v21 = vadd.f32 %v1805_v45, %v7784_v24  ;;  %v2888_v22 = vld [vmem:[%s7281_s2 + $0x78] sm:$0xff] }
 0x2b5   :  { %v4098_v5 = vpop.eup %4097  ;;  %v2821_v10 = vsel %vm2820_vm1, %v4088_v56, %v2817_v6  ;;  %v2829_v29 = vmul.f32 %v4096_v4, %v7190_v60  ;;  %vm2244_vm3 = vcmp.eq.f32.partialorder %v2243_v17, 8.507059e+37  ;;  %v2246_v34 = vor.u32 1.1754944e-38, %v2245_v18 }
 0x2b6   :  { %v2826_v61 = vsel %vm2823_vm2, %v2825_v63, %v2821_v10  ;;  %v2631_v48 = vadd.f32 1.0, %v4098_v5  ;;  %vm2548_vm15 = vcmp.eq.f32.partialorder %v2547_v57, 8.507059e+37  ;;  %v1944_v37 = vadd.f32 %v6266_v19, %v1870_v21 }
 0x2b7   :  { %v2965_v38 = vmul.f32 %v4094_v11, %v2826_v61  ;;  %4101 = vtanh.f32 %v7188_v55  ;;  %v2830_v7 = vsub.f32 1.0, %v2829_v29  ;;  %v2551_v41 = vsel %vm2548_vm15, %v2550_v39, %v2546_v62 }
 0x2b8   :  { %v2839_v8 = vand.u32 2147483648, %v7190_v60  ;;  %4103 = vrcp.f32 %v2631_v48  ;;  %v2247_v3 = vsel %vm2244_vm3, %v2246_v34, %v2242_v1  ;;  %vm2834_vm4 = vweird.f32 %v4096_v4 }
 0x2b9   :  { %v4100_v54 = vpop.eup %4099  ;;  %2981 = vst [vmem:[%s7283_s8 + $0x60] sm:$0xff] %v2965_v38  ;;  %v2831_v52 = vmul.f32 %v4096_v4, %v2830_v7  ;;  %v2837_v19 = vand.u32 2147483647, %v7190_v60  ;;  %v3696_v27 = vmul.f32 -1.442695, %v1944_v37  ;;  %v2904_v46 = vmul.f32 %v2888_v22, %v2551_v41 }
 0x2ba   :  { %v2920_v55 = vmul.f32 %v4100_v54, %v2247_v3  ;;  %vm2833_vm5 = vweird.f32 %v7190_v60  ;;  %v2840_v9 = vor.u32 1.1754944e-38, %v2839_v8  ;;  %v2854_v14 = vand.u32 2147483648, %v2631_v48 }
 0x2bb   :  { %v2832_v30 = vadd.f32 %v4096_v4, %v2831_v52  ;;  %4105 = vpow2.f32 %v3696_v27  ;;  %vm2835_vm6 = vmor %vm2833_vm5, %vm2834_vm4  ;;  %vm2838_vm7 = vcmp.eq.f32.partialorder %v2837_v19, 8.507059e+37  ;;  %v2852_v42 = vand.u32 2147483647, %v2631_v48 }
 0x2bc   :  { %v2936_v44 = vadd.f32 %v2920_v55, %v2904_v46  ;;  %4107 = vtanh.f32 %v2935_v25  ;;  %vm2848_vm9 = vweird.f32 %v2631_v48  ;;  %v2855_v23 = vor.u32 1.1754944e-38, %v2854_v14 }
 0x2bd   :  { %v4102_v56 = vpop.eup %4101  ;;  %v2836_v49 = vsel %vm2835_vm6, %v4096_v4, %v2832_v30  ;;  %vm2853_vm11 = vcmp.eq.f32.partialorder %v2852_v42, 8.507059e+37 }
 0x2be   :  { %v4104_v2 = vpop.eup %4103  ;;  %v2841_v31 = vsel %vm2838_vm7, %v2840_v9, %v2836_v49  ;;  %3000 = vst [vmem:[%s7282_s9 + $0x78] sm:$0xff] %v2936_v44 }
 0x2bf   :  { %v2966_v12 = vmul.f32 %v4102_v56, %v2841_v31  ;;  %v2844_v15 = vmul.f32 %v4104_v2, %v2631_v48  ;;  %vm2849_vm8 = vweird.f32 %v4104_v2 }
 0x2c0   :  { %vm2850_vm10 = vmor %vm2848_vm9, %vm2849_vm8 }
 0x2c1   :  { %v4106_v35 = vpop.eup %4105  ;;  %2982 = vst [vmem:[%s7283_s8 + $0x68] sm:$0xff] %v2966_v12  ;;  %v2845_v60 = vsub.f32 1.0, %v2844_v15 }
 0x2c2   :  { %v2632_v0 = vadd.f32 1.0, %v4106_v35  ;;  %v4108_v47 = vpop.eup %4107 }
 0x2c3   :  { %v2846_v13 = vmul.f32 %v4104_v2, %v2845_v60 }
 0x2c4   :  { %4109 = vrcp.f32 %v2632_v0  ;;  %v2869_v17 = vand.u32 2147483648, %v2632_v0  ;;  %v2867_v59 = vand.u32 2147483647, %v2632_v0  ;;  %vm2863_vm13 = vweird.f32 %v2632_v0 }
 0x2c5   :  { %v2847_v28 = vadd.f32 %v4104_v2, %v2846_v13  ;;  %4111 = vtanh.f32 %v2936_v44 }
 0x2c6   :  { %v2870_v40 = vor.u32 1.1754944e-38, %v2869_v17  ;;  %vm2868_vm0 = vcmp.eq.f32.partialorder %v2867_v59, 8.507059e+37 }
 0x2c7   :  { %v2851_v33 = vsel %vm2850_vm10, %v4104_v2, %v2847_v28 }
 0x2c8   :  { %v2856_v58 = vsel %vm2853_vm11, %v2855_v23, %v2851_v33 }
 0x2c9   :  { %v2967_v16 = vmul.f32 %v4108_v47, %v2856_v58 }
 0x2ca   :  { %v4110_v32 = vpop.eup %4109 }
 0x2cb   :  { %2983 = vst [vmem:[%s7283_s8 + $0x70] sm:$0xff] %v2967_v16  ;;  %v2859_v53 = vmul.f32 %v4110_v32, %v2632_v0  ;;  %vm2864_vm12 = vweird.f32 %v4110_v32  ;;  %v4112_v50 = vpop.eup %4111 }
 0x2cc   :  { %vm2865_vm14 = vmor %vm2863_vm13, %vm2864_vm12 }
 0x2cd   :  { %v2860_v26 = vsub.f32 1.0, %v2859_v53 }
 0x2cf   :  { %v2861_v36 = vmul.f32 %v4110_v32, %v2860_v26 }
 0x2d1   :  { %v2862_v51 = vadd.f32 %v4110_v32, %v2861_v36 }
 0x2d3   :  { %v2866_v18 = vsel %vm2865_vm14, %v4110_v32, %v2862_v51 }
 0x2d4   :  { %v2871_v39 = vsel %vm2868_vm0, %v2870_v40, %v2866_v18 }
 0x2d5   :  { %v2968_v25 = vmul.f32 %v4112_v50, %v2871_v39 }
 0x2d7   :  { %2984 = vst [vmem:[%s7283_s8 + $0x78] sm:$0xff] %v2968_v25 }

</bundles_post_ra>
